<compile_context>
chip_gen: v5e
topology: v5e:2x2
jax: 0.10.0
libtpu: 0.0.40
codegen_flags: <defaults>
</compile_context>

<pallas_src>
import functools

import jax
import jax.numpy as jnp
from jax.experimental import pallas as pl
from jax.experimental.pallas import tpu as pltpu


# ---------------------------------------------------------------------------
# Pallas kernels
# ---------------------------------------------------------------------------

def _dwconv3x3_kernel(x_ref, w_ref, b_ref, o_ref):
    """Depthwise 3x3 conv, stride 1, zero 'same' padding handled in-kernel.

    x_ref: (Bb, H, W, C) NHWC block
    w_ref: (3, 3, C)     per-channel taps
    b_ref: (1, C)        bias
    o_ref: (Bb, H, W, C)
    """
    Bb, H, W, C = x_ref.shape
    x = x_ref[...].astype(jnp.float32)
    w = w_ref[...].astype(jnp.float32)
    b = b_ref[...].astype(jnp.float32)

    zcol = jnp.zeros((Bb, H, 1, C), jnp.float32)
    zrow = jnp.zeros((Bb, 1, W, C), jnp.float32)
    # One zero-pad along W (sublane concat) + 2 static slices replace the 9
    # shifted copies of the old padded-in-HBM variant.  dh offsets are handled
    # by a zero-pad along H (non-minor axis: cheap vreg stacking) + slicing.
    # TODO(synk): pltpu.roll(axis=-2) could turn the two dw!=0 slices into XLU
    # rotates once its roll direction is verified on this toolchain.
    x_wpad = jnp.concatenate([zcol, x, zcol], axis=2)        # (Bb, H, W+2, C)

    acc = jnp.zeros((Bb, H, W, C), jnp.float32)
    for kw in range(3):                                      # dw = kw - 1
        xs = x if kw == 1 else x_wpad[:, :, kw:kw + W, :]
        xs_hpad = jnp.concatenate([zrow, xs, zrow], axis=1)  # (Bb, H+2, W, C)
        for kh in range(3):                                  # dh = kh - 1
            acc = acc + xs_hpad[:, kh:kh + H, :, :] * w[kh, kw]
    o_ref[...] = (acc + b).astype(o_ref.dtype)


def _band_attn_kernel(q_ref, k_ref, v_ref, lepe_ref, o_ref, *,
                      scale, num_heads, W_sp):
    """Windowed multi-head attention + LePE for one (1, H_sp, W, C) band.

    The band holds nW = W // W_sp complete windows side by side; each window
    is attended independently (batched einsum over the window axis) with all
    heads fused along the channel dim.
    """
    _, H_sp, W, C = q_ref.shape
    nW = W // W_sp
    N = H_sp * W_sp
    hd = C // num_heads

    def gather_windows(ref):
        x = ref[0]                                           # (H_sp, W, C), native dtype
        if nW == 1:
            return x.reshape(1, N, C)
        parts = [x[:, j * W_sp:(j + 1) * W_sp, :].reshape(1, N, C)
                 for j in range(nW)]
        return jnp.concatenate(parts, axis=0)                # (nW, N, C)

    q = gather_windows(q_ref)
    k = gather_windows(k_ref)
    v = gather_windows(v_ref)
    lepe = gather_windows(lepe_ref).astype(jnp.float32)

    outs = []
    for h in range(num_heads):                               # short static loop
        lo = h * hd
        qh = q[:, :, lo:lo + hd]                             # (nW, N, hd), native dtype
        kh = k[:, :, lo:lo + hd]
        vh = v[:, :, lo:lo + hd]

        # scores in f32; scale applied to the (small) f32 scores, not to q.
        s = jnp.einsum("gqd,gkd->gqk", qh, kh,
                       preferred_element_type=jnp.float32) * scale   # (nW, N, N)
        m = jnp.max(s, axis=-1, keepdims=True)
        e = jnp.exp(s - m)                                   # f32
        denom = jnp.sum(e, axis=-1, keepdims=True)           # (nW, N, 1) f32
        oh = jnp.einsum("gqk,gkd->gqd", e.astype(vh.dtype), vh,
                        preferred_element_type=jnp.float32)  # (nW, N, hd) f32
        # deferred softmax normalization: N/hd fewer multiplies than scaling e.
        outs.append(oh * pl.reciprocal(denom, approx=False))

    out = jnp.concatenate(outs, axis=-1) + lepe              # (nW, N, C) f32

    # Scatter windows back into band layout and store exactly once
    # (no per-head masked sub-lane stores).
    if nW == 1:
        band = out.reshape(H_sp, W_sp, C)
    else:
        band = jnp.concatenate(
            [out[j].reshape(H_sp, W_sp, C) for j in range(nW)], axis=1)
    o_ref[0] = band.astype(o_ref.dtype)


# ---------------------------------------------------------------------------
# VMEM-budget helpers (generation aware)
# ---------------------------------------------------------------------------

def _vmem_plan():
    """Returns (per-kernel VMEM working-set budget, vmem_limit_bytes)."""
    cap = 64 * 1024 * 1024                      # conservative fallback (v7x-sized)
    try:
        cap = int(getattr(pltpu.get_tpu_info(), "vmem_capacity_bytes", cap))
    except Exception:                           # non-TPU / unsupported query
        pass
    # ~3/8 of physical VMEM: ~48 MiB on 128-MiB parts (v5e/v6e), ~24 MiB on
    # v7x (64 MiB physical, two TensorCores sharing pressure).
    budget = max(8 * 1024 * 1024, (cap * 3) // 8)
    limit = int(min(cap, (budget * 4) // 3))    # scoped limit with headroom
    return budget, limit


def _largest_divisor_at_most(n, cap):
    cap = max(1, min(n, cap))
    for d in range(cap, 0, -1):
        if n % d == 0:
            return d
    return 1


def _pick_batch_block(B, H, W, C, itemsize, budget):
    img = H * W * C
    # 2x double-buffered in + out pipeline streams (input dtype) plus in-kernel
    # f32 temps (x, x_wpad, xs, xs_hpad, acc ~ 6 block-sized f32 arrays).
    per_image = 4 * img * int(itemsize) + 6 * img * 4
    cap = max(1, budget // max(per_image, 1))
    if B > 1:
        cap = min(cap, max(1, B // 2))          # keep >= 2 grid steps (v7x megacore)
    return _largest_divisor_at_most(B, cap)


# ---------------------------------------------------------------------------
# Pallas wrappers
# ---------------------------------------------------------------------------

def dwconv3x3(x_nhwc, w, b):
    """x_nhwc: (B, H, W, C); w: (3, 3, C); b: (C,) -> (B, H, W, C)"""
    B, H, W, C = x_nhwc.shape
    budget, vmem_limit = _vmem_plan()
    bb = _pick_batch_block(B, H, W, C, x_nhwc.dtype.itemsize, budget)
    return pl.pallas_call(
        _dwconv3x3_kernel,
        out_shape=jax.ShapeDtypeStruct((B, H, W, C), x_nhwc.dtype),
        grid=(B // bb,),
        in_specs=[
            pl.BlockSpec((bb, H, W, C), lambda i: (i, 0, 0, 0)),
            pl.BlockSpec((3, 3, C), lambda i: (0, 0, 0)),
            pl.BlockSpec((1, C), lambda i: (0, 0)),
        ],
        out_specs=pl.BlockSpec((bb, H, W, C), lambda i: (i, 0, 0, 0)),
        compiler_params=pltpu.CompilerParams(
            dimension_semantics=("parallel",),
            vmem_limit_bytes=vmem_limit),
    )(x_nhwc, w, b.reshape(1, C))


def eda_window_attention(q_img, k_img, v_img, lepe_img, *,
                         scale, num_heads, H_sp, W_sp):
    """q/k/v/lepe images: (B, H, W, C) -> attended image (B, H, W, C).

    Window gather/scatter is done by the BlockSpecs: each grid step gets one
    (1, H_sp, W, C) band holding W // W_sp complete windows.
    """
    B, H, W, C = q_img.shape
    nWh = H // H_sp
    _, vmem_limit = _vmem_plan()
    kernel = functools.partial(_band_attn_kernel, scale=scale,
                               num_heads=num_heads, W_sp=W_sp)
    spec = pl.BlockSpec((1, H_sp, W, C), lambda b, i: (b, i, 0, 0))
    # TODO(synk): for very large windows (idx == -1 on big images) the band
    # plus the f32 (N, N) score temps may exceed the VMEM budget; that case
    # needs a flash-style online-softmax split over N.
    return pl.pallas_call(
        kernel,
        out_shape=jax.ShapeDtypeStruct((B, H, W, C), q_img.dtype),
        grid=(B, nWh),
        in_specs=[spec, spec, spec, spec],
        out_specs=spec,
        compiler_params=pltpu.CompilerParams(
            dimension_semantics=("parallel", "parallel"),
            vmem_limit_bytes=vmem_limit),
    )(q_img, k_img, v_img, lepe_img)


# ---------------------------------------------------------------------------
# Forward pass (no host-side window transposes at all)
# ---------------------------------------------------------------------------

def _window_sizes(idx, H, W, split_size):
    if idx == -1:
        return H, W
    if idx == 0:
        return H, split_size
    if idx == 1:
        return split_size, W
    raise ValueError(f"ERROR MODE {idx}")


def eda_attention(q, k, v, H, W, conv_w, conv_b, *,
                  num_heads, split_size, idx, qk_scale=None):
    """Forward pass of EDA_Attention. q/k/v: (B, L, C), L = H*W."""
    B, L, C = q.shape
    head_dim = C // num_heads
    scale = qk_scale if qk_scale is not None else head_dim ** (-0.5)
    H_sp, W_sp = _window_sizes(idx, H, W, split_size)

    # (B, L, C) row-major over (H, W) is exactly (B, H, W, C): free reshape,
    # equivalent to torch's B,L,C -> B,C,H,W -> NHWC round trip.
    q_img = q.reshape(B, H, W, C)
    k_img = k.reshape(B, H, W, C)
    v_img = v.reshape(B, H, W, C)

    # LePE: depthwise 3x3 conv on v (Pallas kernel), stays in image layout.
    lepe_img = dwconv3x3(v_img, conv_w, conv_b)

    # Windowed attention with the window gather/scatter fused into the kernel.
    out_img = eda_window_attention(q_img, k_img, v_img, lepe_img,
                                   scale=scale, num_heads=num_heads,
                                   H_sp=H_sp, W_sp=W_sp)
    # TODO(synk): attn_drop (nn.Dropout) is identity for p=0.0 / eval mode.
    return out_img.reshape(B, L, C)


# ---------------------------------------------------------------------------
# Pure-JAX reference (mirrors the PyTorch forward literally; independent of
# the fused image-layout path used above)
# ---------------------------------------------------------------------------

def windows2img(win, H_sp, W_sp, H, W):
    """win: (B*nW, H_sp*W_sp, C) -> (B, H, W, C)"""
    B = win.shape[0] // (H * W // H_sp // W_sp)
    x = win.reshape(B, H // H_sp, W // W_sp, H_sp, W_sp, -1)
    x = jnp.transpose(x, (0, 1, 3, 2, 4, 5))
    return x.reshape(B, H, W, -1)


def _img2windows_nchw(img, H_sp, W_sp):
    B, C, H, W = img.shape
    x = img.reshape(B, C, H // H_sp, H_sp, W // W_sp, W_sp)
    return jnp.transpose(x, (0, 2, 4, 3, 5, 1)).reshape(-1, H_sp * W_sp, C)


def _window_nchw_heads(x, H_sp, W_sp, num_heads):
    B, C, H, W = x.shape
    x = x.reshape(B, C, H // H_sp, H_sp, W // W_sp, W_sp)
    x = jnp.transpose(x, (0, 2, 4, 1, 3, 5)).reshape(-1, C, H_sp, W_sp)
    x = x.reshape(-1, num_heads, C // num_heads, H_sp * W_sp)
    return jnp.transpose(x, (0, 1, 3, 2))


def eda_attention_reference(q, k, v, H, W, conv_w, conv_b, *,
                            num_heads, split_size, idx, qk_scale=None):
    B, L, C = q.shape
    hd = C // num_heads
    scale = qk_scale if qk_scale is not None else hd ** (-0.5)
    H_sp, W_sp = _window_sizes(idx, H, W, split_size)
    N = H_sp * W_sp

    def im2cswin(x):
        xc = jnp.transpose(x, (0, 2, 1)).reshape(B, C, H, W)
        xw = _img2windows_nchw(xc, H_sp, W_sp)
        xw = xw.reshape(-1, N, num_heads, hd)
        return jnp.transpose(xw, (0, 2, 1, 3))

    qw = im2cswin(q)
    kw = im2cswin(k)

    v_nchw = jnp.transpose(v, (0, 2, 1)).reshape(B, C, H, W)
    v_nhwc = jnp.transpose(v_nchw, (0, 2, 3, 1))
    lepe_nhwc = jax.lax.conv_general_dilated(
        v_nhwc, conv_w.reshape(3, 3, 1, C), (1, 1), "SAME",
        dimension_numbers=("NHWC", "HWIO", "NHWC"),
        feature_group_count=C) + conv_b
    lepe_nchw = jnp.transpose(lepe_nhwc, (0, 3, 1, 2))

    vw = _window_nchw_heads(v_nchw, H_sp, W_sp, num_heads)
    lw = _window_nchw_heads(lepe_nchw, H_sp, W_sp, num_heads)

    attn = jnp.einsum("whqd,whkd->whqk", qw * scale, kw)
    attn = jax.nn.softmax(attn, axis=-1)
    x = jnp.einsum("whqk,whkd->whqd", attn, vw) + lw

    x = jnp.transpose(x, (0, 2, 1, 3)).reshape(-1, N, C)
    x = windows2img(x, H_sp, W_sp, H, W).reshape(B, -1, C)
    return x


# ---------------------------------------------------------------------------
# Main
# ---------------------------------------------------------------------------

if __name__ == "__main__":
    B, H, W = 2, 8, 8
    C = 32                  # dim
    num_heads = 4
    split_size = 4
    idx = 0                 # H_sp = H, W_sp = split_size

    key = jax.random.PRNGKey(0)
    kq, kk, kv, kwgt, kb = jax.random.split(key, 5)
    q = jax.random.normal(kq, (B, H * W, C), jnp.float32)
    k = jax.random.normal(kk, (B, H * W, C), jnp.float32)
    v = jax.random.normal(kv, (B, H * W, C), jnp.float32)
    # deterministic depthwise-conv params (Conv2d(dim, dim, 3, groups=dim))
    conv_w = jax.random.normal(kwgt, (3, 3, C), jnp.float32) * 0.1
    conv_b = jax.random.normal(kb, (C,), jnp.float32) * 0.1

    fwd = jax.jit(lambda q_, k_, v_, cw_, cb_: eda_attention(
        q_, k_, v_, H, W, cw_, cb_,
        num_heads=num_heads, split_size=split_size, idx=idx))
    out = jax.block_until_ready(fwd(q, k, v, conv_w, conv_b))

    ref = eda_attention_reference(q, k, v, H, W, conv_w, conv_b,
                                  num_heads=num_heads, split_size=split_size,
                                  idx=idx)
    assert out.shape == (B, H * W, C), out.shape
    max_err = float(jnp.max(jnp.abs(out - ref)))
    assert jnp.allclose(out, ref, rtol=1e-4, atol=1e-4), max_err

    print("KERNEL_OK")
</pallas_src>

<mosaic_0001>
module attributes {stable_mosaic.version = 11 : i64} {
  func.func @_dwconv3x3_kernel(%arg0: i32, %arg1: memref<1x8x8x32xf32, #tpu.memory_space<vmem>>, %arg2: memref<3x3x32xf32, #tpu.memory_space<vmem>>, %arg3: memref<1x32xf32, #tpu.memory_space<vmem>>, %arg4: memref<1x8x8x32xf32, #tpu.memory_space<vmem>>) attributes {dimension_semantics = [#tpu.dimension_semantics<parallel>], iteration_bounds = array<i64: 2>, scalar_prefetch = 0 : i64, scratch_operands = 0 : i64, tpu.core_type = #tpu.core_type<tc>, window_params = [{transform_indices = @transform_0, window_bounds = array<i64: 1, 8, 8, 32>}, {pipeline_mode = #tpu.pipeline_mode<synchronous>, transform_indices = @transform_1, window_bounds = array<i64: 3, 3, 32>}, {pipeline_mode = #tpu.pipeline_mode<synchronous>, transform_indices = @transform_2, window_bounds = array<i64: 1, 32>}, {transform_indices = @transform_3, window_bounds = array<i64: 1, 8, 8, 32>}]} {
    %c0 = arith.constant 0 : index
    %c0_0 = arith.constant 0 : index
    %c0_1 = arith.constant 0 : index
    %c0_2 = arith.constant 0 : index
    %0 = vector.load %arg1[%c0, %c0_0, %c0_1, %c0_2] : memref<1x8x8x32xf32, #tpu.memory_space<vmem>>, vector<1x8x8x32xf32>
    %c0_3 = arith.constant 0 : index
    %c0_4 = arith.constant 0 : index
    %c0_5 = arith.constant 0 : index
    %1 = vector.load %arg2[%c0_3, %c0_4, %c0_5] : memref<3x3x32xf32, #tpu.memory_space<vmem>>, vector<3x3x32xf32>
    %c0_6 = arith.constant 0 : index
    %c0_7 = arith.constant 0 : index
    %2 = vector.load %arg3[%c0_6, %c0_7] : memref<1x32xf32, #tpu.memory_space<vmem>>, vector<1x32xf32>
    %cst = arith.constant 0.000000e+00 : f32
    %3 = vector.broadcast %cst : f32 to vector<1x8x1x32xf32>
    %cst_8 = arith.constant 0.000000e+00 : f32
    %4 = vector.broadcast %cst_8 : f32 to vector<1x1x8x32xf32>
    %5 = tpu.concatenate %3, %0, %3 in 2 : vector<1x8x1x32xf32>, vector<1x8x8x32xf32>, vector<1x8x1x32xf32> -> vector<1x8x10x32xf32>
    %cst_9 = arith.constant 0.000000e+00 : f32
    %6 = vector.broadcast %cst_9 : f32 to vector<1x8x8x32xf32>
    %7 = vector.extract_strided_slice %5 {offsets = [0, 0, 0, 0], sizes = [1, 8, 8, 32], strides = [1, 1, 1, 1]} : vector<1x8x10x32xf32> to vector<1x8x8x32xf32>
    %8 = tpu.concatenate %4, %7, %4 in 1 : vector<1x1x8x32xf32>, vector<1x8x8x32xf32>, vector<1x1x8x32xf32> -> vector<1x10x8x32xf32>
    %9 = vector.extract_strided_slice %8 {offsets = [0, 0, 0, 0], sizes = [1, 8, 8, 32], strides = [1, 1, 1, 1]} : vector<1x10x8x32xf32> to vector<1x8x8x32xf32>
    %10 = vector.extract_strided_slice %1 {offsets = [0, 0, 0], sizes = [1, 1, 32], strides = [1, 1, 1]} : vector<3x3x32xf32> to vector<1x1x32xf32>
    %11 = vector.shape_cast %10 : vector<1x1x32xf32> to vector<32xf32>
    %12 = vector.shape_cast %11 : vector<32xf32> to vector<1x1x1x32xf32>
    %13 = vector.broadcast %12 : vector<1x1x1x32xf32> to vector<1x8x8x32xf32>
    %14 = arith.mulf %9, %13 : vector<1x8x8x32xf32>
    %15 = arith.addf %6, %14 : vector<1x8x8x32xf32>
    %16 = vector.extract_strided_slice %8 {offsets = [0, 1, 0, 0], sizes = [1, 8, 8, 32], strides = [1, 1, 1, 1]} : vector<1x10x8x32xf32> to vector<1x8x8x32xf32>
    %17 = vector.extract_strided_slice %1 {offsets = [1, 0, 0], sizes = [1, 1, 32], strides = [1, 1, 1]} : vector<3x3x32xf32> to vector<1x1x32xf32>
    %18 = vector.shape_cast %17 : vector<1x1x32xf32> to vector<32xf32>
    %19 = vector.shape_cast %18 : vector<32xf32> to vector<1x1x1x32xf32>
    %20 = vector.broadcast %19 : vector<1x1x1x32xf32> to vector<1x8x8x32xf32>
    %21 = arith.mulf %16, %20 : vector<1x8x8x32xf32>
    %22 = arith.addf %15, %21 : vector<1x8x8x32xf32>
    %23 = vector.extract_strided_slice %8 {offsets = [0, 2, 0, 0], sizes = [1, 8, 8, 32], strides = [1, 1, 1, 1]} : vector<1x10x8x32xf32> to vector<1x8x8x32xf32>
    %24 = vector.extract_strided_slice %1 {offsets = [2, 0, 0], sizes = [1, 1, 32], strides = [1, 1, 1]} : vector<3x3x32xf32> to vector<1x1x32xf32>
    %25 = vector.shape_cast %24 : vector<1x1x32xf32> to vector<32xf32>
    %26 = vector.shape_cast %25 : vector<32xf32> to vector<1x1x1x32xf32>
    %27 = vector.broadcast %26 : vector<1x1x1x32xf32> to vector<1x8x8x32xf32>
    %28 = arith.mulf %23, %27 : vector<1x8x8x32xf32>
    %29 = arith.addf %22, %28 : vector<1x8x8x32xf32>
    %30 = tpu.concatenate %4, %0, %4 in 1 : vector<1x1x8x32xf32>, vector<1x8x8x32xf32>, vector<1x1x8x32xf32> -> vector<1x10x8x32xf32>
    %31 = vector.extract_strided_slice %30 {offsets = [0, 0, 0, 0], sizes = [1, 8, 8, 32], strides = [1, 1, 1, 1]} : vector<1x10x8x32xf32> to vector<1x8x8x32xf32>
    %32 = vector.extract_strided_slice %1 {offsets = [0, 1, 0], sizes = [1, 1, 32], strides = [1, 1, 1]} : vector<3x3x32xf32> to vector<1x1x32xf32>
    %33 = vector.shape_cast %32 : vector<1x1x32xf32> to vector<32xf32>
    %34 = vector.shape_cast %33 : vector<32xf32> to vector<1x1x1x32xf32>
    %35 = vector.broadcast %34 : vector<1x1x1x32xf32> to vector<1x8x8x32xf32>
    %36 = arith.mulf %31, %35 : vector<1x8x8x32xf32>
    %37 = arith.addf %29, %36 : vector<1x8x8x32xf32>
    %38 = vector.extract_strided_slice %30 {offsets = [0, 1, 0, 0], sizes = [1, 8, 8, 32], strides = [1, 1, 1, 1]} : vector<1x10x8x32xf32> to vector<1x8x8x32xf32>
    %39 = vector.extract_strided_slice %1 {offsets = [1, 1, 0], sizes = [1, 1, 32], strides = [1, 1, 1]} : vector<3x3x32xf32> to vector<1x1x32xf32>
    %40 = vector.shape_cast %39 : vector<1x1x32xf32> to vector<32xf32>
    %41 = vector.shape_cast %40 : vector<32xf32> to vector<1x1x1x32xf32>
    %42 = vector.broadcast %41 : vector<1x1x1x32xf32> to vector<1x8x8x32xf32>
    %43 = arith.mulf %38, %42 : vector<1x8x8x32xf32>
    %44 = arith.addf %37, %43 : vector<1x8x8x32xf32>
    %45 = vector.extract_strided_slice %30 {offsets = [0, 2, 0, 0], sizes = [1, 8, 8, 32], strides = [1, 1, 1, 1]} : vector<1x10x8x32xf32> to vector<1x8x8x32xf32>
    %46 = vector.extract_strided_slice %1 {offsets = [2, 1, 0], sizes = [1, 1, 32], strides = [1, 1, 1]} : vector<3x3x32xf32> to vector<1x1x32xf32>
    %47 = vector.shape_cast %46 : vector<1x1x32xf32> to vector<32xf32>
    %48 = vector.shape_cast %47 : vector<32xf32> to vector<1x1x1x32xf32>
    %49 = vector.broadcast %48 : vector<1x1x1x32xf32> to vector<1x8x8x32xf32>
    %50 = arith.mulf %45, %49 : vector<1x8x8x32xf32>
    %51 = arith.addf %44, %50 : vector<1x8x8x32xf32>
    %52 = vector.extract_strided_slice %5 {offsets = [0, 0, 2, 0], sizes = [1, 8, 8, 32], strides = [1, 1, 1, 1]} : vector<1x8x10x32xf32> to vector<1x8x8x32xf32>
    %53 = tpu.concatenate %4, %52, %4 in 1 : vector<1x1x8x32xf32>, vector<1x8x8x32xf32>, vector<1x1x8x32xf32> -> vector<1x10x8x32xf32>
    %54 = vector.extract_strided_slice %53 {offsets = [0, 0, 0, 0], sizes = [1, 8, 8, 32], strides = [1, 1, 1, 1]} : vector<1x10x8x32xf32> to vector<1x8x8x32xf32>
    %55 = vector.extract_strided_slice %1 {offsets = [0, 2, 0], sizes = [1, 1, 32], strides = [1, 1, 1]} : vector<3x3x32xf32> to vector<1x1x32xf32>
    %56 = vector.shape_cast %55 : vector<1x1x32xf32> to vector<32xf32>
    %57 = vector.shape_cast %56 : vector<32xf32> to vector<1x1x1x32xf32>
    %58 = vector.broadcast %57 : vector<1x1x1x32xf32> to vector<1x8x8x32xf32>
    %59 = arith.mulf %54, %58 : vector<1x8x8x32xf32>
    %60 = arith.addf %51, %59 : vector<1x8x8x32xf32>
    %61 = vector.extract_strided_slice %53 {offsets = [0, 1, 0, 0], sizes = [1, 8, 8, 32], strides = [1, 1, 1, 1]} : vector<1x10x8x32xf32> to vector<1x8x8x32xf32>
    %62 = vector.extract_strided_slice %1 {offsets = [1, 2, 0], sizes = [1, 1, 32], strides = [1, 1, 1]} : vector<3x3x32xf32> to vector<1x1x32xf32>
    %63 = vector.shape_cast %62 : vector<1x1x32xf32> to vector<32xf32>
    %64 = vector.shape_cast %63 : vector<32xf32> to vector<1x1x1x32xf32>
    %65 = vector.broadcast %64 : vector<1x1x1x32xf32> to vector<1x8x8x32xf32>
    %66 = arith.mulf %61, %65 : vector<1x8x8x32xf32>
    %67 = arith.addf %60, %66 : vector<1x8x8x32xf32>
    %68 = vector.extract_strided_slice %53 {offsets = [0, 2, 0, 0], sizes = [1, 8, 8, 32], strides = [1, 1, 1, 1]} : vector<1x10x8x32xf32> to vector<1x8x8x32xf32>
    %69 = vector.extract_strided_slice %1 {offsets = [2, 2, 0], sizes = [1, 1, 32], strides = [1, 1, 1]} : vector<3x3x32xf32> to vector<1x1x32xf32>
    %70 = vector.shape_cast %69 : vector<1x1x32xf32> to vector<32xf32>
    %71 = vector.shape_cast %70 : vector<32xf32> to vector<1x1x1x32xf32>
    %72 = vector.broadcast %71 : vector<1x1x1x32xf32> to vector<1x8x8x32xf32>
    %73 = arith.mulf %68, %72 : vector<1x8x8x32xf32>
    %74 = arith.addf %67, %73 : vector<1x8x8x32xf32>
    %75 = vector.shape_cast %2 : vector<1x32xf32> to vector<1x1x1x32xf32>
    %76 = vector.broadcast %75 : vector<1x1x1x32xf32> to vector<1x8x8x32xf32>
    %77 = arith.addf %74, %76 : vector<1x8x8x32xf32>
    %c0_10 = arith.constant 0 : index
    %c0_11 = arith.constant 0 : index
    %c0_12 = arith.constant 0 : index
    %c0_13 = arith.constant 0 : index
    %78 = vector.load %arg4[%c0_10, %c0_11, %c0_12, %c0_13] : memref<1x8x8x32xf32, #tpu.memory_space<vmem>>, vector<1x8x8x32xf32>
    tpu.vector_store %arg4[%c0_10, %c0_11, %c0_12, %c0_13], %77 {strides = array<i32>} : memref<1x8x8x32xf32, #tpu.memory_space<vmem>>, vector<1x8x8x32xf32>,
    return
  }
  func.func @transform_0(%arg0: i32) -> (i32, i32, i32, i32) {
    %c0_i32 = arith.constant 0 : i32
    %c0_i32_0 = arith.constant 0 : i32
    %c0_i32_1 = arith.constant 0 : i32
    %c0_i32_2 = arith.constant 0 : i32
    return %arg0, %c0_i32, %c0_i32_0, %c0_i32_1 : i32, i32, i32, i32
  }
  func.func @transform_1(%arg0: i32) -> (i32, i32, i32) {
    %c0_i32 = arith.constant 0 : i32
    %c0_i32_0 = arith.constant 0 : i32
    %c0_i32_1 = arith.constant 0 : i32
    %c0_i32_2 = arith.constant 0 : i32
    return %c0_i32, %c0_i32_0, %c0_i32_1 : i32, i32, i32
  }
  func.func @transform_2(%arg0: i32) -> (i32, i32) {
    %c0_i32 = arith.constant 0 : i32
    %c0_i32_0 = arith.constant 0 : i32
    %c0_i32_1 = arith.constant 0 : i32
    return %c0_i32, %c0_i32_0 : i32, i32
  }
  func.func @transform_3(%arg0: i32) -> (i32, i32, i32, i32) {
    %c0_i32 = arith.constant 0 : i32
    %c0_i32_0 = arith.constant 0 : i32
    %c0_i32_1 = arith.constant 0 : i32
    %c0_i32_2 = arith.constant 0 : i32
    return %arg0, %c0_i32, %c0_i32_0, %c0_i32_1 : i32, i32, i32, i32
  }
}

module attributes {stable_mosaic.version = 11 : i64} {
  func.func @_band_attn_kernel(%arg0: i32, %arg1: i32, %arg2: memref<1x8x8x32xf32, #tpu.memory_space<vmem>>, %arg3: memref<1x8x8x32xf32, #tpu.memory_space<vmem>>, %arg4: memref<1x8x8x32xf32, #tpu.memory_space<vmem>>, %arg5: memref<1x8x8x32xf32, #tpu.memory_space<vmem>>, %arg6: memref<1x8x8x32xf32, #tpu.memory_space<vmem>>) attributes {dimension_semantics = [#tpu.dimension_semantics<parallel>, #tpu.dimension_semantics<parallel>], iteration_bounds = array<i64: 2, 1>, scalar_prefetch = 0 : i64, scratch_operands = 0 : i64, tpu.core_type = #tpu.core_type<tc>, window_params = [{transform_indices = @transform_0, window_bounds = array<i64: 1, 8, 8, 32>}, {transform_indices = @transform_1, window_bounds = array<i64: 1, 8, 8, 32>}, {transform_indices = @transform_2, window_bounds = array<i64: 1, 8, 8, 32>}, {transform_indices = @transform_3, window_bounds = array<i64: 1, 8, 8, 32>}, {transform_indices = @transform_4, window_bounds = array<i64: 1, 8, 8, 32>}]} {
    %c0 = arith.constant 0 : index
    %c0_0 = arith.constant 0 : index
    %c0_1 = arith.constant 0 : index
    %c0_2 = arith.constant 0 : index
    %0 = vector.load %arg2[%c0, %c0_0, %c0_1, %c0_2] : memref<1x8x8x32xf32, #tpu.memory_space<vmem>>, vector<1x8x8x32xf32>
    %1 = vector.shape_cast %0 : vector<1x8x8x32xf32> to vector<8x8x32xf32>
    %2 = vector.extract_strided_slice %1 {offsets = [0, 0, 0], sizes = [8, 4, 32], strides = [1, 1, 1]} : vector<8x8x32xf32> to vector<8x4x32xf32>
    %3 = vector.shape_cast %2 : vector<8x4x32xf32> to vector<1x32x32xf32>
    %4 = vector.extract_strided_slice %1 {offsets = [0, 4, 0], sizes = [8, 4, 32], strides = [1, 1, 1]} : vector<8x8x32xf32> to vector<8x4x32xf32>
    %5 = vector.shape_cast %4 : vector<8x4x32xf32> to vector<1x32x32xf32>
    %6 = tpu.concatenate %3, %5 in 0 : vector<1x32x32xf32>, vector<1x32x32xf32> -> vector<2x32x32xf32>
    %c0_3 = arith.constant 0 : index
    %c0_4 = arith.constant 0 : index
    %c0_5 = arith.constant 0 : index
    %c0_6 = arith.constant 0 : index
    %7 = vector.load %arg3[%c0_3, %c0_4, %c0_5, %c0_6] : memref<1x8x8x32xf32, #tpu.memory_space<vmem>>, vector<1x8x8x32xf32>
    %8 = vector.shape_cast %7 : vector<1x8x8x32xf32> to vector<8x8x32xf32>
    %9 = vector.extract_strided_slice %8 {offsets = [0, 0, 0], sizes = [8, 4, 32], strides = [1, 1, 1]} : vector<8x8x32xf32> to vector<8x4x32xf32>
    %10 = vector.shape_cast %9 : vector<8x4x32xf32> to vector<1x32x32xf32>
    %11 = vector.extract_strided_slice %8 {offsets = [0, 4, 0], sizes = [8, 4, 32], strides = [1, 1, 1]} : vector<8x8x32xf32> to vector<8x4x32xf32>
    %12 = vector.shape_cast %11 : vector<8x4x32xf32> to vector<1x32x32xf32>
    %13 = tpu.concatenate %10, %12 in 0 : vector<1x32x32xf32>, vector<1x32x32xf32> -> vector<2x32x32xf32>
    %c0_7 = arith.constant 0 : index
    %c0_8 = arith.constant 0 : index
    %c0_9 = arith.constant 0 : index
    %c0_10 = arith.constant 0 : index
    %14 = vector.load %arg4[%c0_7, %c0_8, %c0_9, %c0_10] : memref<1x8x8x32xf32, #tpu.memory_space<vmem>>, vector<1x8x8x32xf32>
    %15 = vector.shape_cast %14 : vector<1x8x8x32xf32> to vector<8x8x32xf32>
    %16 = vector.extract_strided_slice %15 {offsets = [0, 0, 0], sizes = [8, 4, 32], strides = [1, 1, 1]} : vector<8x8x32xf32> to vector<8x4x32xf32>
    %17 = vector.shape_cast %16 : vector<8x4x32xf32> to vector<1x32x32xf32>
    %18 = vector.extract_strided_slice %15 {offsets = [0, 4, 0], sizes = [8, 4, 32], strides = [1, 1, 1]} : vector<8x8x32xf32> to vector<8x4x32xf32>
    %19 = vector.shape_cast %18 : vector<8x4x32xf32> to vector<1x32x32xf32>
    %20 = tpu.concatenate %17, %19 in 0 : vector<1x32x32xf32>, vector<1x32x32xf32> -> vector<2x32x32xf32>
    %c0_11 = arith.constant 0 : index
    %c0_12 = arith.constant 0 : index
    %c0_13 = arith.constant 0 : index
    %c0_14 = arith.constant 0 : index
    %21 = vector.load %arg5[%c0_11, %c0_12, %c0_13, %c0_14] : memref<1x8x8x32xf32, #tpu.memory_space<vmem>>, vector<1x8x8x32xf32>
    %22 = vector.shape_cast %21 : vector<1x8x8x32xf32> to vector<8x8x32xf32>
    %23 = vector.extract_strided_slice %22 {offsets = [0, 0, 0], sizes = [8, 4, 32], strides = [1, 1, 1]} : vector<8x8x32xf32> to vector<8x4x32xf32>
    %24 = vector.shape_cast %23 : vector<8x4x32xf32> to vector<1x32x32xf32>
    %25 = vector.extract_strided_slice %22 {offsets = [0, 4, 0], sizes = [8, 4, 32], strides = [1, 1, 1]} : vector<8x8x32xf32> to vector<8x4x32xf32>
    %26 = vector.shape_cast %25 : vector<8x4x32xf32> to vector<1x32x32xf32>
    %27 = tpu.concatenate %24, %26 in 0 : vector<1x32x32xf32>, vector<1x32x32xf32> -> vector<2x32x32xf32>
    %28 = vector.extract_strided_slice %6 {offsets = [0, 0, 0], sizes = [2, 32, 8], strides = [1, 1, 1]} : vector<2x32x32xf32> to vector<2x32x8xf32>
    %29 = vector.extract_strided_slice %13 {offsets = [0, 0, 0], sizes = [2, 32, 8], strides = [1, 1, 1]} : vector<2x32x32xf32> to vector<2x32x8xf32>
    %30 = vector.extract_strided_slice %20 {offsets = [0, 0, 0], sizes = [2, 32, 8], strides = [1, 1, 1]} : vector<2x32x32xf32> to vector<2x32x8xf32>
    "tpu.trace_start"() <{level = 10 : i32, message = "gqd,gkd->gqk"}> : () -> ()
    %cst = arith.constant dense<0.000000e+00> : vector<2x32x32xf32>
    %31 = tpu.matmul %28, %29, %cst {dimension_numbers = #tpu.dot_dimension_numbers<[2], [2], [1], [1], [0, 0, 0, 1, 1, 1], [0], [0]>} : vector<2x32x8xf32>, vector<2x32x8xf32>, vector<2x32x32xf32> -> vector<2x32x32xf32>
    "tpu.trace_stop"() : () -> ()
    %cst_15 = arith.constant 0.353553385 : f32
    %32 = vector.broadcast %cst_15 : f32 to vector<2x32x32xf32>
    %33 = arith.mulf %31, %32 : vector<2x32x32xf32>
    %cst_16 = arith.constant dense<0xFF800000> : vector<2x32xf32>
    %34 = vector.multi_reduction <maximumf>, %33, %cst_16 [2] : vector<2x32x32xf32> to vector<2x32xf32>
    %35 = vector.shape_cast %34 : vector<2x32xf32> to vector<2x32x1xf32>
    %36 = vector.broadcast %35 : vector<2x32x1xf32> to vector<2x32x32xf32>
    %37 = arith.subf %33, %36 : vector<2x32x32xf32>
    %38 = math.exp %37 : vector<2x32x32xf32>
    %cst_17 = arith.constant dense<0.000000e+00> : vector<2x32xf32>
    %39 = vector.multi_reduction <add>, %38, %cst_17 [2] : vector<2x32x32xf32> to vector<2x32xf32>
    %40 = vector.shape_cast %39 : vector<2x32xf32> to vector<2x32x1xf32>
    "tpu.trace_start"() <{level = 10 : i32, message = "gqk,gkd->gqd"}> : () -> ()
    %cst_18 = arith.constant dense<0.000000e+00> : vector<2x32x8xf32>
    %41 = tpu.matmul %38, %30, %cst_18 {dimension_numbers = #tpu.dot_dimension_numbers<[2], [1], [1], [2], [0, 0, 0, 1, 1, 2], [0], [0]>} : vector<2x32x32xf32>, vector<2x32x8xf32>, vector<2x32x8xf32> -> vector<2x32x8xf32>
    "tpu.trace_stop"() : () -> ()
    %42 = tpu.reciprocal %40 : vector<2x32x1xf32> -> vector<2x32x1xf32>
    %43 = vector.broadcast %42 : vector<2x32x1xf32> to vector<2x32x8xf32>
    %44 = arith.mulf %41, %43 : vector<2x32x8xf32>
    %45 = vector.extract_strided_slice %6 {offsets = [0, 0, 8], sizes = [2, 32, 8], strides = [1, 1, 1]} : vector<2x32x32xf32> to vector<2x32x8xf32>
    %46 = vector.extract_strided_slice %13 {offsets = [0, 0, 8], sizes = [2, 32, 8], strides = [1, 1, 1]} : vector<2x32x32xf32> to vector<2x32x8xf32>
    %47 = vector.extract_strided_slice %20 {offsets = [0, 0, 8], sizes = [2, 32, 8], strides = [1, 1, 1]} : vector<2x32x32xf32> to vector<2x32x8xf32>
    "tpu.trace_start"() <{level = 10 : i32, message = "gqd,gkd->gqk"}> : () -> ()
    %cst_19 = arith.constant dense<0.000000e+00> : vector<2x32x32xf32>
    %48 = tpu.matmul %45, %46, %cst_19 {dimension_numbers = #tpu.dot_dimension_numbers<[2], [2], [1], [1], [0, 0, 0, 1, 1, 1], [0], [0]>} : vector<2x32x8xf32>, vector<2x32x8xf32>, vector<2x32x32xf32> -> vector<2x32x32xf32>
    "tpu.trace_stop"() : () -> ()
    %cst_20 = arith.constant 0.353553385 : f32
    %49 = vector.broadcast %cst_20 : f32 to vector<2x32x32xf32>
    %50 = arith.mulf %48, %49 : vector<2x32x32xf32>
    %cst_21 = arith.constant dense<0xFF800000> : vector<2x32xf32>
    %51 = vector.multi_reduction <maximumf>, %50, %cst_21 [2] : vector<2x32x32xf32> to vector<2x32xf32>
    %52 = vector.shape_cast %51 : vector<2x32xf32> to vector<2x32x1xf32>
    %53 = vector.broadcast %52 : vector<2x32x1xf32> to vector<2x32x32xf32>
    %54 = arith.subf %50, %53 : vector<2x32x32xf32>
    %55 = math.exp %54 : vector<2x32x32xf32>
    %cst_22 = arith.constant dense<0.000000e+00> : vector<2x32xf32>
    %56 = vector.multi_reduction <add>, %55, %cst_22 [2] : vector<2x32x32xf32> to vector<2x32xf32>
    %57 = vector.shape_cast %56 : vector<2x32xf32> to vector<2x32x1xf32>
    "tpu.trace_start"() <{level = 10 : i32, message = "gqk,gkd->gqd"}> : () -> ()
    %cst_23 = arith.constant dense<0.000000e+00> : vector<2x32x8xf32>
    %58 = tpu.matmul %55, %47, %cst_23 {dimension_numbers = #tpu.dot_dimension_numbers<[2], [1], [1], [2], [0, 0, 0, 1, 1, 2], [0], [0]>} : vector<2x32x32xf32>, vector<2x32x8xf32>, vector<2x32x8xf32> -> vector<2x32x8xf32>
    "tpu.trace_stop"() : () -> ()
    %59 = tpu.reciprocal %57 : vector<2x32x1xf32> -> vector<2x32x1xf32>
    %60 = vector.broadcast %59 : vector<2x32x1xf32> to vector<2x32x8xf32>
    %61 = arith.mulf %58, %60 : vector<2x32x8xf32>
    %62 = vector.extract_strided_slice %6 {offsets = [0, 0, 16], sizes = [2, 32, 8], strides = [1, 1, 1]} : vector<2x32x32xf32> to vector<2x32x8xf32>
    %63 = vector.extract_strided_slice %13 {offsets = [0, 0, 16], sizes = [2, 32, 8], strides = [1, 1, 1]} : vector<2x32x32xf32> to vector<2x32x8xf32>
    %64 = vector.extract_strided_slice %20 {offsets = [0, 0, 16], sizes = [2, 32, 8], strides = [1, 1, 1]} : vector<2x32x32xf32> to vector<2x32x8xf32>
    "tpu.trace_start"() <{level = 10 : i32, message = "gqd,gkd->gqk"}> : () -> ()
    %cst_24 = arith.constant dense<0.000000e+00> : vector<2x32x32xf32>
    %65 = tpu.matmul %62, %63, %cst_24 {dimension_numbers = #tpu.dot_dimension_numbers<[2], [2], [1], [1], [0, 0, 0, 1, 1, 1], [0], [0]>} : vector<2x32x8xf32>, vector<2x32x8xf32>, vector<2x32x32xf32> -> vector<2x32x32xf32>
    "tpu.trace_stop"() : () -> ()
    %cst_25 = arith.constant 0.353553385 : f32
    %66 = vector.broadcast %cst_25 : f32 to vector<2x32x32xf32>
    %67 = arith.mulf %65, %66 : vector<2x32x32xf32>
    %cst_26 = arith.constant dense<0xFF800000> : vector<2x32xf32>
    %68 = vector.multi_reduction <maximumf>, %67, %cst_26 [2] : vector<2x32x32xf32> to vector<2x32xf32>
    %69 = vector.shape_cast %68 : vector<2x32xf32> to vector<2x32x1xf32>
    %70 = vector.broadcast %69 : vector<2x32x1xf32> to vector<2x32x32xf32>
    %71 = arith.subf %67, %70 : vector<2x32x32xf32>
    %72 = math.exp %71 : vector<2x32x32xf32>
    %cst_27 = arith.constant dense<0.000000e+00> : vector<2x32xf32>
    %73 = vector.multi_reduction <add>, %72, %cst_27 [2] : vector<2x32x32xf32> to vector<2x32xf32>
    %74 = vector.shape_cast %73 : vector<2x32xf32> to vector<2x32x1xf32>
    "tpu.trace_start"() <{level = 10 : i32, message = "gqk,gkd->gqd"}> : () -> ()
    %cst_28 = arith.constant dense<0.000000e+00> : vector<2x32x8xf32>
    %75 = tpu.matmul %72, %64, %cst_28 {dimension_numbers = #tpu.dot_dimension_numbers<[2], [1], [1], [2], [0, 0, 0, 1, 1, 2], [0], [0]>} : vector<2x32x32xf32>, vector<2x32x8xf32>, vector<2x32x8xf32> -> vector<2x32x8xf32>
    "tpu.trace_stop"() : () -> ()
    %76 = tpu.reciprocal %74 : vector<2x32x1xf32> -> vector<2x32x1xf32>
    %77 = vector.broadcast %76 : vector<2x32x1xf32> to vector<2x32x8xf32>
    %78 = arith.mulf %75, %77 : vector<2x32x8xf32>
    %79 = vector.extract_strided_slice %6 {offsets = [0, 0, 24], sizes = [2, 32, 8], strides = [1, 1, 1]} : vector<2x32x32xf32> to vector<2x32x8xf32>
    %80 = vector.extract_strided_slice %13 {offsets = [0, 0, 24], sizes = [2, 32, 8], strides = [1, 1, 1]} : vector<2x32x32xf32> to vector<2x32x8xf32>
    %81 = vector.extract_strided_slice %20 {offsets = [0, 0, 24], sizes = [2, 32, 8], strides = [1, 1, 1]} : vector<2x32x32xf32> to vector<2x32x8xf32>
    "tpu.trace_start"() <{level = 10 : i32, message = "gqd,gkd->gqk"}> : () -> ()
    %cst_29 = arith.constant dense<0.000000e+00> : vector<2x32x32xf32>
    %82 = tpu.matmul %79, %80, %cst_29 {dimension_numbers = #tpu.dot_dimension_numbers<[2], [2], [1], [1], [0, 0, 0, 1, 1, 1], [0], [0]>} : vector<2x32x8xf32>, vector<2x32x8xf32>, vector<2x32x32xf32> -> vector<2x32x32xf32>
    "tpu.trace_stop"() : () -> ()
    %cst_30 = arith.constant 0.353553385 : f32
    %83 = vector.broadcast %cst_30 : f32 to vector<2x32x32xf32>
    %84 = arith.mulf %82, %83 : vector<2x32x32xf32>
    %cst_31 = arith.constant dense<0xFF800000> : vector<2x32xf32>
    %85 = vector.multi_reduction <maximumf>, %84, %cst_31 [2] : vector<2x32x32xf32> to vector<2x32xf32>
    %86 = vector.shape_cast %85 : vector<2x32xf32> to vector<2x32x1xf32>
    %87 = vector.broadcast %86 : vector<2x32x1xf32> to vector<2x32x32xf32>
    %88 = arith.subf %84, %87 : vector<2x32x32xf32>
    %89 = math.exp %88 : vector<2x32x32xf32>
    %cst_32 = arith.constant dense<0.000000e+00> : vector<2x32xf32>
    %90 = vector.multi_reduction <add>, %89, %cst_32 [2] : vector<2x32x32xf32> to vector<2x32xf32>
    %91 = vector.shape_cast %90 : vector<2x32xf32> to vector<2x32x1xf32>
    "tpu.trace_start"() <{level = 10 : i32, message = "gqk,gkd->gqd"}> : () -> ()
    %cst_33 = arith.constant dense<0.000000e+00> : vector<2x32x8xf32>
    %92 = tpu.matmul %89, %81, %cst_33 {dimension_numbers = #tpu.dot_dimension_numbers<[2], [1], [1], [2], [0, 0, 0, 1, 1, 2], [0], [0]>} : vector<2x32x32xf32>, vector<2x32x8xf32>, vector<2x32x8xf32> -> vector<2x32x8xf32>
    "tpu.trace_stop"() : () -> ()
    %93 = tpu.reciprocal %91 : vector<2x32x1xf32> -> vector<2x32x1xf32>
    %94 = vector.broadcast %93 : vector<2x32x1xf32> to vector<2x32x8xf32>
    %95 = arith.mulf %92, %94 : vector<2x32x8xf32>
    %96 = tpu.concatenate %44, %61, %78, %95 in 2 : vector<2x32x8xf32>, vector<2x32x8xf32>, vector<2x32x8xf32>, vector<2x32x8xf32> -> vector<2x32x32xf32>
    %97 = arith.addf %96, %27 : vector<2x32x32xf32>
    %98 = vector.extract_strided_slice %97 {offsets = [0, 0, 0], sizes = [1, 32, 32], strides = [1, 1, 1]} : vector<2x32x32xf32> to vector<1x32x32xf32>
    %99 = vector.shape_cast %98 : vector<1x32x32xf32> to vector<32x32xf32>
    %100 = vector.shape_cast %99 : vector<32x32xf32> to vector<8x4x32xf32>
    %101 = vector.extract_strided_slice %97 {offsets = [1, 0, 0], sizes = [1, 32, 32], strides = [1, 1, 1]} : vector<2x32x32xf32> to vector<1x32x32xf32>
    %102 = vector.shape_cast %101 : vector<1x32x32xf32> to vector<32x32xf32>
    %103 = vector.shape_cast %102 : vector<32x32xf32> to vector<8x4x32xf32>
    %104 = tpu.concatenate %100, %103 in 1 : vector<8x4x32xf32>, vector<8x4x32xf32> -> vector<8x8x32xf32>
    %c0_34 = arith.constant 0 : index
    %c0_35 = arith.constant 0 : index
    %c0_36 = arith.constant 0 : index
    %c0_37 = arith.constant 0 : index
    %105 = vector.load %arg6[%c0_34, %c0_35, %c0_36, %c0_37] : memref<1x8x8x32xf32, #tpu.memory_space<vmem>>, vector<1x8x8x32xf32>
    %106 = vector.shape_cast %105 : vector<1x8x8x32xf32> to vector<8x8x32xf32>
    %107 = vector.shape_cast %104 : vector<8x8x32xf32> to vector<1x8x8x32xf32>
    tpu.vector_store %arg6[%c0_34, %c0_35, %c0_36, %c0_37], %107 {strides = array<i32>} : memref<1x8x8x32xf32, #tpu.memory_space<vmem>>, vector<1x8x8x32xf32>,
    return
  }
  func.func @transform_0(%arg0: i32, %arg1: i32) -> (i32, i32, i32, i32) {
    %c0_i32 = arith.constant 0 : i32
    %c0_i32_0 = arith.constant 0 : i32
    %c0_i32_1 = arith.constant 0 : i32
    return %arg0, %arg1, %c0_i32, %c0_i32_0 : i32, i32, i32, i32
  }
  func.func @transform_1(%arg0: i32, %arg1: i32) -> (i32, i32, i32, i32) {
    %c0_i32 = arith.constant 0 : i32
    %c0_i32_0 = arith.constant 0 : i32
    %c0_i32_1 = arith.constant 0 : i32
    return %arg0, %arg1, %c0_i32, %c0_i32_0 : i32, i32, i32, i32
  }
  func.func @transform_2(%arg0: i32, %arg1: i32) -> (i32, i32, i32, i32) {
    %c0_i32 = arith.constant 0 : i32
    %c0_i32_0 = arith.constant 0 : i32
    %c0_i32_1 = arith.constant 0 : i32
    return %arg0, %arg1, %c0_i32, %c0_i32_0 : i32, i32, i32, i32
  }
  func.func @transform_3(%arg0: i32, %arg1: i32) -> (i32, i32, i32, i32) {
    %c0_i32 = arith.constant 0 : i32
    %c0_i32_0 = arith.constant 0 : i32
    %c0_i32_1 = arith.constant 0 : i32
    return %arg0, %arg1, %c0_i32, %c0_i32_0 : i32, i32, i32, i32
  }
  func.func @transform_4(%arg0: i32, %arg1: i32) -> (i32, i32, i32, i32) {
    %c0_i32 = arith.constant 0 : i32
    %c0_i32_0 = arith.constant 0 : i32
    %c0_i32_1 = arith.constant 0 : i32
    return %arg0, %arg1, %c0_i32, %c0_i32_0 : i32, i32, i32, i32
  }
}

</mosaic_0001>

<bundles_post_ra>
// kernel: _lambda_.2
= control target key start
LH: loop header
LB: loop body
LE: loop exit
PB: predicated region body
PF: predicated region fallthrough
CT: control target
= control target key end

     0   :  { %s551_s12 = smov 0   ;;  %s769_s0 = inlined_call_operand.vmem [shape: f32[2,8,8,32], index: 0, kind: input, shape index: {}]   ;;  %s770_s1 = inlined_call_operand.vmem [shape: f32[3,3,32], index: 1, kind: input, shape index: {}]   ;;  %s771_s2 = inlined_call_operand.vmem [shape: f32[1,32], index: 2, kind: input, shape index: {}]   ;;  %s772_s3 = inlined_call_operand.vmem [shape: f32[2,8,8,32], index: 3, kind: output, shape index: {}]  }
   0x1 LB: > { %s501_s13 = sadd.s32 4294967295, %s529_s12   ;;  %p505_p0 = scmp.ge.s32.totalorder %s529_s12, 1  ;;  %s529_s12 = sphi %s551_s12, %s13_s12  }
   0x2   : > { %p137_p1 = scmp.lt.s32.totalorder %s529_s12, 3 }
   0x4   : > { %p138_p2 = pnand %p505_p0, %p137_p1 }
   0x5   : > { %p161_p3 = scmp.lt.s32.totalorder (!%p138_p2), %s501_s13, 1 }
   0x6   : > { %141 = sbr.rel (%p138_p2) target bundleno = 75 (0x4b), region = 32 }
   0xb   : > { %v179_v0 = vld [vmem:[%s770_s1] sm:$0x7]  ;;  %s774_s13 = smov (!%p161_p3, %s501_s13), 1  ;;  %v180_v1 = vld [vmem:[%s770_s1 + $0x4] sm:$0x7]  ;;  %vm207_vm0 = vcmask 1040384  }
   0xc   : > { %v181_v2 = vld [vmem:[%s770_s1 + $0x8] sm:$0x7]  ;;  %v570_v3 = vperm.slane %v179_v0, 0  ;;  %v572_v4 = vperm.slane %v179_v0, 1  ;;  %s512_s20 = sshll.u32 %s774_s13, 6  ;;  %v575_v5 = vperm.slane %v180_v1, 1 }
   0xd   : > { %v577_v6 = vperm.slane %v179_v0, 2  ;;  %s584_s23 = scalar_lea.vmem %s769_s0, %s512_s20  ;;  %v586_v7 = vperm.slane %v180_v1, 0  ;;  %v588_v8 = vperm.slane %v181_v2, 0  ;;  %v593_v12 = vperm.slane %v181_v2, 1  ;;  %s673_s28 = scalar_lea.vmem %s772_s3, %s512_s20 }
   0xe   : > { %v171_v9 = vld [vmem:[%s584_s23] sm:$0xff]  ;;  %v172_v10 = vld [vmem:[%s584_s23 + $0x8] sm:$0xff]  ;;  %v225_v11 = vmul.f32 0.0, %v570_v3  ;;  %vm342_vm1 = vcmask 1045504   ;;  %v596_v13 = vld [vmem:[%s584_s23 + $0x10] sm:$0xff]  ;;  %v276_v16 = vmul.f32 0.0, %v572_v4 }
   0xf   : > { %v191_v14 = vrot.slane %v171_v9, 7  ;;  %v192_v15 = vrot.slane %v172_v10, 7  ;;  %v599_v17 = vperm.slane %v180_v1, 2  ;;  %v293_v18 = vmul.f32 %v575_v5, %v171_v9  ;;  %v618_v38 = vld [vmem:[%s584_s23 + $0x18] sm:$0xff]  ;;  %v638_v63 = vld [vmem:[%s584_s23 + $0x20] sm:$0xff] }
  0x10   : > { %v376_v19 = vmul.f32 0.0, %v577_v6  ;;  %v603_v20 = vperm.slane %v181_v2, 2  ;;  %v193_v21 = vrot.slane %v596_v13, 7  ;;  %v310_v39 = vmul.f32 %v593_v12, %v172_v10 }
  0x11   : > { %v208_v22 = vsel %vm207_vm0, 0.0, %v191_v14  ;;  %v209_v23 = vsel %vm207_vm0, 0.0, %v192_v15  ;;  %v216_v24 = vsel %vm207_vm0, %v191_v14, 0.0  ;;  %v217_v25 = vsel %vm207_vm0, %v192_v15, 0.0 }
  0x12   : > { %v226_v26 = vmul.f32 %v570_v3, %v208_v22  ;;  %v242_v27 = vmul.f32 %v586_v7, %v208_v22  ;;  %v259_v28 = vmul.f32 %v588_v8, %v209_v23  ;;  %v343_v29 = vrot.slane %v208_v22, 2 }
  0x13   : > { %v344_v30 = vrot.slane %v216_v24, 2  ;;  %v346_v31 = vrot.slane %v209_v23, 2  ;;  %v347_v32 = vrot.slane %v217_v25, 2  ;;  %v210_v33 = vsel %vm207_vm0, 0.0, %v193_v21 }
  0x14   : > { %v250_v34 = vadd.f32 %v242_v27, %v225_v11  ;;  %v218_v35 = vsel %vm207_vm0, %v193_v21, 0.0  ;;  %v243_v36 = vmul.f32 %v586_v7, %v209_v23  ;;  %v260_v37 = vmul.f32 %v588_v8, %v210_v33 }
  0x15   : > { %v277_v40 = vmul.f32 %v572_v4, %v171_v9  ;;  %v349_v41 = vrot.slane %v210_v33, 2  ;;  %v350_v42 = vrot.slane %v218_v35, 2  ;;  %v345_v44 = vsel %vm342_vm1, %v343_v29, %v344_v30  ;;  %v661_v35 = vld [vmem:[%s584_s23 + $0x28] sm:$0xff] }
  0x16   : > { %v267_v43 = vadd.f32 %v259_v28, %v250_v34  ;;  %v251_v45 = vadd.f32 %v243_v36, %v226_v26  ;;  %v294_v46 = vmul.f32 %v575_v5, %v172_v10  ;;  %v348_v47 = vsel %vm342_vm1, %v346_v31, %v347_v32 }
  0x17   : > { %v393_v48 = vmul.f32 %v599_v17, %v345_v44  ;;  %v311_v49 = vmul.f32 %v593_v12, %v596_v13  ;;  %v194_v50 = vrot.slane %v618_v38, 7  ;;  %v410_v52 = vmul.f32 %v603_v20, %v348_v47 }
  0x18   : > { %v284_v51 = vadd.f32 %v276_v16, %v267_v43  ;;  %v268_v53 = vadd.f32 %v260_v37, %v251_v45  ;;  %v227_v54 = vmul.f32 %v570_v3, %v209_v23  ;;  %v351_v55 = vsel %vm342_vm1, %v349_v41, %v350_v42 }
  0x19   : > { %v377_v56 = vmul.f32 %v577_v6, %v345_v44  ;;  %v211_v57 = vsel %vm207_vm0, 0.0, %v194_v50  ;;  %v244_v58 = vmul.f32 %v586_v7, %v210_v33  ;;  %v219_v61 = vsel %vm207_vm0, %v194_v50, 0.0 }
  0x1a   : > { %v301_v59 = vadd.f32 %v293_v18, %v284_v51  ;;  %v285_v60 = vadd.f32 %v277_v40, %v268_v53  ;;  %v261_v62 = vmul.f32 %v588_v8, %v211_v57  ;;  %vm437_vm2 = vcmask 261120  }
  0x1b   : > { %v394_v0 = vmul.f32 %v599_v17, %v348_v47  ;;  %v411_v1 = vmul.f32 %v603_v20, %v351_v55  ;;  %v252_v2 = vadd.f32 %v244_v58, %v227_v54  ;;  %v278_v9 = vmul.f32 %v572_v4, %v172_v10 }
  0x1c   : > { %v318_v11 = vadd.f32 %v310_v39, %v301_v59  ;;  %v302_v14 = vadd.f32 %v294_v46, %v285_v60  ;;  %v295_v15 = vmul.f32 %v575_v5, %v596_v13  ;;  %v352_v16 = vrot.slane %v211_v57, 2 }
  0x1d   : > { %v269_v18 = vadd.f32 %v261_v62, %v252_v2  ;;  %v353_v21 = vrot.slane %v219_v61, 2  ;;  %v195_v22 = vrot.slane %v638_v63, 7  ;;  %v228_v23 = vmul.f32 %v570_v3, %v210_v33  ;;  %v690_v2 = vld [vmem:[%s584_s23 + $0x30] sm:$0xff] }
  0x1e   : > { %v384_v24 = vadd.f32 %v376_v19, %v318_v11  ;;  %v319_v25 = vadd.f32 %v311_v49, %v302_v14  ;;  %v312_v26 = vmul.f32 %v593_v12, %v618_v38  ;;  %v245_v10 = vmul.f32 %v586_v7, %v211_v57  ;;  %v657_v19 = vld [vmem:[%s771_s2] ss:$0 sm:$0xff] }
  0x1f   : > { %v286_v27 = vadd.f32 %v278_v9, %v269_v18  ;;  %v378_v28 = vmul.f32 %v577_v6, %v348_v47  ;;  %v212_v29 = vsel %vm207_vm0, 0.0, %v195_v22  ;;  %v279_v30 = vmul.f32 %v572_v4, %v596_v13 }
  0x20   : > { %v401_v31 = vadd.f32 %v393_v48, %v384_v24  ;;  %v385_v32 = vadd.f32 %v377_v56, %v319_v25  ;;  %v253_v33 = vadd.f32 %v245_v10, %v228_v23  ;;  %v262_v34 = vmul.f32 %v588_v8, %v212_v29 }
  0x21   : > { %v303_v36 = vadd.f32 %v295_v15, %v286_v27  ;;  %v354_v37 = vsel %vm342_vm1, %v352_v16, %v353_v21  ;;  %v395_v39 = vmul.f32 %v599_v17, %v351_v55  ;;  %v220_v40 = vsel %vm207_vm0, %v195_v22, 0.0 }
  0x22   : > { %v418_v13 = vadd.f32 %v410_v52, %v401_v31  ;;  %v402_v41 = vadd.f32 %v394_v0, %v385_v32  ;;  %v270_v42 = vadd.f32 %v262_v34, %v253_v33  ;;  %v296_v43 = vmul.f32 %v575_v5, %v618_v38 }
  0x23   : > { %v320_v44 = vadd.f32 %v312_v26, %v303_v36  ;;  %v313_v45 = vmul.f32 %v593_v12, %v638_v63  ;;  %v355_v46 = vrot.slane %v212_v29, 2  ;;  %v196_v47 = vrot.slane %v661_v35, 7  ;;  %v178_v36 = vld [vmem:[%s584_s23 + $0x38] sm:$0xff] }
  0x24   : > { %v429_v48 = vadd.f32 %v657_v19, %v418_v13  ;;  %v419_v49 = vadd.f32 %v411_v1, %v402_v41  ;;  %v287_v50 = vadd.f32 %v279_v30, %v270_v42  ;;  %v356_v51 = vrot.slane %v220_v40, 2 }
  0x25   : > { %v386_v52 = vadd.f32 %v378_v28, %v320_v44  ;;  %v412_v53 = vmul.f32 %v603_v20, %v354_v37  ;;  %v379_v54 = vmul.f32 %v577_v6, %v351_v55  ;;  %v213_v56 = vsel %vm207_vm0, 0.0, %v196_v47 }
  0x26   : > { %438 = vst.msk [vmem:[%s673_s28] sm:$0xff] %vm437_vm2, %v429_v48  ;;  %v430_v58 = vadd.f32 %v657_v19, %v419_v49  ;;  %v304_v59 = vadd.f32 %v296_v43, %v287_v50  ;;  %v229_v60 = vmul.f32 %v570_v3, %v211_v57  ;;  %v246_v61 = vmul.f32 %v586_v7, %v212_v29 }
  0x27   : > { %v403_v62 = vadd.f32 %v395_v39, %v386_v52  ;;  %v396_v0 = vmul.f32 %v599_v17, %v354_v37  ;;  %v263_v1 = vmul.f32 %v588_v8, %v213_v56  ;;  %v357_v9 = vsel %vm342_vm1, %v355_v46, %v356_v51 }
  0x28   : > { %439 = vst.msk [vmem:[%s673_s28 + $0x8] sm:$0xff] %vm437_vm2, %v430_v58  ;;  %v321_v55 = vadd.f32 %v313_v45, %v304_v59  ;;  %v254_v11 = vadd.f32 %v246_v61, %v229_v60  ;;  %v280_v14 = vmul.f32 %v572_v4, %v618_v38  ;;  %v413_v57 = vmul.f32 %v603_v20, %v357_v9 }
  0x29   : > { %v420_v15 = vadd.f32 %v412_v53, %v403_v62  ;;  %v221_v16 = vsel %vm207_vm0, %v196_v47, 0.0  ;;  %v297_v18 = vmul.f32 %v575_v5, %v638_v63  ;;  %v197_v23 = vrot.slane %v690_v2, 7 }
  0x2a   : > { %v387_v21 = vadd.f32 %v379_v54, %v321_v55  ;;  %v271_v22 = vadd.f32 %v263_v1, %v254_v11  ;;  %v230_v24 = vmul.f32 %v570_v3, %v212_v29  ;;  %v314_v38 = vmul.f32 %v593_v12, %v661_v35 }
  0x2b   : > { %v431_v25 = vadd.f32 %v657_v19, %v420_v15  ;;  %v358_v26 = vrot.slane %v213_v56, 2  ;;  %v247_v10 = vmul.f32 %v586_v7, %v213_v56  ;;  %v359_v30 = vrot.slane %v221_v16, 2 }
  0x2c   : > { %v404_v27 = vadd.f32 %v396_v0, %v387_v21  ;;  %v288_v28 = vadd.f32 %v280_v14, %v271_v22  ;;  %v214_v31 = vsel %vm207_vm0, 0.0, %v197_v23  ;;  %v222_v32 = vsel %vm207_vm0, %v197_v23, 0.0 }
  0x2d   : > { %440 = vst.msk [vmem:[%s673_s28 + $0x10] sm:$0xff] %vm437_vm2, %v431_v25  ;;  %v255_v33 = vadd.f32 %v247_v10, %v230_v24  ;;  %v264_v29 = vmul.f32 %v588_v8, %v214_v31  ;;  %v281_v34 = vmul.f32 %v572_v4, %v638_v63  ;;  %v380_v13 = vmul.f32 %v577_v6, %v354_v37 }
  0x2e   : > { %v421_v39 = vadd.f32 %v413_v57, %v404_v27  ;;  %v305_v40 = vadd.f32 %v297_v18, %v288_v28  ;;  %v397_v41 = vmul.f32 %v599_v17, %v357_v9  ;;  %v298_v43 = vmul.f32 %v575_v5, %v661_v35 }
  0x2f   : > { %v272_v42 = vadd.f32 %v264_v29, %v255_v33  ;;  %v361_v44 = vrot.slane %v214_v31, 2  ;;  %v362_v45 = vrot.slane %v222_v32, 2  ;;  %v198_v48 = vrot.slane %v178_v36, 7 }
  0x30   : > { %v432_v46 = vadd.f32 %v657_v19, %v421_v39  ;;  %v322_v47 = vadd.f32 %v314_v38, %v305_v40  ;;  %v231_v63 = vmul.f32 %v570_v3, %v213_v56  ;;  %v360_v49 = vsel %vm342_vm1, %v358_v26, %v359_v30 }
  0x31   : > { %v289_v50 = vadd.f32 %v281_v34, %v272_v42  ;;  %v315_v37 = vmul.f32 %v593_v12, %v690_v2  ;;  %v248_v51 = vmul.f32 %v586_v7, %v214_v31  ;;  %v414_v53 = vmul.f32 %v603_v20, %v360_v49 }
  0x32   : > { %441 = vst.msk [vmem:[%s673_s28 + $0x18] sm:$0xff] %vm437_vm2, %v432_v46  ;;  %v388_v52 = vadd.f32 %v380_v13, %v322_v47  ;;  %v381_v54 = vmul.f32 %v577_v6, %v357_v9  ;;  %v215_v58 = vsel %vm207_vm0, 0.0, %v198_v48  ;;  %v282_v61 = vmul.f32 %v572_v4, %v661_v35 }
  0x33   : > { %v306_v59 = vadd.f32 %v298_v43, %v289_v50  ;;  %v256_v60 = vadd.f32 %v248_v51, %v231_v63  ;;  %v265_v56 = vmul.f32 %v588_v8, %v215_v58  ;;  %v363_v0 = vsel %vm342_vm1, %v361_v44, %v362_v45 }
  0x34   : > { %v405_v62 = vadd.f32 %v397_v41, %v388_v52  ;;  %v398_v1 = vmul.f32 %v599_v17, %v360_v49  ;;  %v249_v55 = vmul.f32 %v586_v7, %v215_v58  ;;  %v223_v14 = vsel %vm207_vm0, %v198_v48, 0.0 }
  0x35   : > { %v323_v11 = vadd.f32 %v315_v37, %v306_v59  ;;  %v273_v9 = vadd.f32 %v265_v56, %v256_v60  ;;  %v299_v15 = vmul.f32 %v575_v5, %v690_v2  ;;  %v415_v16 = vmul.f32 %v603_v20, %v363_v0 }
  0x36   : > { %v422_v57 = vadd.f32 %v414_v53, %v405_v62  ;;  %v232_v35 = vmul.f32 %v570_v3, %v214_v31  ;;  %v266_v18 = vmul.f32 0.0, %v588_v8  ;;  %v316_v23 = vmul.f32 %v593_v12, %v178_v36 }
  0x37   : > { %v389_v21 = vadd.f32 %v381_v54, %v323_v11  ;;  %v290_v22 = vadd.f32 %v282_v61, %v273_v9  ;;  %v364_v7 = vrot.slane %v215_v58, 2  ;;  %v365_v25 = vrot.slane %v223_v14, 2 }
  0x38   : > { %v433_v24 = vadd.f32 %v657_v19, %v422_v57  ;;  %v257_v38 = vadd.f32 %v249_v55, %v232_v35  ;;  %v283_v26 = vmul.f32 %v572_v4, %v690_v2  ;;  %v382_v28 = vmul.f32 %v577_v6, %v360_v49 }
  0x39   : > { %v406_v10 = vadd.f32 %v398_v1, %v389_v21  ;;  %v307_v27 = vadd.f32 %v299_v15, %v290_v22  ;;  %v300_v8 = vmul.f32 %v575_v5, %v178_v36  ;;  %v399_v32 = vmul.f32 %v599_v17, %v363_v0 }
  0x3a   : > { %442 = vst.msk [vmem:[%s673_s28 + $0x20] sm:$0xff] %vm437_vm2, %v433_v24  ;;  %v274_v3 = vadd.f32 %v266_v18, %v257_v38  ;;  %v366_v33 = vsel %vm342_vm1, %v364_v7, %v365_v25  ;;  %v317_v4 = vmul.f32 0.0, %v593_v12  ;;  %v383_v13 = vmul.f32 %v577_v6, %v363_v0 }
  0x3b   : > { %v423_v30 = vadd.f32 %v415_v16, %v406_v10  ;;  %v324_v31 = vadd.f32 %v316_v23, %v307_v27  ;;  %v416_v39 = vmul.f32 %v603_v20, %v366_v33  ;;  %v400_v41 = vmul.f32 %v599_v17, %v366_v33 }
  0x3c   : > { %v291_v29 = vadd.f32 %v283_v26, %v274_v3  ;;  %v417_v44 = vmul.f32 0.0, %v603_v20 }
  0x3d   : > { %v434_v2 = vadd.f32 %v657_v19, %v423_v30  ;;  %v390_v34 = vadd.f32 %v382_v28, %v324_v31 }
  0x3e   : > { %v308_v40 = vadd.f32 %v300_v8, %v291_v29 }
  0x3f   : > { %443 = vst.msk [vmem:[%s673_s28 + $0x28] sm:$0xff] %vm437_vm2, %v434_v2  ;;  %v407_v5 = vadd.f32 %v399_v32, %v390_v34 }
  0x40   : > { %v325_v36 = vadd.f32 %v317_v4, %v308_v40 }
  0x41   : > { %v424_v42 = vadd.f32 %v416_v39, %v407_v5 }
  0x42   : > { %v391_v43 = vadd.f32 %v383_v13, %v325_v36 }
  0x43   : > { %v435_v12 = vadd.f32 %v657_v19, %v424_v42 }
  0x44   : > { %v408_v45 = vadd.f32 %v400_v41, %v391_v43 }
  0x45   : > { %444 = vst.msk [vmem:[%s673_s28 + $0x30] sm:$0xff] %vm437_vm2, %v435_v12 }
  0x46   : > { %v425_v46 = vadd.f32 %v417_v44, %v408_v45 }
  0x48   : > { %v436_v47 = vadd.f32 %v657_v19, %v425_v46 }
  0x4a   : > { %445 = vst.msk [vmem:[%s673_s28 + $0x38] sm:$0xff] %vm437_vm2, %v436_v47 }
  0x4b PF: > { %s13_s12 = sadd.s32 1, %s529_s12  }
  0x4c   : > { %p10_p4 = scmp.ge.s32.totalorder %s13_s12, 4  }
  0x4e   :  { %12 = sbr.rel (!%p10_p4) target bundleno = 1 (0x1), region = 62 }

// kernel: _lambda_.3
= control target key start
LH: loop header
LB: loop body
LE: loop exit
PB: predicated region body
PF: predicated region fallthrough
CT: control target
= control target key end

     0   :  { %s3377_s15 = smov 0   ;;  %s3379_s16 = smov 0   ;;  %s4847_s0 = inlined_call_operand.vmem [shape: f32[2,8,8,32], index: 0, kind: input, shape index: {}]   ;;  %s4848_s1 = inlined_call_operand.vmem [shape: f32[2,8,8,32], index: 1, kind: input, shape index: {}]   ;;  %s4849_s2 = inlined_call_operand.vmem [shape: f32[2,8,8,32], index: 2, kind: input, shape index: {}]   ;;  %s4850_s3 = inlined_call_operand.vmem [shape: f32[2,8,8,32], index: 3, kind: input, shape index: {}]   ;;  %s4851_s4 = inlined_call_operand.vmem [shape: f32[2,8,8,32], index: 4, kind: output, shape index: {}]  }
   0x1   :  { %s3381_s17 = smov 0  }
   0x2 LB: > { %s26_s18 = sadd.s32 1, %s3340_s16  ;;  %p2990_p0 = scmp.ge.s32.totalorder %s3344_s17, 1  ;;  %s3344_s17 = sphi %s3381_s17, %s14_s17   ;;  %s3340_s16 = sphi %s3379_s16, %s4960_s16   ;;  %s3336_s15 = sphi %s3377_s15, %s4959_s15  }
   0x3   : > { %p28_p1 = scmp.ge.s32.totalorder %s26_s18, 2  ;;  %p234_p2 = scmp.lt.s32.totalorder %s3344_s17, 3 }
   0x5   : > { %s4962_s18 = smov (%p28_p1, %s26_s18), 0  ;;  %p235_p3 = pnand %p2990_p0, %p234_p2 }
   0x7   : > { %238 = sbr.rel (%p235_p3) target bundleno = 1197 (0x4ad), region = 36 }
   0xc   : > { %p296_p4 = scmp.lt.s32.totalorder %s3336_s15, 1  ;;  %vm527_vm0 = vcmask 64512   ;;  %s3346_s6 = smov 120   ;;  %vm664_vm1 = vcmask 261120  }
   0xd   : > { %s3347_s7 = smov 112   ;;  %s3348_s8 = smov 104  }
   0xe   : > { %s4964_s15 = smov (!%p296_p4, %s3336_s15), 1  ;;  %s3349_s9 = smov 8  }
   0xf   : > { %s3395_s19 = sshll.u32 %s4964_s15, 6  ;;  %s3350_s10 = smov 16  }
  0x10   : > { %s303_s22 = scalar_lea.vmem %s4847_s0, %s3395_s19  ;;  %s313_s25 = scalar_lea.vmem %s4848_s1, %s3395_s19 }
  0x11   : > { %v3401_v0 = vld [vmem:[%s303_s22 + $0x8] sm:$0xff]  ;;  %v3403_v1 = vld [vmem:[%s303_s22 + $0x10] sm:$0xff]  ;;  %v3405_v2 = vld [vmem:[%s303_s22 + $0x18] sm:$0xff]  ;;  %s323_s28 = scalar_lea.vmem %s4849_s2, %s3395_s19  ;;  %s333_s5 = scalar_lea.vmem %s4850_s3, %s3395_s19 }
  0x12   : > { %364 = vst.sshfl [vmem:[#allocation1 + $0x10] sm:$0xff pattern:$0x75316420] %v3401_v0  ;;  %v3410_v3 = vld [vmem:[%s303_s22 + $0x28] sm:$0xff]  ;;  %v3412_v4 = vld [vmem:[%s303_s22 + $0x30] sm:$0xff]  ;;  %v3414_v5 = vld [vmem:[%s303_s22] sm:$0xff]  ;;  %s4777_s14 = scalar_lea.vmem %s4851_s4, %s3395_s19 }
  0x13   : > { %367 = vst.sshfl [vmem:[#allocation1 + $0x20] sm:$0xff pattern:$0x75316420] %v3403_v1  ;;  %v3416_v6 = vld [vmem:[%s303_s22 + $0x38] sm:$0xff]  ;;  %v3432_v10 = vld [vmem:[%s303_s22 + $0x20] sm:$0xff]  ;;  %v3434_v11 = vld [vmem:[%s313_s25 + $0x8] sm:$0xff] }
  0x14   : > { %370 = vst.sshfl [vmem:[#allocation1 + $0x30] sm:$0xff pattern:$0x75316420] %v3405_v2  ;;  %v3436_v12 = vld [vmem:[%s313_s25 + $0x10] sm:$0xff]  ;;  %v3440_v14 = vld [vmem:[%s313_s25 + $0x18] sm:$0xff]  ;;  %v3452_v18 = vld [vmem:[%s313_s25] sm:$0xff] }
  0x15   : > { %361 = vst.sshfl [vmem:[#allocation1] sm:$0xff pattern:$0x75316420] %v3414_v5  ;;  %v3454_v19 = vld [vmem:[%s313_s25 + $0x28] sm:$0xff]  ;;  %v3456_v20 = vld [vmem:[%s313_s25 + $0x30] sm:$0xff]  ;;  %v3460_v22 = vld [vmem:[%s313_s25 + $0x38] sm:$0xff] }
  0x16   : > { %v3476_v26 = vld [vmem:[%s313_s25 + $0x20] sm:$0xff]  ;;  %v3478_v27 = vld [vmem:[%s323_s28 + $0x8] sm:$0xff]  ;;  %v3480_v28 = vld [vmem:[%s323_s28 + $0x10] sm:$0xff]  ;;  %s3351_s11 = smov 24  }
  0x17   : > { %v3484_v30 = vld [vmem:[%s323_s28 + $0x18] sm:$0xff]  ;;  %v3496_v34 = vld [vmem:[%s323_s28] sm:$0xff]  ;;  %v3498_v35 = vld [vmem:[%s323_s28 + $0x28] sm:$0xff] }
  0x18   : > { %v3500_v36 = vld [vmem:[%s323_s28 + $0x30] sm:$0xff]  ;;  %v3504_v38 = vld [vmem:[%s323_s28 + $0x38] sm:$0xff]  ;;  %v3520_v42 = vld [vmem:[%s323_s28 + $0x20] sm:$0xff] }
  0x19   : > { %v3418_v7 = vld [vmem:[#allocation1 + $0x11] ss:$2 sm:$0xff]  ;;  %4867 = vst [vmem:[#allocation2_spill] sm:$0xff] %v3500_v36  ;;  %v3522_v43 = vld [vmem:[%s333_s5 + $0x8] sm:$0xff]  ;;  %v3540_v50 = vld [vmem:[%s333_s5] sm:$0xff] }
  0x1a   : > { %v3421_v8 = vld [vmem:[#allocation1 + $0x21] ss:$2 sm:$0xff]  ;;  %375 = vst.sshfl [vmem:[#allocation1 + $0x10] sm:$0xff pattern:$0x75316420] %v3410_v3  ;;  %v3524_v44 = vld [vmem:[%s333_s5 + $0x10] sm:$0xff] }
  0x1b   : > { %v3424_v9 = vld [vmem:[#allocation1 + $0x31] ss:$2 sm:$0xff]  ;;  %377 = vst.sshfl [vmem:[#allocation1 + $0x20] sm:$0xff pattern:$0x75316420] %v3412_v4  ;;  %v3542_v51 = vld [vmem:[%s333_s5 + $0x28] sm:$0xff] }
  0x1c   : > { %379 = vst.sshfl [vmem:[#allocation1 + $0x30] sm:$0xff pattern:$0x75316420] %v3416_v6  ;;  %v3438_v13 = vld [vmem:[#allocation1 + $0x1] ss:$2 sm:$0xff]  ;;  %v3528_v46 = vld [vmem:[%s333_s5 + $0x18] sm:$0xff] }
  0x1d   : > { %373 = vst.sshfl [vmem:[#allocation1] sm:$0xff pattern:$0x75316420] %v3432_v10  ;;  %v3544_v52 = vld [vmem:[%s333_s5 + $0x30] sm:$0xff]  ;;  %v3548_v54 = vld [vmem:[%s333_s5 + $0x38] sm:$0xff]  ;;  %v3562_v58 = vld [vmem:[%s333_s5 + $0x20] sm:$0xff] }
  0x1e   : > { %4868 = vst [vmem:[#allocation3_spill] sm:$0xff] %v3504_v38 }
  0x1f   : > { %4869 = vst [vmem:[#allocation4_spill] sm:$0xff] %v3522_v43 }
  0x20   : > { %4870 = vst [vmem:[#allocation5_spill] sm:$0xff] %v3524_v44 }
  0x21   : > { %v3442_v15 = vld [vmem:[#allocation1 + $0x11] ss:$2 sm:$0xff]  ;;  %4871 = vst [vmem:[#allocation6_spill] sm:$0xff] %v3528_v46 }
  0x22   : > { %v3445_v16 = vld [vmem:[#allocation1 + $0x21] ss:$2 sm:$0xff]  ;;  %400 = vst.sshfl [vmem:[#allocation1 + $0x10] sm:$0xff pattern:$0x75316420] %v3434_v11 }
  0x23   : > { %v3448_v17 = vld [vmem:[#allocation1 + $0x31] ss:$2 sm:$0xff]  ;;  %403 = vst.sshfl [vmem:[#allocation1 + $0x20] sm:$0xff pattern:$0x75316420] %v3436_v12 }
  0x24   : > { %406 = vst.sshfl [vmem:[#allocation1 + $0x30] sm:$0xff pattern:$0x75316420] %v3440_v14  ;;  %v3458_v21 = vld [vmem:[#allocation1 + $0x1] ss:$2 sm:$0xff] }
  0x25   : > { %397 = vst.sshfl [vmem:[#allocation1] sm:$0xff pattern:$0x75316420] %v3452_v18 }
  0x26   : > { %4873 = vst [vmem:[#allocation8_spill] sm:$0xff] %v3540_v50 }
  0x27   : > { %4874 = vst [vmem:[#allocation9_spill] sm:$0xff] %v3542_v51 }
  0x28   : > { %4875 = vst [vmem:[#allocation10_spill] sm:$0xff] %v3544_v52 }
  0x29   : > { %v3462_v23 = vld [vmem:[#allocation1 + $0x11] ss:$2 sm:$0xff]  ;;  %4877 = vst [vmem:[#allocation12_spill] sm:$0xff] %v3548_v54 }
  0x2a   : > { %v3465_v24 = vld [vmem:[#allocation1 + $0x21] ss:$2 sm:$0xff]  ;;  %411 = vst.sshfl [vmem:[#allocation1 + $0x10] sm:$0xff pattern:$0x75316420] %v3454_v19 }
  0x2b   : > { %v3468_v25 = vld [vmem:[#allocation1 + $0x31] ss:$2 sm:$0xff]  ;;  %413 = vst.sshfl [vmem:[#allocation1 + $0x20] sm:$0xff pattern:$0x75316420] %v3456_v20 }
  0x2c   : > { %415 = vst.sshfl [vmem:[#allocation1 + $0x30] sm:$0xff pattern:$0x75316420] %v3460_v22  ;;  %v3482_v29 = vld [vmem:[#allocation1 + $0x1] ss:$2 sm:$0xff] }
  0x2d   : > { %409 = vst.sshfl [vmem:[#allocation1] sm:$0xff pattern:$0x75316420] %v3476_v26 }
  0x2e   : > { %4881 = vst [vmem:[#allocation16_spill] sm:$0xff] %v3562_v58 }
  0x31   : > { %v3486_v31 = vld [vmem:[#allocation1 + $0x11] ss:$2 sm:$0xff] }
  0x32   : > { %v3489_v32 = vld [vmem:[#allocation1 + $0x21] ss:$2 sm:$0xff]  ;;  %436 = vst.sshfl [vmem:[#allocation1 + $0x10] sm:$0xff pattern:$0x75316420] %v3478_v27 }
  0x33   : > { %v3492_v33 = vld [vmem:[#allocation1 + $0x31] ss:$2 sm:$0xff]  ;;  %439 = vst.sshfl [vmem:[#allocation1 + $0x20] sm:$0xff pattern:$0x75316420] %v3480_v28 }
  0x34   : > { %442 = vst.sshfl [vmem:[#allocation1 + $0x30] sm:$0xff pattern:$0x75316420] %v3484_v30  ;;  %v3502_v37 = vld [vmem:[#allocation1 + $0x1] ss:$2 sm:$0xff] }
  0x35   : > { %433 = vst.sshfl [vmem:[#allocation1] sm:$0xff pattern:$0x75316420] %v3496_v34 }
  0x39   : > { %v3506_v39 = vld [vmem:[#allocation1 + $0x11] ss:$2 sm:$0xff] }
  0x3a   : > { %v3509_v40 = vld [vmem:[#allocation1 + $0x21] ss:$2 sm:$0xff]  ;;  %447 = vst.sshfl [vmem:[#allocation1 + $0x10] sm:$0xff pattern:$0x75316420] %v3498_v35 }
  0x3b   : > { %v3512_v41 = vld [vmem:[#allocation1 + $0x31] ss:$2 sm:$0xff]  ;;  %449 = vst.sshfl [vmem:[#allocation1 + $0x20] sm:$0xff pattern:$0x75316420] %v3500_v36 }
  0x3c   : > { %451 = vst.sshfl [vmem:[#allocation1 + $0x30] sm:$0xff pattern:$0x75316420] %v3504_v38  ;;  %v3526_v45 = vld [vmem:[#allocation1 + $0x1] ss:$2 sm:$0xff] }
  0x3d   : > { %445 = vst.sshfl [vmem:[#allocation1] sm:$0xff pattern:$0x75316420] %v3520_v42 }
  0x41   : > { %v3530_v47 = vld [vmem:[#allocation1 + $0x11] ss:$2 sm:$0xff] }
  0x42   : > { %4872 = vst [vmem:[#allocation7_spill] sm:$0xff] %v3530_v47  ;;  %v3533_v48 = vld [vmem:[#allocation1 + $0x21] ss:$2 sm:$0xff] }
  0x43   : > { %472 = vst.sshfl [vmem:[#allocation1 + $0x10] sm:$0xff pattern:$0x75316420] %v3522_v43  ;;  %v3536_v49 = vld [vmem:[#allocation1 + $0x31] ss:$2 sm:$0xff] }
  0x44   : > { %475 = vst.sshfl [vmem:[#allocation1 + $0x20] sm:$0xff pattern:$0x75316420] %v3524_v44  ;;  %v3546_v53 = vld [vmem:[#allocation1 + $0x1] ss:$2 sm:$0xff] }
  0x45   : > { %478 = vst.sshfl [vmem:[#allocation1 + $0x30] sm:$0xff pattern:$0x75316420] %v3528_v46 }
  0x46   : > { %4876 = vst [vmem:[#allocation11_spill] sm:$0xff] %v3546_v53 }
  0x47   : > { %469 = vst.sshfl [vmem:[#allocation1] sm:$0xff pattern:$0x75316420] %v3540_v50 }
  0x4a   : > { %v3550_v55 = vld [vmem:[#allocation1 + $0x11] ss:$2 sm:$0xff] }
  0x4b   : > { %4878 = vst [vmem:[#allocation13_spill] sm:$0xff] %v3550_v55  ;;  %v3553_v56 = vld [vmem:[#allocation1 + $0x21] ss:$2 sm:$0xff] }
  0x4c   : > { %4879 = vst [vmem:[#allocation14_spill] sm:$0xff] %v3553_v56  ;;  %v3556_v57 = vld [vmem:[#allocation1 + $0x31] ss:$2 sm:$0xff] }
  0x4d   : > { %483 = vst.sshfl [vmem:[#allocation1 + $0x10] sm:$0xff pattern:$0x75316420] %v3542_v51 }
  0x4e   : > { %4880 = vst [vmem:[#allocation15_spill] sm:$0xff] %v3556_v57  ;;  %v3565_v59 = vld [vmem:[#allocation1 + $0x1] ss:$2 sm:$0xff] }
  0x4f   : > { %485 = vst.sshfl [vmem:[#allocation1 + $0x20] sm:$0xff pattern:$0x75316420] %v3544_v52 }
  0x50   : > { %487 = vst.sshfl [vmem:[#allocation1 + $0x30] sm:$0xff pattern:$0x75316420] %v3548_v54 }
  0x51   : > { %501 = vst [vmem:[#allocation1 + $0x30] ss:$2 sm:$0xff] %v3412_v4 }
  0x52   : > { %497 = vst [vmem:[#allocation1 + $0x20] ss:$2 sm:$0xff] %v3432_v10 }
  0x53   : > { %493 = vst [vmem:[#allocation1 + $0x10] ss:$2 sm:$0xff] %v3403_v1 }
  0x54   : > { %4882 = vst [vmem:[#allocation17_spill] sm:$0xff] %v3565_v59  ;;  %v3567_v60 = vld [vmem:[#allocation1 + $0x11] ss:$2 sm:$0xff] }
  0x55   : > { %4883 = vst [vmem:[#allocation18_spill] sm:$0xff] %v3567_v60 }
  0x56   : > { %481 = vst.sshfl [vmem:[#allocation1] sm:$0xff pattern:$0x75316420] %v3562_v58  ;;  %v3570_v61 = vld [vmem:[#allocation1 + $0x21] ss:$2 sm:$0xff] }
  0x57   : > { %4884 = vst [vmem:[#allocation19_spill] sm:$0xff] %v3570_v61  ;;  %v3573_v62 = vld [vmem:[#allocation1 + $0x31] ss:$2 sm:$0xff] }
  0x58   : > { %495 = vst [vmem:[#allocation1 + $0x11] ss:$2 sm:$0xff] %v3405_v2 }
  0x59   : > { %4885 = vst [vmem:[#allocation20_spill] sm:$0xff] %v3573_v62 }
  0x5a   : > { %499 = vst [vmem:[#allocation1 + $0x21] ss:$2 sm:$0xff] %v3410_v3 }
  0x5b   : > { %503 = vst [vmem:[#allocation1 + $0x31] ss:$2 sm:$0xff] %v3416_v6 }
  0x5c   : > { %489 = vst [vmem:[#allocation1] ss:$2 sm:$0xff] %v3414_v5 }
  0x5d   : > { %v3578_v63 = vld [vmem:[#allocation1 + $0x1] ss:$2 sm:$0xff] }
  0x5e   : > { %4886 = vst [vmem:[#allocation21_spill] sm:$0xff] %v3578_v63 }
  0x5f   : > { %v505_v57 = vld.sshfl [vmem:[#allocation1 + $0x10] sm:$0xff pattern:$0x75316420]  ;;  %491 = vst [vmem:[#allocation1 + $0x1] ss:$2 sm:$0xff] %v3401_v0 }
  0x60   : > { %512 = vst [vmem:[#allocation1 + $0x10] ss:$2 sm:$0xff] %v3436_v12 }
  0x61   : > { %v3581_v56 = vld.sshfl [vmem:[#allocation1 + $0x20] sm:$0xff pattern:$0x75316420]  ;;  %514 = vst [vmem:[#allocation1 + $0x11] ss:$2 sm:$0xff] %v3440_v14 }
  0x62   : > { %v3584_v55 = vld.sshfl [vmem:[#allocation1 + $0x30] sm:$0xff pattern:$0x75316420]  ;;  %516 = vst [vmem:[#allocation1 + $0x20] ss:$2 sm:$0xff] %v3476_v26 }
  0x63   : > { %520 = vst [vmem:[#allocation1 + $0x30] ss:$2 sm:$0xff] %v3456_v20 }
  0x64   : > { %522 = vst [vmem:[#allocation1 + $0x31] ss:$2 sm:$0xff] %v3460_v22 }
  0x65   : > { %518 = vst [vmem:[#allocation1 + $0x21] ss:$2 sm:$0xff] %v3454_v19 }
  0x66   : > { %v504_v59 = vld.sshfl [vmem:[#allocation1] sm:$0xff pattern:$0x75316420] }
  0x67   : > { %508 = vst [vmem:[#allocation1] ss:$2 sm:$0xff] %v3452_v18 }
  0x68   : > { %510 = vst [vmem:[#allocation1 + $0x1] ss:$2 sm:$0xff] %v3434_v11  ;;  %v524_v43 = vld.sshfl [vmem:[#allocation1 + $0x10] sm:$0xff pattern:$0x75316420] }
  0x69   : > { %577 = vst [vmem:[#allocation1 + $0x10] ss:$2 sm:$0xff] %v3421_v8 }
  0x6a   : > { %579 = vst [vmem:[#allocation1 + $0x11] ss:$2 sm:$0xff] %v3424_v9 }
  0x6b   : > { %v526_v46 = vld.sshfl [vmem:[#allocation1 + $0x30] sm:$0xff pattern:$0x75316420] }
  0x6c   : > { %3001 = vmatpush.xpose.msk.msra.mxu0 %vm527_vm0, %v526_v46  ;;  %585 = vst [vmem:[#allocation1 + $0x30] ss:$2 sm:$0xff] %v3445_v16  ;;  %v525_v44 = vld.sshfl [vmem:[#allocation1 + $0x20] sm:$0xff pattern:$0x75316420] }
  0x6d   : > { %587 = vst [vmem:[#allocation1 + $0x31] ss:$2 sm:$0xff] %v3448_v17 }
  0x6e   : > { %583 = vst [vmem:[#allocation1 + $0x21] ss:$2 sm:$0xff] %v3442_v15 }
  0x6f   : > { %v523_v50 = vld.sshfl [vmem:[#allocation1] sm:$0xff pattern:$0x75316420]  ;;  %581 = vst [vmem:[#allocation1 + $0x20] ss:$2 sm:$0xff] %v3458_v21 }
  0x70   : > { %3002 = vmatpush.xpose.msk.msra.mxu0 %vm527_vm0, %v525_v44  ;;  %573 = vst [vmem:[#allocation1] ss:$2 sm:$0xff] %v3438_v13 }
  0x71   : > { %575 = vst [vmem:[#allocation1 + $0x1] ss:$2 sm:$0xff] %v3418_v7  ;;  %v589_v62 = vld.sshfl [vmem:[#allocation1 + $0x10] sm:$0xff pattern:$0x75316420] }
  0x72   : > { %596 = vst [vmem:[#allocation1 + $0x10] ss:$2 sm:$0xff] %v3465_v24 }
  0x73   : > { %598 = vst [vmem:[#allocation1 + $0x11] ss:$2 sm:$0xff] %v3468_v25 }
  0x74   : > { %3003 = vmatpush.xpose.msk.msra.mxu0 %vm527_vm0, %v524_v43  ;;  %v3604_v46 = vld.sshfl [vmem:[#allocation1 + $0x30] sm:$0xff pattern:$0x75316420] }
  0x75   : > { %604 = vst [vmem:[#allocation1 + $0x30] ss:$2 sm:$0xff] %v3489_v32 }
  0x76   : > { %606 = vst [vmem:[#allocation1 + $0x31] ss:$2 sm:$0xff] %v3492_v33  ;;  %v3611_v61 = vld.sshfl [vmem:[#allocation1 + $0x20] sm:$0xff pattern:$0x75316420] }
  0x77   : > { %600 = vst [vmem:[#allocation1 + $0x20] ss:$2 sm:$0xff] %v3502_v37 }
  0x78   : > { %3004 = vmatpush.xpose.msk.msra.mxu0 %vm527_vm0, %v523_v50  ;;  %v588_v44 = vld.sshfl [vmem:[#allocation1] sm:$0xff pattern:$0x75316420]  ;;  %602 = vst [vmem:[#allocation1 + $0x21] ss:$2 sm:$0xff] %v3486_v31 }
  0x79   : > { %592 = vst [vmem:[#allocation1] ss:$2 sm:$0xff] %v3482_v29 }
  0x7a   : > { %594 = vst [vmem:[#allocation1 + $0x1] ss:$2 sm:$0xff] %v3462_v23  ;;  %v608_v50 = vld.sshfl [vmem:[#allocation1 + $0x10] sm:$0xff pattern:$0x75316420] }
  0x7b   : > { %3005 = vmatmul.msk.f32.vlgmr.msra.gmra.mxu0 %vm527_vm0, %v504_v59  ;;  %741 = vst [vmem:[#allocation1 + $0x10] ss:$2 sm:$0xff] %v3480_v28 }
  0x7c   : > { %743 = vst [vmem:[#allocation1 + $0x11] ss:$2 sm:$0xff] %v3484_v30 }
  0x7d   : > { %v610_v43 = vld.sshfl [vmem:[#allocation1 + $0x30] sm:$0xff pattern:$0x75316420] }
  0x7e   : > { %3009 = vmatpush.xpose.msk.msra.mxu1 %vm527_vm0, %v610_v43  ;;  %751 = vst [vmem:[#allocation1 + $0x31] ss:$2 sm:$0xff] %v3504_v38 }
  0x7f   : > { %749 = vst [vmem:[#allocation1 + $0x30] ss:$2 sm:$0xff] %v3500_v36  ;;  %v609_v60 = vld.sshfl [vmem:[#allocation1 + $0x20] sm:$0xff pattern:$0x75316420] }
  0x80   : > { %745 = vst [vmem:[#allocation1 + $0x20] ss:$2 sm:$0xff] %v3520_v42 }
  0x81   : > { %v607_v59 = vld.sshfl [vmem:[#allocation1] sm:$0xff pattern:$0x75316420]  ;;  %747 = vst [vmem:[#allocation1 + $0x21] ss:$2 sm:$0xff] %v3498_v35 }
  0x82   : > { %3010 = vmatpush.xpose.msk.msra.mxu1 %vm527_vm0, %v609_v60  ;;  %737 = vst [vmem:[#allocation1] ss:$2 sm:$0xff] %v3496_v34 }
  0x83   : > { %3006 = vmatmul.msk.f32.gmra.mxu0 %vm527_vm0, %v505_v57  ;;  %739 = vst [vmem:[#allocation1 + $0x1] ss:$2 sm:$0xff] %v3478_v27  ;;  %v753_v63 = vld.sshfl [vmem:[#allocation1 + $0x10] sm:$0xff pattern:$0x75316420] }
  0x84   : > { %805 = vst [vmem:[#allocation1 + $0x10] ss:$2 sm:$0xff] %v3509_v40 }
  0x85   : > { %807 = vst [vmem:[#allocation1 + $0x11] ss:$2 sm:$0xff] %v3512_v41 }
  0x86   : > { %v755_v43 = vld.sshfl [vmem:[#allocation1 + $0x30] sm:$0xff pattern:$0x75316420]  ;;  %3011 = vmatpush.xpose.msk.msra.mxu1 %vm527_vm0, %v608_v50 }
  0x87   : > { %784 = vmatpush.msra.mxu2 %v755_v43  ;;  %813 = vst [vmem:[#allocation1 + $0x30] ss:$2 sm:$0xff] %v3533_v48 }
  0x88   : > { %815 = vst [vmem:[#allocation1 + $0x31] ss:$2 sm:$0xff] %v3536_v49  ;;  %v754_v57 = vld.sshfl [vmem:[#allocation1 + $0x20] sm:$0xff pattern:$0x75316420] }
  0x89   : > { %809 = vst [vmem:[#allocation1 + $0x20] ss:$2 sm:$0xff] %v3546_v53  ;;  %785 = vmatpush.msra.mxu2 %v754_v57 }
  0x8a   : > { %3012 = vmatpush.xpose.msk.msra.mxu1 %vm527_vm0, %v607_v59  ;;  %v752_v60 = vld.sshfl [vmem:[#allocation1] sm:$0xff pattern:$0x75316420]  ;;  %811 = vst [vmem:[#allocation1 + $0x21] ss:$2 sm:$0xff] %v3530_v47 }
  0x8b   : > { %3007 = vmatmul.msk.f32.gmra.mxu0 %vm527_vm0, %v3581_v56  ;;  %801 = vst [vmem:[#allocation1] ss:$2 sm:$0xff] %v3526_v45  ;;  %786 = vmatpush.msra.mxu2 %v753_v63 }
  0x8c   : > { %803 = vst [vmem:[#allocation1 + $0x1] ss:$2 sm:$0xff] %v3506_v39  ;;  %v817_v56 = vld.sshfl [vmem:[#allocation1 + $0x10] sm:$0xff pattern:$0x75316420] }
  0x8d   : > { %3013 = vmatmul.msk.f32.vlgmr.msra.gmra.mxu1 %vm527_vm0, %v588_v44  ;;  %787 = vmatpush.msra.mxu2 %v752_v60  ;;  %989 = vst [vmem:[#allocation1 + $0x10] ss:$2 sm:$0xff] %v3403_v1 }
  0x8e   : > { %991 = vst [vmem:[#allocation1 + $0x11] ss:$2 sm:$0xff] %v3405_v2 }
  0x8f   : > { %v819_v50 = vld.sshfl [vmem:[#allocation1 + $0x30] sm:$0xff pattern:$0x75316420] }
  0x90   : > { %997 = vst [vmem:[#allocation1 + $0x30] ss:$2 sm:$0xff] %v3412_v4  ;;  %848 = vmatpush.msra.mxu3 %v819_v50 }
  0x91   : > { %999 = vst [vmem:[#allocation1 + $0x31] ss:$2 sm:$0xff] %v3416_v6  ;;  %v818_v44 = vld.sshfl [vmem:[#allocation1 + $0x20] sm:$0xff pattern:$0x75316420] }
  0x92   : > { %993 = vst [vmem:[#allocation1 + $0x20] ss:$2 sm:$0xff] %v3432_v10  ;;  %849 = vmatpush.msra.mxu3 %v818_v44 }
  0x93   : > { %3008 = vmatmul.msk.f32.gmra.mxu0 %vm527_vm0, %v3584_v55  ;;  %v816_v63 = vld.sshfl [vmem:[#allocation1] sm:$0xff pattern:$0x75316420]  ;;  %995 = vst [vmem:[#allocation1 + $0x21] ss:$2 sm:$0xff] %v3410_v3 }
  0x94   : > { %985 = vst [vmem:[#allocation1] ss:$2 sm:$0xff] %v3414_v5  ;;  %850 = vmatpush.msra.mxu3 %v817_v56 }
  0x95   : > { %3014 = vmatmul.msk.f32.gmra.mxu1 %vm527_vm0, %v589_v62  ;;  %987 = vst [vmem:[#allocation1 + $0x1] ss:$2 sm:$0xff] %v3401_v0  ;;  %v1001_v55 = vld.sshfl [vmem:[#allocation1 + $0x10] sm:$0xff pattern:$0x75316420] }
  0x96   : > { %851 = vmatpush.msra.mxu3 %v816_v63  ;;  %1016 = vst [vmem:[#allocation1 + $0x10] ss:$2 sm:$0xff] %v3436_v12  ;;  %1006 = vrot.lane.b32.xlu2 %v1001_v55, %s3346_s6 }
  0x97   : > { %1018 = vst [vmem:[#allocation1 + $0x11] ss:$2 sm:$0xff] %v3440_v14 }
  0x98   : > { %v3653_v59 = vld.sshfl [vmem:[#allocation1 + $0x30] sm:$0xff pattern:$0x75316420] }
  0x99   : > { %1024 = vst [vmem:[#allocation1 + $0x30] ss:$2 sm:$0xff] %v3456_v20 }
  0x9a   : > { %1026 = vst [vmem:[#allocation1 + $0x31] ss:$2 sm:$0xff] %v3460_v22  ;;  %v3660_v62 = vld.sshfl [vmem:[#allocation1 + $0x20] sm:$0xff pattern:$0x75316420] }
  0x9b   : > { %1020 = vst [vmem:[#allocation1 + $0x20] ss:$2 sm:$0xff] %v3476_v26 }
  0x9c   : > { %v1000_v43 = vld.sshfl [vmem:[#allocation1] sm:$0xff pattern:$0x75316420]  ;;  %1022 = vst [vmem:[#allocation1 + $0x21] ss:$2 sm:$0xff] %v3454_v19 }
  0x9d   : > { %3015 = vmatmul.msk.f32.gmra.mxu1 %vm527_vm0, %v3611_v61  ;;  %1004 = vrot.lane.b32.xlu1 %v1000_v43, %s3346_s6  ;;  %1012 = vst [vmem:[#allocation1] ss:$2 sm:$0xff] %v3452_v18 }
  0x9e   : > { %1014 = vst [vmem:[#allocation1 + $0x1] ss:$2 sm:$0xff] %v3434_v11  ;;  %v1028_v60 = vld.sshfl [vmem:[#allocation1 + $0x10] sm:$0xff pattern:$0x75316420] }
  0x9f   : > { %1088 = vst [vmem:[#allocation1 + $0x10] ss:$2 sm:$0xff] %v3421_v8 }
  0xa0   : > { %1090 = vst [vmem:[#allocation1 + $0x11] ss:$2 sm:$0xff] %v3424_v9 }
  0xa1   : > { %v1030_v57 = vld.sshfl [vmem:[#allocation1 + $0x30] sm:$0xff pattern:$0x75316420] }
  0xa2   : > { %1096 = vst [vmem:[#allocation1 + $0x30] ss:$2 sm:$0xff] %v3445_v16  ;;  %1037 = vrot.lane.b32.xlu2 %v1030_v57, %s3346_s6 }
  0xa3   : > { %1098 = vst [vmem:[#allocation1 + $0x31] ss:$2 sm:$0xff] %v3448_v17  ;;  %v1029_v61 = vld.sshfl [vmem:[#allocation1 + $0x20] sm:$0xff pattern:$0x75316420] }
  0xa4   : > { %1035 = vrot.lane.b32.xlu0 %v1029_v61, %s3346_s6  ;;  %1092 = vst [vmem:[#allocation1 + $0x20] ss:$2 sm:$0xff] %v3458_v21 }
  0xa5   : > { %3016 = vmatmul.msk.f32.gmra.mxu1 %vm527_vm0, %v3604_v46  ;;  %1094 = vst [vmem:[#allocation1 + $0x21] ss:$2 sm:$0xff] %v3442_v15  ;;  %v1027_v50 = vld.sshfl [vmem:[#allocation1] sm:$0xff pattern:$0x75316420] }
  0xa6   : > { %1084 = vst [vmem:[#allocation1] ss:$2 sm:$0xff] %v3438_v13 }
  0xa7   : > { %1086 = vst [vmem:[#allocation1 + $0x1] ss:$2 sm:$0xff] %v3418_v7  ;;  %v1100_v44 = vld.sshfl [vmem:[#allocation1 + $0x10] sm:$0xff pattern:$0x75316420] }
  0xa8   : > { %1115 = vst [vmem:[#allocation1 + $0x10] ss:$2 sm:$0xff] %v3465_v24 }
  0xa9   : > { %1117 = vst [vmem:[#allocation1 + $0x11] ss:$2 sm:$0xff] %v3468_v25 }
  0xaa   : > { %v3681_v56 = vld.sshfl [vmem:[#allocation1 + $0x30] sm:$0xff pattern:$0x75316420]  ;;  %1031 = vrot.lane.b32.xlu2 %v1027_v50, %s3346_s6 }
  0xab   : > { %1123 = vst [vmem:[#allocation1 + $0x30] ss:$2 sm:$0xff] %v3489_v32 }
  0xac   : > { %1125 = vst [vmem:[#allocation1 + $0x31] ss:$2 sm:$0xff] %v3492_v33  ;;  %1033 = vrot.lane.b32.xlu0 %v1028_v60, %s3346_s6  ;;  %v1101_v46 = vld.sshfl [vmem:[#allocation1 + $0x20] sm:$0xff pattern:$0x75316420] }
  0xad   : > { %1119 = vst [vmem:[#allocation1 + $0x20] ss:$2 sm:$0xff] %v3502_v37 }
  0xae   : > { %v1099_v63 = vld.sshfl [vmem:[#allocation1] sm:$0xff pattern:$0x75316420]  ;;  %1121 = vst [vmem:[#allocation1 + $0x21] ss:$2 sm:$0xff] %v3486_v31 }
  0xaf   : > { %1103 = vrot.lane.b32.xlu1 %v1099_v63, %s3346_s6  ;;  %1111 = vst [vmem:[#allocation1] ss:$2 sm:$0xff] %v3482_v29 }
  0xb0   : > { %1113 = vst [vmem:[#allocation1 + $0x1] ss:$2 sm:$0xff] %v3462_v23  ;;  %v1127_v43 = vld.sshfl [vmem:[#allocation1 + $0x10] sm:$0xff pattern:$0x75316420] }
  0xb1   : > { %1267 = vst [vmem:[#allocation1 + $0x10] ss:$2 sm:$0xff] %v3480_v28 }
  0xb2   : > { %1269 = vst [vmem:[#allocation1 + $0x11] ss:$2 sm:$0xff] %v3484_v30 }
  0xb3   : > { %v1129_v55 = vld.sshfl [vmem:[#allocation1 + $0x30] sm:$0xff pattern:$0x75316420] }
  0xb4   : > { %1275 = vst [vmem:[#allocation1 + $0x30] ss:$2 sm:$0xff] %v3500_v36  ;;  %1105 = vrot.lane.b32.xlu0 %v1100_v44, %s3346_s6 }
  0xb5   : > { %1277 = vst [vmem:[#allocation1 + $0x31] ss:$2 sm:$0xff] %v3504_v38  ;;  %v1128_v57 = vld.sshfl [vmem:[#allocation1 + $0x20] sm:$0xff pattern:$0x75316420] }
  0xb6   : > { %1271 = vst [vmem:[#allocation1 + $0x20] ss:$2 sm:$0xff] %v3520_v42 }
  0xb7   : > { %1107 = vrot.lane.b32.xlu1 %v1101_v46, %s3346_s6  ;;  %1273 = vst [vmem:[#allocation1 + $0x21] ss:$2 sm:$0xff] %v3498_v35  ;;  %v1126_v60 = vld.sshfl [vmem:[#allocation1] sm:$0xff pattern:$0x75316420] }
  0xb8   : > { %1130 = vrot.lane.b32.xlu2 %v1126_v60, %s3346_s6  ;;  %1263 = vst [vmem:[#allocation1] ss:$2 sm:$0xff] %v3496_v34 }
  0xb9   : > { %1265 = vst [vmem:[#allocation1 + $0x1] ss:$2 sm:$0xff] %v3478_v27  ;;  %v3709_v50 = vld.sshfl [vmem:[#allocation1 + $0x10] sm:$0xff pattern:$0x75316420] }
  0xba   : > { %4888 = vst [vmem:[#allocation23_spill] sm:$0xff] %v3709_v50 }
  0xbb   : > { %1339 = vst [vmem:[#allocation1 + $0x10] ss:$2 sm:$0xff] %v3509_v40 }
  0xbc   : > { %v3704_v61 = vld.sshfl [vmem:[#allocation1 + $0x30] sm:$0xff pattern:$0x75316420]  ;;  %1134 = vrot.lane.b32.xlu0 %v1128_v57, %s3346_s6  ;;  %1341 = vst [vmem:[#allocation1 + $0x11] ss:$2 sm:$0xff] %v3512_v41 }
  0xbd   : > { %4887 = vst [vmem:[#allocation22_spill] sm:$0xff] %v3704_v61 }
  0xbe   : > { %1347 = vst [vmem:[#allocation1 + $0x30] ss:$2 sm:$0xff] %v3533_v48  ;;  %v3714_v44 = vld.sshfl [vmem:[#allocation1 + $0x20] sm:$0xff pattern:$0x75316420] }
  0xbf   : > { %1349 = vst [vmem:[#allocation1 + $0x31] ss:$2 sm:$0xff] %v3536_v49  ;;  %1136 = vrot.lane.b32.xlu1 %v1129_v55, %s3346_s6 }
  0xc0   : > { %4889 = vst [vmem:[#allocation24_spill] sm:$0xff] %v3714_v44  ;;  %v3719_v46 = vld.sshfl [vmem:[#allocation1] sm:$0xff pattern:$0x75316420] }
  0xc1   : > { %1343 = vst [vmem:[#allocation1 + $0x20] ss:$2 sm:$0xff] %v3546_v53 }
  0xc2   : > { %1345 = vst [vmem:[#allocation1 + $0x21] ss:$2 sm:$0xff] %v3530_v47 }
  0xc3   : > { %4890 = vst [vmem:[#allocation25_spill] sm:$0xff] %v3719_v46 }
  0xc4   : > { %1335 = vst [vmem:[#allocation1] ss:$2 sm:$0xff] %v3526_v45 }
  0xc5   : > { %1337 = vst [vmem:[#allocation1 + $0x1] ss:$2 sm:$0xff] %v3506_v39 }
  0xc6   : > { %v3723_v63 = vld.sshfl [vmem:[#allocation1 + $0x30] sm:$0xff pattern:$0x75316420] }
  0xc7   : > { %4891 = vst [vmem:[#allocation26_spill] sm:$0xff] %v3723_v63  ;;  %1132 = vrot.lane.b32.xlu1 %v1127_v43, %s3346_s6 }
  0xc8   : > { %1539 = vst [vmem:[#allocation1 + $0x30] ss:$2 sm:$0xff] %v3412_v4 }
  0xc9   : > { %1541 = vst [vmem:[#allocation1 + $0x31] ss:$2 sm:$0xff] %v3416_v6  ;;  %v3728_v57 = vld.sshfl [vmem:[#allocation1 + $0x20] sm:$0xff pattern:$0x75316420] }
  0xca   : > { %4892 = vst [vmem:[#allocation27_spill] sm:$0xff] %v3728_v57 }
  0xcb   : > { %1535 = vst [vmem:[#allocation1 + $0x20] ss:$2 sm:$0xff] %v3432_v10 }
  0xcc   : > { %1537 = vst [vmem:[#allocation1 + $0x21] ss:$2 sm:$0xff] %v3410_v3  ;;  %v3762_v44 = vld.sshfl [vmem:[#allocation1] sm:$0xff pattern:$0x75316420] }
  0xcd   : > { %4897 = vst [vmem:[#allocation32_spill] sm:$0xff] %v3762_v44 }
  0xce   : > { %1527 = vst [vmem:[#allocation1] ss:$2 sm:$0xff] %v3414_v5 }
  0xcf   : > { %1529 = vst [vmem:[#allocation1 + $0x1] ss:$2 sm:$0xff] %v3401_v0 }
  0xd0   : > { %v3732_v55 = vld.sshfl [vmem:[#allocation1 + $0x30] sm:$0xff pattern:$0x75316420] }
  0xd1   : > { %4893 = vst [vmem:[#allocation28_spill] sm:$0xff] %v3732_v55 }
  0xd2   : > { %1566 = vst [vmem:[#allocation1 + $0x30] ss:$2 sm:$0xff] %v3456_v20 }
  0xd3   : > { %1568 = vst [vmem:[#allocation1 + $0x31] ss:$2 sm:$0xff] %v3460_v22  ;;  %v3736_v60 = vld.sshfl [vmem:[#allocation1 + $0x20] sm:$0xff pattern:$0x75316420] }
  0xd4   : > { %4894 = vst [vmem:[#allocation29_spill] sm:$0xff] %v3736_v60  ;;  %v3775_v60 = vld.sshfl [vmem:[#allocation1 + $0x10] sm:$0xff pattern:$0x75316420] }
  0xd5   : > { %1562 = vst [vmem:[#allocation1 + $0x20] ss:$2 sm:$0xff] %v3476_v26 }
  0xd6   : > { %1564 = vst [vmem:[#allocation1 + $0x21] ss:$2 sm:$0xff] %v3454_v19 }
  0xd7   : > { %4901 = vst [vmem:[#allocation36_spill] sm:$0xff] %v3775_v60 }
  0xd8   : > { %1531 = vst [vmem:[#allocation1 + $0x10] ss:$2 sm:$0xff] %v3403_v1 }
  0xd9   : > { %1533 = vst [vmem:[#allocation1 + $0x11] ss:$2 sm:$0xff] %v3405_v2 }
  0xda   : > { %v3740_v54 = vld.sshfl [vmem:[#allocation1 + $0x30] sm:$0xff pattern:$0x75316420] }
  0xdb   : > { %1638 = vst [vmem:[#allocation1 + $0x30] ss:$2 sm:$0xff] %v3445_v16 }
  0xdc   : > { %1640 = vst [vmem:[#allocation1 + $0x31] ss:$2 sm:$0xff] %v3448_v17 }
  0xdd   : > { %v3744_v43 = vld.sshfl [vmem:[#allocation1 + $0x20] sm:$0xff pattern:$0x75316420] }
  0xde   : > { %1634 = vst [vmem:[#allocation1 + $0x20] ss:$2 sm:$0xff] %v3458_v21 }
  0xdf   : > { %1636 = vst [vmem:[#allocation1 + $0x21] ss:$2 sm:$0xff] %v3442_v15 }
  0xe3   : > { %v3748_v52 = vld.sshfl [vmem:[#allocation1 + $0x30] sm:$0xff pattern:$0x75316420] }
  0xe4   : > { %4895 = vst [vmem:[#allocation30_spill] sm:$0xff] %v3748_v52  ;;  %v3772_v52 = vld.sshfl [vmem:[#allocation1] sm:$0xff pattern:$0x75316420] }
  0xe5   : > { %1665 = vst [vmem:[#allocation1 + $0x30] ss:$2 sm:$0xff] %v3489_v32 }
  0xe6   : > { %1667 = vst [vmem:[#allocation1 + $0x31] ss:$2 sm:$0xff] %v3492_v33  ;;  %v3752_v51 = vld.sshfl [vmem:[#allocation1 + $0x20] sm:$0xff pattern:$0x75316420] }
  0xe7   : > { %4896 = vst [vmem:[#allocation31_spill] sm:$0xff] %v3752_v51 }
  0xe8   : > { %1661 = vst [vmem:[#allocation1 + $0x20] ss:$2 sm:$0xff] %v3502_v37 }
  0xe9   : > { %1663 = vst [vmem:[#allocation1 + $0x21] ss:$2 sm:$0xff] %v3486_v31 }
  0xea   : > { %4900 = vst [vmem:[#allocation35_spill] sm:$0xff] %v3772_v52 }
  0xeb   : > { %1554 = vst [vmem:[#allocation1] ss:$2 sm:$0xff] %v3452_v18 }
  0xec   : > { %1556 = vst [vmem:[#allocation1 + $0x1] ss:$2 sm:$0xff] %v3434_v11 }
  0xed   : > { %v1671_v58 = vld.sshfl [vmem:[#allocation1 + $0x30] sm:$0xff pattern:$0x75316420] }
  0xee   : > { %1678 = vrot.lane.b32.xlu0 %v1671_v58, %s3347_s7  ;;  %1817 = vst [vmem:[#allocation1 + $0x30] ss:$2 sm:$0xff] %v3500_v36 }
  0xef   : > { %1819 = vst [vmem:[#allocation1 + $0x31] ss:$2 sm:$0xff] %v3504_v38 }
  0xf0   : > { %v1670_v46 = vld.sshfl [vmem:[#allocation1 + $0x20] sm:$0xff pattern:$0x75316420]  ;;  %v3766_v61 = vpop.permute.xlu2 %1006 }
  0xf1   : > { %1676 = vrot.lane.b32.xlu2 %v1670_v46, %s3347_s7  ;;  %1813 = vst [vmem:[#allocation1 + $0x20] ss:$2 sm:$0xff] %v3520_v42 }
  0xf2   : > { %1815 = vst [vmem:[#allocation1 + $0x21] ss:$2 sm:$0xff] %v3498_v35 }
  0xf3   : > { %4898 = vst [vmem:[#allocation33_spill] sm:$0xff] %v3766_v61  ;;  %v3781_v61 = vld.sshfl [vmem:[#allocation1] sm:$0xff pattern:$0x75316420] }
  0xf4   : > { %1626 = vst [vmem:[#allocation1] ss:$2 sm:$0xff] %v3438_v13 }
  0xf5   : > { %1628 = vst [vmem:[#allocation1 + $0x1] ss:$2 sm:$0xff] %v3418_v7 }
  0xf8   : > { %v561_v50 = vpop.f32.mrf.mxu0 }
  0xf9   : > { %v3788_v60 = vmul.f32 0.35355338, %v561_v50 }
  0xfb   : > { %v665_v51 = vsel %vm664_vm1, %v3788_v60, -inf }
  0xfc   : > { %v1038_v44 = vpop.permute.xlu2 %1037  ;;  %v3797_v52 = vld.sshfl [vmem:[#allocation1] sm:$0xff pattern:$0x75316420] }
  0xfd   : > { %3025 = vmatpush.xpose.msk.msrb.mxu2 %vm527_vm0, %v1038_v44  ;;  %1653 = vst [vmem:[#allocation1] ss:$2 sm:$0xff] %v3482_v29 }
  0xfe   : > { %1655 = vst [vmem:[#allocation1 + $0x1] ss:$2 sm:$0xff] %v3462_v23 }
 0x100   : > { %v564_v58 = vpop.f32.mrf.mxu0 }
 0x101   : > { %v3768_v55 = vmul.f32 0.35355338, %v564_v58 }
 0x103   : > { %4899 = vst [vmem:[#allocation34_spill] sm:$0xff] %v3768_v55  ;;  %v668_v46 = vsel %vm664_vm1, %v3768_v55, -inf }
 0x104   : > { %669 = vmax.xlane.f32.xlu1 %v668_v46  ;;  %v3785_v46 = vld.sshfl [vmem:[#allocation1 + $0x10] sm:$0xff pattern:$0x75316420] }
 0x105   : > { %1558 = vst [vmem:[#allocation1 + $0x10] ss:$2 sm:$0xff] %v3436_v12 }
 0x106   : > { %1560 = vst [vmem:[#allocation1 + $0x11] ss:$2 sm:$0xff] %v3440_v14 }
 0x108   : > { %v567_v55 = vpop.f32.mrf.mxu0 }
 0x109   : > { %v3791_v44 = vmul.f32 0.35355338, %v567_v55 }
 0x10a   : > { %v644_v58 = vpop.f32.mrf.mxu1 }
 0x10b   : > { %4902 = vst [vmem:[#allocation37_spill] sm:$0xff] %v3791_v44  ;;  %v3799_v38 = vmul.f32 0.35355338, %v644_v58  ;;  %v671_v36 = vsel %vm664_vm1, %v3791_v44, -inf }
 0x10c   : > { %v3816_v44 = vld.sshfl [vmem:[#allocation1 + $0x20] sm:$0xff pattern:$0x75316420] }
 0x10d   : > { %v3807_v55 = vld.sshfl [vmem:[#allocation1 + $0x10] sm:$0xff pattern:$0x75316420]  ;;  %4905 = vst [vmem:[#allocation40_spill] sm:$0xff] %v3816_v44 }
 0x10e   : > { %1630 = vst [vmem:[#allocation1 + $0x10] ss:$2 sm:$0xff] %v3421_v8 }
 0x10f   : > { %1632 = vst [vmem:[#allocation1 + $0x11] ss:$2 sm:$0xff] %v3424_v9  ;;  %v3813_v58 = vpop.permute.xlu1 %1004 }
 0x110   : > { %4904 = vst [vmem:[#allocation39_spill] sm:$0xff] %v3813_v58 }
 0x111   : > { %1885 = vst [vmem:[#allocation1 + $0x20] ss:$2 sm:$0xff] %v3546_v53 }
 0x112   : > { %v647_v57 = vpop.f32.mrf.mxu1  ;;  %1887 = vst [vmem:[#allocation1 + $0x21] ss:$2 sm:$0xff] %v3530_v47 }
 0x113   : > { %v3795_v63 = vmul.f32 0.35355338, %v647_v57 }
 0x115   : > { %4903 = vst [vmem:[#allocation38_spill] sm:$0xff] %v3795_v63  ;;  %v680_v50 = vsel %vm664_vm1, %v3795_v63, -inf }
 0x116   : > { %681 = vmax.xlane.f32.xlu1 %v680_v50  ;;  %v1036_v57 = vpop.permute.xlu0 %1035  ;;  %v1668_v50 = vld.sshfl [vmem:[#allocation1] sm:$0xff pattern:$0x75316420] }
 0x117   : > { %3026 = vmatpush.xpose.msk.msrb.mxu2 %vm527_vm0, %v1036_v57  ;;  %1805 = vst [vmem:[#allocation1] ss:$2 sm:$0xff] %v3496_v34  ;;  %v1032_v57 = vpop.permute.xlu2 %1031 }
 0x118   : > { %666 = vmax.xlane.f32.xlu0 %v665_v51  ;;  %v677_v51 = vsel %vm664_vm1, %v3799_v38, -inf  ;;  %1807 = vst [vmem:[#allocation1 + $0x1] ss:$2 sm:$0xff] %v3478_v27 }
 0x119   : > { %v3827_v58 = vld.sshfl [vmem:[#allocation1 + $0x20] sm:$0xff pattern:$0x75316420] }
 0x11a   : > { %672 = vmax.xlane.f32.xlu2 %v671_v36  ;;  %v3822_v36 = vld.sshfl [vmem:[#allocation1 + $0x10] sm:$0xff pattern:$0x75316420]  ;;  %4906 = vst [vmem:[#allocation41_spill] sm:$0xff] %v3827_v58 }
 0x11b   : > { %1657 = vst [vmem:[#allocation1 + $0x10] ss:$2 sm:$0xff] %v3465_v24 }
 0x11c   : > { %1659 = vst [vmem:[#allocation1 + $0x11] ss:$2 sm:$0xff] %v3468_v25 }
 0x11d   : > { %2077 = vst [vmem:[#allocation1 + $0x20] ss:$2 sm:$0xff] %v3432_v10 }
 0x11e   : > { %v1034_v63 = vpop.permute.xlu0 %1033  ;;  %2079 = vst [vmem:[#allocation1 + $0x21] ss:$2 sm:$0xff] %v3410_v3  ;;  %v3854_v3 = vld.sshfl [vmem:[#allocation1 + $0x30] sm:$0xff pattern:$0x75316420] }
 0x11f   : > { %3027 = vmatpush.xpose.msk.msrb.mxu2 %vm527_vm0, %v1034_v63  ;;  %v3836_v53 = vld.sshfl [vmem:[#allocation1] sm:$0xff pattern:$0x75316420]  ;;  %1889 = vst [vmem:[#allocation1 + $0x30] ss:$2 sm:$0xff] %v3533_v48 }
 0x120   : > { %678 = vmax.xlane.f32.xlu0 %v677_v51  ;;  %1877 = vst [vmem:[#allocation1] ss:$2 sm:$0xff] %v3526_v45 }
 0x121   : > { %v3829_v51 = vpop.permute.xlu1 %1103  ;;  %1879 = vst [vmem:[#allocation1 + $0x1] ss:$2 sm:$0xff] %v3506_v39 }
 0x122   : > { %1891 = vst [vmem:[#allocation1 + $0x31] ss:$2 sm:$0xff] %v3536_v49 }
 0x123   : > { %3028 = vmatpush.xpose.msk.msrb.mxu2 %vm527_vm0, %v1032_v57  ;;  %v1669_v47 = vld.sshfl [vmem:[#allocation1 + $0x10] sm:$0xff pattern:$0x75316420]  ;;  %v4914_v57 = vld [vmem:[#allocation29_spill] sm:$0xff] }
 0x124   : > { %1809 = vst [vmem:[#allocation1 + $0x10] ss:$2 sm:$0xff] %v3480_v28 }
 0x125   : > { %1811 = vst [vmem:[#allocation1 + $0x11] ss:$2 sm:$0xff] %v3484_v30  ;;  %v3842_v58 = vld.sshfl [vmem:[#allocation1 + $0x20] sm:$0xff pattern:$0x75316420] }
 0x126   : > { %v3840_v63 = vpop.permute.xlu0 %1105  ;;  %2104 = vst [vmem:[#allocation1 + $0x20] ss:$2 sm:$0xff] %v3476_v26 }
 0x127   : > { %2106 = vst [vmem:[#allocation1 + $0x21] ss:$2 sm:$0xff] %v3454_v19 }
 0x129   : > { %v3838_v44 = vpop.permute.xlu1 %1107 }
 0x12e   : > { %v3859_v19 = vld.sshfl [vmem:[#allocation1 + $0x20] sm:$0xff pattern:$0x75316420]  ;;  %v1135_v26 = vpop.permute.xlu0 %1134 }
 0x12f   : > { %1008 = vrot.lane.b32.xlu1 %v3660_v62, %s3346_s6  ;;  %2176 = vst [vmem:[#allocation1 + $0x20] ss:$2 sm:$0xff] %v3458_v21 }
 0x130   : > { %2178 = vst [vmem:[#allocation1 + $0x21] ss:$2 sm:$0xff] %v3442_v15  ;;  %v1131_v15 = vpop.permute.xlu2 %1130 }
 0x131   : > { %v1137_v10 = vpop.permute.xlu1 %1136 }
 0x132   : > { %1579 = vrot.lane.b32.xlu2 %v3740_v54, %s3347_s7  ;;  %3033 = vmatpush.xpose.msk.msrb.mxu3 %vm527_vm0, %v1137_v10  ;;  %v3872_v54 = vld.sshfl [vmem:[#allocation1 + $0x30] sm:$0xff pattern:$0x75316420] }
 0x133   : > { %2081 = vst [vmem:[#allocation1 + $0x30] ss:$2 sm:$0xff] %v3412_v4 }
 0x134   : > { %1109 = vrot.lane.b32.xlu0 %v3681_v56, %s3346_s6  ;;  %v3862_v56 = vld.sshfl [vmem:[#allocation1] sm:$0xff pattern:$0x75316420]  ;;  %2083 = vst [vmem:[#allocation1 + $0x31] ss:$2 sm:$0xff] %v3416_v6 }
 0x135   : > { %2069 = vst [vmem:[#allocation1] ss:$2 sm:$0xff] %v3414_v5 }
 0x136   : > { %3034 = vmatpush.xpose.msk.msrb.mxu3 %vm527_vm0, %v1135_v26  ;;  %2071 = vst [vmem:[#allocation1 + $0x1] ss:$2 sm:$0xff] %v3401_v0  ;;  %v3888_v0 = vld.sshfl [vmem:[#allocation1 + $0x10] sm:$0xff pattern:$0x75316420] }
 0x137   : > { %1674 = vrot.lane.b32.xlu1 %v1669_v47, %s3347_s7  ;;  %v3877_v62 = vld.sshfl [vmem:[#allocation1 + $0x20] sm:$0xff pattern:$0x75316420]  ;;  %1881 = vst [vmem:[#allocation1 + $0x10] ss:$2 sm:$0xff] %v3509_v40 }
 0x138   : > { %2203 = vst [vmem:[#allocation1 + $0x20] ss:$2 sm:$0xff] %v3502_v37  ;;  %v4907_v37 = vld [vmem:[#allocation2_spill] sm:$0xff] }
 0x139   : > { %v1133_v21 = vpop.permute.xlu1 %1132  ;;  %2205 = vst [vmem:[#allocation1 + $0x21] ss:$2 sm:$0xff] %v3486_v31 }
 0x13a   : > { %1672 = vrot.lane.b32.xlu2 %v1668_v50, %s3347_s7  ;;  %3035 = vmatpush.xpose.msk.msrb.mxu3 %vm527_vm0, %v1133_v21  ;;  %1883 = vst [vmem:[#allocation1 + $0x11] ss:$2 sm:$0xff] %v3512_v41 }
 0x13b   : > { %v3890_v4 = vld.sshfl [vmem:[#allocation1 + $0x30] sm:$0xff pattern:$0x75316420] }
 0x13c   : > { %1577 = vrot.lane.b32.xlu0 %v3744_v43, %s3347_s7  ;;  %2108 = vst [vmem:[#allocation1 + $0x30] ss:$2 sm:$0xff] %v3456_v20  ;;  %v650_v20 = vpop.f32.mrf.mxu1 }
 0x13d   : > { %v3881_v5 = vld.sshfl [vmem:[#allocation1] sm:$0xff pattern:$0x75316420]  ;;  %2110 = vst [vmem:[#allocation1 + $0x31] ss:$2 sm:$0xff] %v3460_v22 }
 0x13e   : > { %3036 = vmatpush.xpose.msk.msrb.mxu3 %vm527_vm0, %v1131_v15  ;;  %2096 = vst [vmem:[#allocation1] ss:$2 sm:$0xff] %v3452_v18 }
 0x13f   : > { %1010 = vrot.lane.b32.xlu1 %v3653_v59, %s3346_s6  ;;  %2098 = vst [vmem:[#allocation1 + $0x1] ss:$2 sm:$0xff] %v3434_v11 }
 0x140   : > { %v2212_v6 = vld.sshfl [vmem:[#allocation1 + $0x20] sm:$0xff pattern:$0x75316420] }
 0x141   : > { %2355 = vst [vmem:[#allocation1 + $0x20] ss:$2 sm:$0xff] %v3520_v42  ;;  %v3905_v22 = vld.sshfl [vmem:[#allocation1 + $0x10] sm:$0xff pattern:$0x75316420] }
 0x142   : > { %2357 = vst [vmem:[#allocation1 + $0x21] ss:$2 sm:$0xff] %v3498_v35  ;;  %v3932_v35 = vmul.f32 0.35355338, %v650_v20  ;;  %v4908_v42 = vld [vmem:[#allocation3_spill] sm:$0xff]  ;;  %v3159_v50 = vpack.i.bf16 %v3862_v56, %v3905_v22  ;;  %v4916_v20 = vld [vmem:[#allocation37_spill] sm:$0xff] }
 0x143   : > { %2073 = vst [vmem:[#allocation1 + $0x10] ss:$2 sm:$0xff] %v3403_v1 }
 0x144   : > { %v2114_v18 = vld.sshfl [vmem:[#allocation1 + $0x30] sm:$0xff pattern:$0x75316420]  ;;  %2075 = vst [vmem:[#allocation1 + $0x11] ss:$2 sm:$0xff] %v3405_v2 }
 0x145   : > { %2180 = vst [vmem:[#allocation1 + $0x30] ss:$2 sm:$0xff] %v3445_v16 }
 0x146   : > { %v3900_v11 = vld.sshfl [vmem:[#allocation1] sm:$0xff pattern:$0x75316420]  ;;  %2182 = vst [vmem:[#allocation1 + $0x31] ss:$2 sm:$0xff] %v3448_v17 }
 0x147   : > { %1573 = vrot.lane.b32.xlu1 %v3781_v61, %s3347_s7  ;;  %2168 = vst [vmem:[#allocation1] ss:$2 sm:$0xff] %v3438_v13  ;;  %v653_v13 = vpop.f32.mrf.mxu1 }
 0x148   : > { %2170 = vst [vmem:[#allocation1 + $0x1] ss:$2 sm:$0xff] %v3418_v7  ;;  %v570_v7 = vpop.f32.mrf.mxu0  ;;  %v3923_v2 = vmul.f32 0.35355338, %v653_v13 }
 0x149   : > { %v3920_v1 = vmul.f32 0.35355338, %v570_v7 }
 0x14b   : > { %v3916_v16 = vld.sshfl [vmem:[#allocation1 + $0x10] sm:$0xff pattern:$0x75316420] }
 0x14c   : > { %2100 = vst [vmem:[#allocation1 + $0x10] ss:$2 sm:$0xff] %v3436_v12 }
 0x14d   : > { %2102 = vst [vmem:[#allocation1 + $0x11] ss:$2 sm:$0xff] %v3440_v14  ;;  %v683_v14 = vsel %vm664_vm1, %v3932_v35, -inf }
 0x14f   : > { %1548 = vrot.lane.b32.xlu1 %v3785_v46, %s3347_s7  ;;  %v3912_v31 = vld.sshfl [vmem:[#allocation1] sm:$0xff pattern:$0x75316420]  ;;  %v4913_v46 = vld [vmem:[#allocation34_spill] sm:$0xff] }
 0x150   : > { %2195 = vst [vmem:[#allocation1] ss:$2 sm:$0xff] %v3482_v29  ;;  %v686_v29 = vsel %vm664_vm1, %v3923_v2, -inf }
 0x151   : > { %2197 = vst [vmem:[#allocation1 + $0x1] ss:$2 sm:$0xff] %v3462_v23  ;;  %v674_v23 = vsel %vm664_vm1, %v3920_v1, -inf }
 0x154   : > { %v2112_v12 = vld.sshfl [vmem:[#allocation1 + $0x10] sm:$0xff pattern:$0x75316420] }
 0x155   : > { %2172 = vst [vmem:[#allocation1 + $0x10] ss:$2 sm:$0xff] %v3421_v8 }
 0x156   : > { %2174 = vst [vmem:[#allocation1 + $0x11] ss:$2 sm:$0xff] %v3424_v9 }
 0x157   : > { %2218 = vrot.lane.b32.xlu1 %v2212_v6, %s3348_s8  ;;  %v4915_v6 = vld [vmem:[#allocation38_spill] sm:$0xff] }
 0x158   : > { %v2210_v17 = vld.sshfl [vmem:[#allocation1] sm:$0xff pattern:$0x75316420] }
 0x159   : > { %2347 = vst [vmem:[#allocation1] ss:$2 sm:$0xff] %v3496_v34  ;;  %v3939_v34 = vld.sshfl [vmem:[#allocation1 + $0x30] sm:$0xff pattern:$0x75316420] }
 0x15a   : > { %2349 = vst [vmem:[#allocation1 + $0x1] ss:$2 sm:$0xff] %v3478_v27 }
 0x15b   : > { %2207 = vst [vmem:[#allocation1 + $0x30] ss:$2 sm:$0xff] %v3489_v32  ;;  %v4910_v32 = vld [vmem:[#allocation26_spill] sm:$0xff] }
 0x15c   : > { %2209 = vst [vmem:[#allocation1 + $0x31] ss:$2 sm:$0xff] %v3492_v33  ;;  %v4911_v33 = vld [vmem:[#allocation27_spill] sm:$0xff] }
 0x15d   : > { %v2184_v27 = vld.sshfl [vmem:[#allocation1 + $0x10] sm:$0xff pattern:$0x75316420]  ;;  %v3134_v47 = vpack.i.bf16 %v4911_v33, %v4910_v32 }
 0x15e   : > { %2199 = vst [vmem:[#allocation1 + $0x10] ss:$2 sm:$0xff] %v3465_v24  ;;  %v4909_v24 = vld [vmem:[#allocation35_spill] sm:$0xff] }
 0x15f   : > { %2121 = vrot.lane.b32.xlu1 %v2114_v18, %s3348_s8  ;;  %2201 = vst [vmem:[#allocation1 + $0x11] ss:$2 sm:$0xff] %v3468_v25  ;;  %v4924_v33 = vld [vmem:[#allocation23_spill] sm:$0xff] }
 0x160   : > { %v1679_v25 = vpop.permute.xlu0 %1678 }
 0x163   : > { %675 = vmax.xlane.f32.xlu2 %v674_v23  ;;  %v2213_v9 = vld.sshfl [vmem:[#allocation1 + $0x30] sm:$0xff pattern:$0x75316420] }
 0x164   : > { %2359 = vst [vmem:[#allocation1 + $0x30] ss:$2 sm:$0xff] %v4907_v37 }
 0x165   : > { %2361 = vst [vmem:[#allocation1 + $0x31] ss:$2 sm:$0xff] %v4908_v42 }
 0x166   : > { %687 = vmax.xlane.f32.xlu0 %v686_v29  ;;  %v2211_v8 = vld.sshfl [vmem:[#allocation1 + $0x10] sm:$0xff pattern:$0x75316420]  ;;  %v4918_v29 = vld [vmem:[#allocation28_spill] sm:$0xff] }
 0x167   : > { %2214 = vrot.lane.b32.xlu1 %v2210_v17, %s3348_s8  ;;  %2351 = vst [vmem:[#allocation1 + $0x10] ss:$2 sm:$0xff] %v3480_v28  ;;  %v1677_v28 = vpop.permute.xlu2 %1676  ;;  %v4917_v17 = vld [vmem:[#allocation30_spill] sm:$0xff] }
 0x168   : > { %2353 = vst [vmem:[#allocation1 + $0x11] ss:$2 sm:$0xff] %v3484_v30 }
 0x16b   : > { %684 = vmax.xlane.f32.xlu2 %v683_v14 }
 0x16f   : > { %2117 = vrot.lane.b32.xlu1 %v2112_v12, %s3348_s8 }
 0x177   : > { %2189 = vrot.lane.b32.xlu1 %v2184_v27, %s3348_s8  ;;  %v670_v59 = vpop.xlane.xlu1 %669 }
 0x17a   : > { %1645 = vrot.lane.b32.xlu0 %v3797_v52, %s3347_s7  ;;  %v4912_v52 = vld [vmem:[#allocation31_spill] sm:$0xff] }
 0x17f   : > { %2092 = vrot.lane.b32.xlu1 %v3842_v58, %s3348_s8 }
 0x182   : > { %1546 = vrot.lane.b32.xlu0 %v4909_v24, %s3347_s7 }
 0x183   : > { %1575 = vrot.lane.b32.xlu2 %v3807_v55, %s3347_s7  ;;  %v690_v55 = vsub.f32 %v4913_v46, %v670_v59 }
 0x185   : > { %v699_v10 = vmul.f32 1.442695, %v690_v55 }
 0x187   : > { %3135 = vrot.lane.b32.xlu1 %v3134_v47, %s3346_s6  ;;  %v4925_v47 = vld [vmem:[#allocation25_spill] sm:$0xff] }
 0x189   : > { %v682_v21 = vpop.xlane.xlu1 %681 }
 0x18a   : > { %1649 = vrot.lane.b32.xlu0 %v4912_v52, %s3347_s7  ;;  %v694_v18 = vsub.f32 %v4915_v6, %v682_v21  ;;  %v3149_v52 = vpack.i.bf16 %v4925_v47, %v4924_v33 }
 0x18b   : > { %v667_v30 = vpop.xlane.xlu0 %666  ;;  %1647 = vrot.lane.b32.xlu2 %v3822_v36, %s3347_s7 }
 0x18c   : > { %v689_v61 = vsub.f32 %v3788_v60, %v667_v30 }
 0x18d   : > { %v673_v58 = vpop.xlane.xlu2 %672 }
 0x18e   : > { %v697_v43 = vmul.f32 1.442695, %v689_v61  ;;  %v691_v22 = vsub.f32 %v4916_v20, %v673_v58  ;;  %v3169_v58 = vpack.i.bf16 %v3836_v53, %v3888_v0  ;;  %v4927_v53 = vld [vmem:[#allocation39_spill] sm:$0xff] }
 0x18f   : > { %3160 = vrot.lane.b32.xlu1 %v3159_v50, %s3347_s7 }
 0x190   : > { %3194 = vpow2.f32 %v697_v43  ;;  %v701_v7 = vmul.f32 1.442695, %v691_v22 }
 0x191   : > { %3196 = vpow2.f32 %v699_v10 }
 0x192   : > { %1550 = vrot.lane.b32.xlu0 %v4914_v57, %s3347_s7 }
 0x193   : > { %v679_v26 = vpop.xlane.xlu0 %678  ;;  %2220 = vrot.lane.b32.xlu2 %v2213_v9, %s3348_s8 }
 0x194   : > { %v693_v60 = vsub.f32 %v3799_v38, %v679_v26  ;;  %v707_v38 = vmul.f32 1.442695, %v694_v18 }
 0x195   : > { %v1580_v56 = vpop.permute.xlu2 %1579 }
 0x196   : > { %v3195_v36 = vpop.eup %3194  ;;  %v705_v15 = vmul.f32 1.442695, %v693_v60 }
 0x197   : > { %3017 = vmatmul.msk.f32.vlgmr.msra.gmra.mxu2 %vm664_vm1, %v3195_v36  ;;  %v3980_v13 = vpop.eup %3196  ;;  %v713_v24 = vsel %vm664_vm1, %v3195_v36, 0.0 }
 0x198   : > { %3198 = vpow2.f32 %v705_v15  ;;  %3049 = vmatpush.xpose.msk.msra.mxu2 %vm527_vm0, %v1580_v56  ;;  %v716_v6 = vsel %vm664_vm1, %v3980_v13, 0.0  ;;  %v4928_v56 = vld [vmem:[#allocation33_spill] sm:$0xff] }
 0x199   : > { %3200 = vpow2.f32 %v707_v38 }
 0x19a   : > { %2216 = vrot.lane.b32.xlu0 %v2211_v8, %s3348_s8  ;;  %3202 = vpow2.f32 %v701_v7 }
 0x19b   : > { %1651 = vrot.lane.b32.xlu2 %v4917_v17, %s3347_s7 }
 0x19d   : > { %v1673_v37 = vpop.permute.xlu2 %1672 }
 0x19e   : > { %v3984_v23 = vpop.eup %3198 }
 0x19f   : > { %3021 = vmatmul.msk.f32.vlgmr.msra.gmra.mxu3 %vm664_vm1, %v3984_v23  ;;  %3018 = vmatmul.msk.f32.gmra.mxu2 %vm664_vm1, %v3980_v13  ;;  %v3994_v12 = vpop.eup %3200 }
 0x1a0   : > { %3057 = vmatpush.xpose.msk.msra.mxu3 %vm527_vm0, %v1679_v25  ;;  %v3998_v14 = vpop.eup %3202 }
 0x1a1   : > { %v4006_v8 = vpop.permute.xlu1 %1008 }
 0x1a2   : > { %1552 = vrot.lane.b32.xlu0 %v4918_v29, %s3347_s7 }
 0x1a3   : > { %2119 = vrot.lane.b32.xlu2 %v3859_v19, %s3348_s8 }
 0x1a4   : > { %3058 = vmatpush.xpose.msk.msra.mxu3 %vm527_vm0, %v1677_v28  ;;  %v4922_v28 = vld [vmem:[#allocation22_spill] sm:$0xff] }
 0x1a6   : > { %v4000_v27 = vpop.permute.xlu0 %1109 }
 0x1a7   : > { %3019 = vmatmul.msk.f32.gmra.mxu2 %vm664_vm1, %v3998_v14  ;;  %3022 = vmatmul.msk.f32.gmra.mxu3 %vm664_vm1, %v3994_v12 }
 0x1a9   : > { %v1675_v19 = vpop.permute.xlu1 %1674 }
 0x1aa   : > { %2115 = vrot.lane.b32.xlu0 %v3900_v11, %s3348_s8  ;;  %3059 = vmatpush.xpose.msk.msra.mxu3 %vm527_vm0, %v1675_v19  ;;  %v4919_v11 = vld [vmem:[#allocation36_spill] sm:$0xff] }
 0x1ab   : > { %2187 = vrot.lane.b32.xlu2 %v3912_v31, %s3348_s8  ;;  %v4920_v31 = vld [vmem:[#allocation32_spill] sm:$0xff] }
 0x1ac   : > { %v3139_v42 = vpack.i.bf16 %v4920_v31, %v4919_v11 }
 0x1ae   : > { %v1578_v9 = vpop.permute.xlu0 %1577  ;;  %3060 = vmatpush.xpose.msk.msra.mxu3 %vm527_vm0, %v1673_v37 }
 0x1af   : > { %3050 = vmatpush.xpose.msk.msra.mxu2 %vm527_vm0, %v1578_v9  ;;  %v719_v9 = vsel %vm664_vm1, %v3998_v14, 0.0 }
 0x1b2   : > { %2090 = vrot.lane.b32.xlu0 %v3916_v16, %s3348_s8  ;;  %v1011_v16 = vpop.permute.xlu1 %1010 }
 0x1b3   : > { %2088 = vrot.lane.b32.xlu2 %v3881_v5, %s3348_s8  ;;  %v4921_v5 = vld [vmem:[#allocation41_spill] sm:$0xff] }
 0x1b4   : > { %v3154_v25 = vpack.i.bf16 %v4921_v5, %v3872_v54  ;;  %v4926_v54 = vld [vmem:[#allocation40_spill] sm:$0xff] }
 0x1b5   : > { %v3164_v61 = vpack.i.bf16 %v4926_v54, %v3854_v3 }
 0x1b9   : > { %714 = vadd.xlane.f32.xlu1 %v713_v24 }
 0x1ba   : > { %2193 = vrot.lane.b32.xlu0 %v3939_v34, %s3348_s8  ;;  %v4923_v34 = vld [vmem:[#allocation24_spill] sm:$0xff] }
 0x1bb   : > { %2191 = vrot.lane.b32.xlu2 %v3877_v62, %s3348_s8  ;;  %v3144_v32 = vpack.i.bf16 %v4923_v34, %v4922_v28  ;;  %v1574_v62 = vpop.permute.xlu1 %1573 }
 0x1c2   : > { %3140 = vrot.lane.b32.xlu0 %v3139_v42, %s3346_s6 }
 0x1c3   : > { %2094 = vrot.lane.b32.xlu2 %v3890_v4, %s3348_s8  ;;  %v4038_v59 = vpop.permute.xlu1 %1548 }
 0x1ca   : > { %3155 = vrot.lane.b32.xlu0 %v3154_v25, %s3347_s7 }
 0x1cb   : > { %3145 = vrot.lane.b32.xlu2 %v3144_v32, %s3346_s6  ;;  %v2219_v57 = vpop.permute.xlu1 %2218 }
 0x1d3   : > { %3150 = vrot.lane.b32.xlu2 %v3149_v52, %s3346_s6  ;;  %v2122_v36 = vpop.permute.xlu1 %2121 }
 0x1d6   : > { %v676_v30 = vpop.xlane.xlu2 %675 }
 0x1d7   : > { %v692_v4 = vsub.f32 %v3920_v1, %v676_v30 }
 0x1d9   : > { %v703_v43 = vmul.f32 1.442695, %v692_v4  ;;  %v688_v50 = vpop.xlane.xlu0 %687 }
 0x1da   : > { %v696_v3 = vsub.f32 %v3923_v2, %v688_v50 }
 0x1db   : > { %3204 = vpow2.f32 %v703_v43  ;;  %3165 = vrot.lane.b32.xlu2 %v3164_v61, %s3347_s7  ;;  %v2215_v20 = vpop.permute.xlu1 %2214 }
 0x1dc   : > { %v711_v21 = vmul.f32 1.442695, %v696_v3 }
 0x1de   : > { %v685_v46 = vpop.xlane.xlu2 %684 }
 0x1df   : > { %v695_v55 = vsub.f32 %v3932_v35, %v685_v46 }
 0x1e1   : > { %v3205_v10 = vpop.eup %3204  ;;  %v709_v26 = vmul.f32 1.442695, %v695_v55 }
 0x1e2   : > { %3020 = vmatmul.msk.f32.gmra.mxu2 %vm664_vm1, %v3205_v10  ;;  %v722_v1 = vsel %vm664_vm1, %v3205_v10, 0.0 }
 0x1e3   : > { %3206 = vpow2.f32 %v709_v26  ;;  %3170 = vrot.lane.b32.xlu2 %v3169_v58, %s3347_s7  ;;  %723 = vadd.xlane.f32.xlu1 %v722_v1  ;;  %v2118_v7 = vpop.permute.xlu1 %2117 }
 0x1e4   : > { %3208 = vpow2.f32 %v711_v21 }
 0x1e6   : > { %v1576_v60 = vpop.permute.xlu2 %1575 }
 0x1e7   : > { %3051 = vmatpush.xpose.msk.msra.mxu2 %vm527_vm0, %v1576_v60 }
 0x1e9   : > { %v4052_v35 = vpop.eup %3206 }
 0x1ea   : > { %3023 = vmatmul.msk.f32.gmra.mxu3 %vm664_vm1, %v4052_v35  ;;  %3029 = vmatmul.msk.f32.vlgmr.msrb.gmra.mxu2 %vm527_vm0, %v4927_v53  ;;  %v4060_v15 = vpop.eup %3208 }
 0x1eb   : > { %3052 = vmatpush.xpose.msk.msra.mxu2 %vm527_vm0, %v1574_v62 }
 0x1ec   : > { %v1646_v0 = vpop.permute.xlu0 %1645 }
 0x1ee   : > { %v1648_v2 = vpop.permute.xlu2 %1647 }
 0x1ef   : > { %3073 = vmatpush.xpose.msk.msrb.mxu2 %vm527_vm0, %v2122_v36 }
 0x1f2   : > { %3024 = vmatmul.msk.f32.gmra.mxu3 %vm664_vm1, %v4060_v15  ;;  %3030 = vmatmul.msk.f32.gmra.mxu2 %vm527_vm0, %v4928_v56 }
 0x1f4   : > { %717 = vadd.xlane.f32.xlu0 %v716_v6  ;;  %v1547_v18 = vpop.permute.xlu0 %1546 }
 0x1f6   : > { %v2221_v22 = vpop.permute.xlu2 %2220 }
 0x1fa   : > { %3037 = vmatmul.msk.f32.vlgmr.msrb.gmra.mxu3 %vm527_vm0, %v3829_v51  ;;  %3031 = vmatmul.msk.f32.gmra.mxu2 %vm527_vm0, %v4006_v8  ;;  %v2190_v51 = vpop.permute.xlu1 %2189 }
 0x1fb   : > { %3081 = vmatpush.xpose.msk.msrb.mxu3 %vm527_vm0, %v2221_v22 }
 0x1fc   : > { %v1650_v38 = vpop.permute.xlu0 %1649 }
 0x1fe   : > { %v1652_v13 = vpop.permute.xlu2 %1651 }
 0x1ff   : > { %3082 = vmatpush.xpose.msk.msrb.mxu3 %vm527_vm0, %v2219_v57 }
 0x202   : > { %3038 = vmatmul.msk.f32.gmra.mxu3 %vm527_vm0, %v3840_v63  ;;  %3032 = vmatmul.msk.f32.gmra.mxu2 %vm527_vm0, %v1011_v16  ;;  %v2093_v63 = vpop.permute.xlu1 %2092 }
 0x204   : > { %v1551_v17 = vpop.permute.xlu0 %1550 }
 0x206   : > { %v2120_v29 = vpop.permute.xlu2 %2119 }
 0x207   : > { %3074 = vmatpush.xpose.msk.msrb.mxu2 %vm527_vm0, %v2120_v29 }
 0x20a   : > { %3039 = vmatmul.msk.f32.gmra.mxu3 %vm527_vm0, %v3838_v44  ;;  %3053 = vmatmul.msk.f32.vlgmr.msra.gmra.mxu2 %vm527_vm0, %v1547_v18  ;;  %v725_v44 = vsel %vm664_vm1, %v3984_v23, 0.0  ;;  %v4094_v37 = vpop.permute.xlu1 %3135 }
 0x20b   : > { %3075 = vmatpush.xpose.msk.msrb.mxu2 %vm527_vm0, %v2118_v7 }
 0x20c   : > { %v2217_v8 = vpop.permute.xlu0 %2216  ;;  %720 = vadd.xlane.f32.xlu2 %v719_v9 }
 0x20d   : > { %3083 = vmatpush.xpose.msk.msrb.mxu3 %vm527_vm0, %v2217_v8 }
 0x20e   : > { %v2188_v11 = vpop.permute.xlu2 %2187 }
 0x211   : > { %3084 = vmatpush.xpose.msk.msrb.mxu3 %vm527_vm0, %v2215_v20 }
 0x212   : > { %3040 = vmatmul.msk.f32.gmra.mxu3 %vm527_vm0, %v4000_v27  ;;  %3054 = vmatmul.msk.f32.gmra.mxu2 %vm527_vm0, %v4038_v59  ;;  %v4099_v27 = vpop.permute.xlu1 %3160 }
 0x214   : > { %v1553_v19 = vpop.permute.xlu0 %1552  ;;  %726 = vadd.xlane.f32.xlu2 %v725_v44 }
 0x216   : > { %v2089_v31 = vpop.permute.xlu2 %2088 }
 0x21a   : > { %3061 = vmatmul.msk.f32.vlgmr.msra.gmra.mxu3 %vm527_vm0, %v1646_v0  ;;  %3055 = vmatmul.msk.f32.gmra.mxu2 %vm527_vm0, %v1551_v17  ;;  %v789_v52 = vpop.f32.mrf.mxu2 }
 0x21c   : > { %v2116_v14 = vpop.permute.xlu0 %2115 }
 0x21d   : > { %3076 = vmatpush.xpose.msk.msrb.mxu2 %vm527_vm0, %v2116_v14 }
 0x21e   : > { %v2192_v5 = vpop.permute.xlu2 %2191 }
 0x222   : > { %3062 = vmatmul.msk.f32.gmra.mxu3 %vm527_vm0, %v1648_v2  ;;  %3056 = vmatmul.msk.f32.gmra.mxu2 %vm527_vm0, %v1553_v19  ;;  %v4113_v61 = vpop.f32.mrf.mxu2  ;;  %v4115_v46 = vpop.f32.mrf.mxu3 }
 0x224   : > { %v2091_v42 = vpop.permute.xlu0 %2090 }
 0x226   : > { %v2095_v59 = vpop.permute.xlu2 %2094 }
 0x22a   : > { %3063 = vmatmul.msk.f32.gmra.mxu3 %vm527_vm0, %v1650_v38  ;;  %3077 = vmatmul.msk.f32.vlgmr.msrb.gmra.mxu2 %vm527_vm0, %v2089_v31  ;;  %v4117_v55 = vpop.f32.mrf.mxu2  ;;  %v4119_v50 = vpop.f32.mrf.mxu3 }
 0x22c   : > { %v715_v23 = vpop.xlane.xlu1 %714  ;;  %v2194_v54 = vpop.permute.xlu0 %2193 }
 0x22d   : > { %3210 = vrcp.f32 %v715_v23  ;;  %v876_v28 = vand.u32 2147483648, %v715_v23  ;;  %v874_v32 = vand.u32 2147483647, %v715_v23  ;;  %vm870_vm3 = vweird.f32 %v715_v23 }
 0x22e   : > { %v3146_v43 = vpop.permute.xlu2 %3145 }
 0x22f   : > { %v877_v33 = vor.u32 1.1754944e-38, %v876_v28  ;;  %vm875_vm5 = vcmp.eq.f32.partialorder %v874_v32, 8.507059e+37  ;;  %v3147_v6 = vunpack.i.l.bf16 %v3146_v43  ;;  %v3148_v18 = vunpack.i.h.bf16 %v3146_v43 }
 0x231   : > { %1318 = vmatpush.msrb.mxu0 %v3147_v6 }
 0x232   : > { %3064 = vmatmul.msk.f32.gmra.mxu3 %vm527_vm0, %v1652_v13  ;;  %3078 = vmatmul.msk.f32.gmra.mxu2 %vm527_vm0, %v2091_v42 }
 0x233   : > { %v3211_v24 = vpop.eup %3210  ;;  %1319 = vmatpush.msrb.mxu0 %v3148_v18 }
 0x234   : > { %v866_v16 = vmul.f32 %v3211_v24, %v715_v23  ;;  %vm871_vm2 = vweird.f32 %v3211_v24 }
 0x235   : > { %vm872_vm4 = vmor %vm870_vm3, %vm871_vm2 }
 0x236   : > { %v867_v25 = vsub.f32 1.0, %v866_v16  ;;  %v3151_v58 = vpop.permute.xlu2 %3150 }
 0x237   : > { %v3152_v29 = vunpack.i.l.bf16 %v3151_v58 }
 0x238   : > { %v868_v34 = vmul.f32 %v3211_v24, %v867_v25 }
 0x239   : > { %1320 = vmatpush.msrb.mxu0 %v3152_v29 }
 0x23a   : > { %3085 = vmatmul.msk.f32.vlgmr.msrb.gmra.mxu3 %vm527_vm0, %v2188_v11  ;;  %3079 = vmatmul.msk.f32.gmra.mxu2 %vm527_vm0, %v2093_v63  ;;  %v869_v62 = vadd.f32 %v3211_v24, %v868_v34 }
 0x23c   : > { %v873_v47 = vsel %vm872_vm4, %v3211_v24, %v869_v62 }
 0x23d   : > { %v878_v30 = vsel %vm875_vm5, %v877_v33, %v873_v47 }
 0x23e   : > { %v4108_v4 = vmul.f32 %v878_v30, %v789_v52  ;;  %v3166_v10 = vpop.permute.xlu2 %3165 }
 0x23f   : > { %v3167_v8 = vunpack.i.l.bf16 %v3166_v10  ;;  %v3168_v9 = vunpack.i.h.bf16 %v3166_v10 }
 0x242   : > { %3086 = vmatmul.msk.f32.gmra.mxu3 %vm527_vm0, %v2190_v51  ;;  %3080 = vmatmul.msk.f32.gmra.mxu2 %vm527_vm0, %v2095_v59  ;;  %v3153_v51 = vunpack.i.h.bf16 %v3151_v58 }
 0x244   : > { %1321 = vmatpush.msrb.mxu0 %v3153_v51  ;;  %v4181_v51 = vld.sshfl [vmem:[#allocation1 + $0x30] sm:$0xff pattern:$0x75316420] }
 0x245   : > { %2431 = vst [vmem:[#allocation1 + $0x30] ss:$2 sm:$0xff] %v3533_v48 }
 0x246   : > { %v3171_v53 = vpop.permute.xlu2 %3170  ;;  %1860 = vmatpush.msra.mxu0 %v3167_v8  ;;  %v4930_v8 = vld [vmem:[#allocation7_spill] sm:$0xff]  ;;  %2433 = vst [vmem:[#allocation1 + $0x31] ss:$2 sm:$0xff] %v3536_v49  ;;  %v4932_v49 = vld [vmem:[#allocation9_spill] sm:$0xff] }
 0x247   : > { %v3172_v11 = vunpack.i.l.bf16 %v3171_v53  ;;  %v3173_v42 = vunpack.i.h.bf16 %v3171_v53 }
 0x248   : > { %1861 = vmatpush.msra.mxu0 %v3168_v9 }
 0x24a   : > { %3087 = vmatmul.msk.f32.gmra.mxu3 %vm527_vm0, %v2192_v5  ;;  %1862 = vmatpush.msra.mxu0 %v3172_v11 }
 0x24c   : > { %1863 = vmatpush.msra.mxu0 %v3173_v42 }
 0x24d   : > { %v4197_v48 = vld.sshfl [vmem:[#allocation1 + $0x30] sm:$0xff pattern:$0x75316420] }
 0x252   : > { %3088 = vmatmul.msk.f32.gmra.mxu3 %vm527_vm0, %v2194_v54 }
 0x265   : > { %v4121_v57 = vpop.f32.mrf.mxu2 }
 0x26d   : > { %v4123_v26 = vpop.f32.mrf.mxu3  ;;  %v1072_v1 = vpop.f32.mrf.mxu2 }
 0x26e   : > { %v4125_v3 = vmul.f32 0.35355338, %v1072_v1 }
 0x270   : > { %v1191_v60 = vsel %vm664_vm1, %v4125_v3, -inf }
 0x271   : > { %1192 = vmax.xlane.f32.xlu0 %v1191_v60 }
 0x275   : > { %v4129_v21 = vpop.f32.mrf.mxu3  ;;  %v1075_v0 = vpop.f32.mrf.mxu2 }
 0x276   : > { %v4131_v36 = vmul.f32 0.35355338, %v1075_v0 }
 0x278   : > { %v1194_v2 = vsel %vm664_vm1, %v4131_v36, -inf }
 0x279   : > { %1195 = vmax.xlane.f32.xlu1 %v1194_v2 }
 0x27d   : > { %v1171_v56 = vpop.f32.mrf.mxu3  ;;  %v1078_v20 = vpop.f32.mrf.mxu2 }
 0x27e   : > { %v4135_v22 = vmul.f32 0.35355338, %v1171_v56  ;;  %v4137_v38 = vmul.f32 0.35355338, %v1078_v20 }
 0x27f   : > { %v721_v7 = vpop.xlane.xlu2 %720 }
 0x280   : > { %3212 = vrcp.f32 %v721_v7  ;;  %v1197_v13 = vsel %vm664_vm1, %v4137_v38, -inf  ;;  %v1203_v17 = vsel %vm664_vm1, %v4135_v22, -inf  ;;  %v904_v25 = vand.u32 2147483648, %v721_v7 }
 0x281   : > { %1198 = vmax.xlane.f32.xlu2 %v1197_v13  ;;  %1204 = vmax.xlane.f32.xlu0 %v1203_v17  ;;  %v902_v34 = vand.u32 2147483647, %v721_v7  ;;  %vm898_vm7 = vweird.f32 %v721_v7  ;;  %v4929_v17 = vld [vmem:[#allocation11_spill] sm:$0xff] }
 0x282   : > { %v905_v33 = vor.u32 1.1754944e-38, %v904_v25  ;;  %v4934_v25 = vld [vmem:[#allocation12_spill] sm:$0xff] }
 0x283   : > { %vm903_vm9 = vcmp.eq.f32.partialorder %v902_v34, 8.507059e+37  ;;  %2747 = vst [vmem:[#allocation1 + $0x31] ss:$2 sm:$0xff] %v4934_v25  ;;  %v3137_v34 = vunpack.i.l.bf16 %v4094_v37 }
 0x285   : > { %v1174_v63 = vpop.f32.mrf.mxu3  ;;  %v1081_v44 = vpop.f32.mrf.mxu2  ;;  %1390 = vmatpush.msrb.mxu1 %v3137_v34 }
 0x286   : > { %v3213_v19 = vpop.eup %3212  ;;  %v4143_v14 = vmul.f32 0.35355338, %v1174_v63  ;;  %v4145_v23 = vmul.f32 0.35355338, %v1081_v44  ;;  %v3141_v44 = vpop.permute.xlu0 %3140 }
 0x287   : > { %v894_v31 = vmul.f32 %v3213_v19, %v721_v7  ;;  %vm899_vm6 = vweird.f32 %v3213_v19  ;;  %v4174_v7 = vld.sshfl [vmem:[#allocation1 + $0x20] sm:$0xff pattern:$0x75316420] }
 0x288   : > { %v1200_v16 = vsel %vm664_vm1, %v4145_v23, -inf  ;;  %v1206_v5 = vsel %vm664_vm1, %v4143_v14, -inf  ;;  %vm900_vm8 = vmor %vm898_vm7, %vm899_vm6  ;;  %2427 = vst [vmem:[#allocation1 + $0x20] ss:$2 sm:$0xff] %v4929_v17  ;;  %v3162_v17 = vunpack.i.l.bf16 %v4099_v27 }
 0x289   : > { %v895_v24 = vsub.f32 1.0, %v894_v31  ;;  %1201 = vmax.xlane.f32.xlu0 %v1200_v16  ;;  %1207 = vmax.xlane.f32.xlu2 %v1206_v5  ;;  %2429 = vst [vmem:[#allocation1 + $0x21] ss:$2 sm:$0xff] %v4930_v8  ;;  %v4931_v16 = vld [vmem:[#allocation16_spill] sm:$0xff]  ;;  %v4933_v5 = vld [vmem:[#allocation10_spill] sm:$0xff] }
 0x28a   : > { %2745 = vst [vmem:[#allocation1 + $0x30] ss:$2 sm:$0xff] %v4933_v5 }
 0x28b   : > { %v896_v28 = vmul.f32 %v3213_v19, %v895_v24 }
 0x28d   : > { %v897_v32 = vadd.f32 %v3213_v19, %v896_v28  ;;  %v1177_v62 = vpop.f32.mrf.mxu3  ;;  %v1614_v52 = vpop.f32.mrf.mxu2 }
 0x28e   : > { %v4151_v47 = vmul.f32 0.35355338, %v1177_v62  ;;  %v4153_v30 = vmul.f32 0.35355338, %v1614_v52 }
 0x28f   : > { %v901_v59 = vsel %vm900_vm8, %v3213_v19, %v897_v32  ;;  %v3138_v32 = vunpack.i.h.bf16 %v4094_v37  ;;  %v4204_v62 = vld.sshfl [vmem:[#allocation1] sm:$0xff pattern:$0x75316420] }
 0x290   : > { %v1209_v54 = vsel %vm664_vm1, %v4151_v47, -inf  ;;  %v906_v43 = vsel %vm903_vm9, %v905_v33, %v901_v59  ;;  %v1733_v58 = vsel %vm664_vm1, %v4153_v30, -inf  ;;  %v4192_v42 = vld.sshfl [vmem:[#allocation1 + $0x20] sm:$0xff pattern:$0x75316420] }
 0x291   : > { %v4160_v10 = vmul.f32 %v906_v43, %v4117_v55  ;;  %1210 = vmax.xlane.f32.xlu0 %v1209_v54  ;;  %1734 = vmax.xlane.f32.xlu1 %v1733_v58  ;;  %2741 = vst [vmem:[#allocation1 + $0x20] ss:$2 sm:$0xff] %v4931_v16  ;;  %v4206_v33 = vld.sshfl [vmem:[#allocation1 + $0x10] sm:$0xff pattern:$0x75316420]  ;;  %v3142_v54 = vunpack.i.l.bf16 %v3141_v44  ;;  %v3156_v58 = vpop.permute.xlu0 %3155  ;;  %v4941_v16 = vld [vmem:[#allocation5_spill] sm:$0xff] }
 0x292   : > { %2743 = vst [vmem:[#allocation1 + $0x21] ss:$2 sm:$0xff] %v4932_v49  ;;  %1391 = vmatpush.msrb.mxu1 %v3138_v32  ;;  %v4942_v49 = vld [vmem:[#allocation6_spill] sm:$0xff]  ;;  %v4943_v32 = vld [vmem:[#allocation17_spill] sm:$0xff] }
 0x293   : > { %2419 = vst [vmem:[#allocation1] ss:$2 sm:$0xff] %v3526_v45 }
 0x294   : > { %2421 = vst [vmem:[#allocation1 + $0x1] ss:$2 sm:$0xff] %v3506_v39  ;;  %v4936_v39 = vld [vmem:[#allocation18_spill] sm:$0xff]  ;;  %1392 = vmatpush.msrb.mxu1 %v3142_v54  ;;  %v4944_v54 = vld [vmem:[#allocation13_spill] sm:$0xff] }
 0x295   : > { %v1180_v1 = vpop.f32.mrf.mxu3  ;;  %v1617_v53 = vpop.f32.mrf.mxu2  ;;  %2423 = vst [vmem:[#allocation1 + $0x10] ss:$2 sm:$0xff] %v3509_v40  ;;  %v4937_v40 = vld [vmem:[#allocation19_spill] sm:$0xff] }
 0x296   : > { %v4162_v60 = vmul.f32 0.35355338, %v1180_v1  ;;  %v4164_v0 = vmul.f32 0.35355338, %v1617_v53  ;;  %v3143_v1 = vunpack.i.h.bf16 %v3141_v44  ;;  %2425 = vst [vmem:[#allocation1 + $0x11] ss:$2 sm:$0xff] %v3512_v41  ;;  %v3157_v53 = vunpack.i.l.bf16 %v3156_v58 }
 0x298   : > { %v1212_v2 = vsel %vm664_vm1, %v4162_v60, -inf  ;;  %v1736_v6 = vsel %vm664_vm1, %v4164_v0, -inf  ;;  %1393 = vmatpush.msrb.mxu1 %v3143_v1 }
 0x299   : > { %1213 = vmax.xlane.f32.xlu1 %v1212_v2  ;;  %1737 = vmax.xlane.f32.xlu0 %v1736_v6  ;;  %v4215_v37 = vld.sshfl [vmem:[#allocation1 + $0x20] sm:$0xff pattern:$0x75316420]  ;;  %v4221_v6 = vld.sshfl [vmem:[#allocation1 + $0x30] sm:$0xff pattern:$0x75316420]  ;;  %v4257_v1 = vpop.xlane.xlu0 %717 }
 0x29a   : > { %v4935_v2 = vld [vmem:[#allocation21_spill] sm:$0xff]  ;;  %2757 = vst [vmem:[#allocation1 + $0x21] ss:$2 sm:$0xff] %v4936_v39  ;;  %1932 = vmatpush.msra.mxu1 %v3157_v53 }
 0x29b   : > { %2756 = vst [vmem:[#allocation1 + $0x20] ss:$2 sm:$0xff] %v4935_v2  ;;  %v2434_v8 = vld.sshfl [vmem:[#allocation1] sm:$0xff pattern:$0x75316420] }
 0x29c   : > { %2758 = vst [vmem:[#allocation1 + $0x30] ss:$2 sm:$0xff] %v4937_v40 }
 0x29d   : > { %v1713_v18 = vpop.f32.mrf.mxu3  ;;  %v1620_v56 = vpop.f32.mrf.mxu2 }
 0x29e   : > { %v4170_v55 = vmul.f32 0.35355338, %v1713_v18  ;;  %v4172_v20 = vmul.f32 0.35355338, %v1620_v56  ;;  %v3158_v18 = vunpack.i.h.bf16 %v3156_v58  ;;  %v4946_v58 = vld [vmem:[#allocation15_spill] sm:$0xff] }
 0x2a0   : > { %v1745_v13 = vsel %vm664_vm1, %v4170_v55, -inf  ;;  %v1739_v29 = vsel %vm664_vm1, %v4172_v20, -inf  ;;  %1933 = vmatpush.msra.mxu1 %v3158_v18  ;;  %v4261_v18 = vpop.xlane.xlu1 %723 }
 0x2a1   : > { %1746 = vmax.xlane.f32.xlu1 %v1745_v13  ;;  %1740 = vmax.xlane.f32.xlu2 %v1739_v29  ;;  %v4938_v13 = vld [vmem:[#allocation20_spill] sm:$0xff] }
 0x2a2   : > { %2759 = vst [vmem:[#allocation1 + $0x31] ss:$2 sm:$0xff] %v4938_v13  ;;  %1934 = vmatpush.msra.mxu1 %v3162_v17  ;;  %v4266_v17 = vpop.xlane.xlu2 %726 }
 0x2a5   : > { %v1716_v9 = vpop.f32.mrf.mxu3  ;;  %v1623_v63 = vpop.f32.mrf.mxu2 }
 0x2a6   : > { %v4186_v19 = vmul.f32 0.35355338, %v1716_v9  ;;  %v4188_v11 = vmul.f32 0.35355338, %v1623_v63  ;;  %v4939_v9 = vld [vmem:[#allocation8_spill] sm:$0xff]  ;;  %v3163_v63 = vunpack.i.h.bf16 %v4099_v27  ;;  %v3184_v27 = vpack.i.bf16 %v4174_v7, %v4181_v51 }
 0x2a7   : > { %2733 = vst [vmem:[#allocation1] ss:$2 sm:$0xff] %v4939_v9  ;;  %v3174_v7 = vpack.i.bf16 %v4192_v42, %v4197_v48 }
 0x2a8   : > { %v1748_v31 = vsel %vm664_vm1, %v4186_v19, -inf  ;;  %v1742_v24 = vsel %vm664_vm1, %v4188_v11, -inf  ;;  %1935 = vmatpush.msra.mxu1 %v3163_v63 }
 0x2a9   : > { %1743 = vmax.xlane.f32.xlu0 %v1742_v24  ;;  %1749 = vmax.xlane.f32.xlu2 %v1748_v31  ;;  %v2435_v31 = vld.sshfl [vmem:[#allocation1 + $0x10] sm:$0xff pattern:$0x75316420]  ;;  %v4940_v24 = vld [vmem:[#allocation4_spill] sm:$0xff] }
 0x2aa   : > { %2735 = vst [vmem:[#allocation1 + $0x1] ss:$2 sm:$0xff] %v4940_v24  ;;  %v3179_v51 = vpack.i.bf16 %v2434_v8, %v2435_v31 }
 0x2ab   : > { %2737 = vst [vmem:[#allocation1 + $0x10] ss:$2 sm:$0xff] %v4941_v16 }
 0x2ac   : > { %2739 = vst [vmem:[#allocation1 + $0x11] ss:$2 sm:$0xff] %v4942_v49 }
 0x2ad   : > { %v1719_v28 = vpop.f32.mrf.mxu3  ;;  %v2156_v59 = vpop.f32.mrf.mxu2 }
 0x2ae   : > { %v4208_v52 = vmul.f32 0.35355338, %v1719_v28  ;;  %v4218_v45 = vmul.f32 0.35355338, %v2156_v59 }
 0x2b0   : > { %v1751_v43 = vsel %vm664_vm1, %v4208_v52, -inf  ;;  %v2275_v29 = vsel %vm664_vm1, %v4218_v45, -inf }
 0x2b1   : > { %1752 = vmax.xlane.f32.xlu1 %v1751_v43  ;;  %v4242_v28 = vld.sshfl [vmem:[#allocation1] sm:$0xff pattern:$0x75316420]  ;;  %v4945_v43 = vld [vmem:[#allocation14_spill] sm:$0xff] }
 0x2b2   : > { %2752 = vst [vmem:[#allocation1] ss:$2 sm:$0xff] %v4943_v32 }
 0x2b3   : > { %v4247_v59 = vld.sshfl [vmem:[#allocation1 + $0x10] sm:$0xff pattern:$0x75316420]  ;;  %2753 = vst [vmem:[#allocation1 + $0x1] ss:$2 sm:$0xff] %v4944_v54 }
 0x2b4   : > { %2754 = vst [vmem:[#allocation1 + $0x10] ss:$2 sm:$0xff] %v4945_v43 }
 0x2b5   : > { %v1722_v56 = vpop.f32.mrf.mxu3  ;;  %2755 = vst [vmem:[#allocation1 + $0x11] ss:$2 sm:$0xff] %v4946_v58  ;;  %v2159_v42 = vpop.f32.mrf.mxu2 }
 0x2b6   : > { %v4227_v41 = vmul.f32 0.35355338, %v1722_v56 }
 0x2b8   : > { %v1754_v44 = vsel %vm664_vm1, %v4227_v41, -inf }
 0x2b9   : > { %1755 = vmax.xlane.f32.xlu0 %v1754_v44  ;;  %2276 = vmax.xlane.f32.xlu1 %v2275_v29 }
 0x2bd   : > { %v2255_v5 = vpop.f32.mrf.mxu3  ;;  %v4275_v44 = vpop.f32.mrf.mxu2 }
 0x2be   : > { %v4238_v25 = vmul.f32 0.35355338, %v2255_v5 }
 0x2c0   : > { %v2287_v34 = vsel %vm664_vm1, %v4238_v25, -inf }
 0x2c1   : > { %2288 = vmax.xlane.f32.xlu1 %v2287_v34  ;;  %3185 = vrot.lane.b32.xlu2 %v3184_v27, %s3348_s8 }
 0x2c5   : > { %v2258_v53 = vpop.f32.mrf.mxu3  ;;  %v2165_v58 = vpop.f32.mrf.mxu2 }
 0x2c6   : > { %v4259_v39 = vmul.f32 0.35355338, %v2258_v53 }
 0x2c8   : > { %v2290_v13 = vsel %vm664_vm1, %v4259_v39, -inf }
 0x2cd   : > { %3175 = vrot.lane.b32.xlu0 %v3174_v7, %s3348_s8  ;;  %v2261_v48 = vpop.f32.mrf.mxu3 }
 0x2ce   : > { %v4289_v7 = vmul.f32 0.35355338, %v2261_v48 }
 0x2d0   : > { %v2293_v48 = vsel %vm664_vm1, %v4289_v7, -inf }
 0x2d5   : > { %v2264_v24 = vpop.f32.mrf.mxu3 }
 0x2d6   : > { %v4283_v54 = vmul.f32 0.35355338, %v2264_v24 }
 0x2d8   : > { %v2296_v43 = vsel %vm664_vm1, %v4283_v54, -inf }
 0x2da   : > { %3180 = vrot.lane.b32.xlu1 %v3179_v51, %s3348_s8 }
 0x2e4   : > { %v1193_v2 = vpop.xlane.xlu0 %1192 }
 0x2e5   : > { %v1215_v40 = vsub.f32 %v4125_v3, %v1193_v2  ;;  %v4273_v3 = vmul.f32 0.35355338, %v2159_v42  ;;  %v3189_v2 = vpack.i.bf16 %v4204_v62, %v4206_v33  ;;  %v4295_v42 = vmul.f32 0.35355338, %v2165_v58 }
 0x2e7   : > { %v1223_v56 = vmul.f32 1.442695, %v1215_v40  ;;  %v2278_v31 = vsel %vm664_vm1, %v4273_v3, -inf }
 0x2e9   : > { %3214 = vpow2.f32 %v1223_v56 }
 0x2ea   : > { %2291 = vmax.xlane.f32.xlu2 %v2290_v13 }
 0x2ec   : > { %v1196_v29 = vpop.xlane.xlu1 %1195 }
 0x2ed   : > { %v1216_v8 = vsub.f32 %v4131_v36, %v1196_v29 }
 0x2ef   : > { %v4269_v9 = vpop.eup %3214  ;;  %v1225_v63 = vmul.f32 1.442695, %v1216_v8 }
 0x2f0   : > { %3041 = vmatmul.msk.f32.vlgmr.msrb.gmra.mxu0 %vm664_vm1, %v4269_v9 }
 0x2f1   : > { %3216 = vpow2.f32 %v1225_v63 }
 0x2f4   : > { %v1205_v16 = vpop.xlane.xlu0 %1204  ;;  %v1199_v49 = vpop.xlane.xlu2 %1198 }
 0x2f5   : > { %v1219_v5 = vsub.f32 %v4135_v22, %v1205_v16  ;;  %v1217_v36 = vsub.f32 %v4137_v38, %v1199_v49  ;;  %v728_v49 = vsel %vm664_vm1, %v3994_v12, 0.0  ;;  %v1239_v12 = vsel %vm664_vm1, %v4269_v9, 0.0 }
 0x2f7   : > { %2279 = vmax.xlane.f32.xlu0 %v2278_v31  ;;  %v4281_v27 = vpop.eup %3216  ;;  %v1231_v34 = vmul.f32 1.442695, %v1219_v5  ;;  %v1227_v32 = vmul.f32 1.442695, %v1217_v36 }
 0x2f8   : > { %3042 = vmatmul.msk.f32.gmra.mxu0 %vm664_vm1, %v4281_v27 }
 0x2f9   : > { %3218 = vpow2.f32 %v1231_v34  ;;  %v734_v34 = vsel %vm664_vm1, %v4060_v15, 0.0 }
 0x2fa   : > { %3220 = vpow2.f32 %v1227_v32 }
 0x2fc   : > { %v1202_v22 = vpop.xlane.xlu0 %1201  ;;  %v1208_v38 = vpop.xlane.xlu2 %1207 }
 0x2fd   : > { %v1218_v51 = vsub.f32 %v4145_v23, %v1202_v22  ;;  %v1220_v53 = vsub.f32 %v4143_v14, %v1208_v38  ;;  %v2284_v14 = vsel %vm664_vm1, %v4295_v42, -inf }
 0x2ff   : > { %2297 = vmax.xlane.f32.xlu0 %v2296_v43  ;;  %v3219_v40 = vpop.eup %3218  ;;  %v1229_v56 = vmul.f32 1.442695, %v1218_v51  ;;  %v1233_v13 = vmul.f32 1.442695, %v1220_v53 }
 0x300   : > { %v3221_v29 = vpop.eup %3220  ;;  %3045 = vmatmul.msk.f32.vlgmr.msrb.gmra.mxu1 %vm664_vm1, %v3219_v40  ;;  %v1251_v51 = vsel %vm664_vm1, %v3219_v40, 0.0 }
 0x301   : > { %3222 = vpow2.f32 %v1229_v56  ;;  %3043 = vmatmul.msk.f32.gmra.mxu0 %vm664_vm1, %v3221_v29 }
 0x302   : > { %3224 = vpow2.f32 %v1233_v13  ;;  %3190 = vrot.lane.b32.xlu2 %v3189_v2, %s3348_s8 }
 0x304   : > { %2294 = vmax.xlane.f32.xlu1 %v2293_v48  ;;  %v1211_v23 = vpop.xlane.xlu0 %1210  ;;  %v1735_v62 = vpop.xlane.xlu1 %1734 }
 0x305   : > { %v1221_v33 = vsub.f32 %v4151_v47, %v1211_v23  ;;  %v1757_v8 = vsub.f32 %v4153_v30, %v1735_v62 }
 0x307   : > { %2285 = vmax.xlane.f32.xlu0 %v2284_v14  ;;  %v3223_v63 = vpop.eup %3222  ;;  %v1235_v31 = vmul.f32 1.442695, %v1221_v33  ;;  %v1765_v24 = vmul.f32 1.442695, %v1757_v8  ;;  %v1245_v14 = vsel %vm664_vm1, %v3221_v29, 0.0 }
 0x308   : > { %v3225_v16 = vpop.eup %3224 }
 0x309   : > { %3226 = vpow2.f32 %v1235_v31  ;;  %3044 = vmatmul.msk.f32.gmra.mxu0 %vm664_vm1, %v3223_v63  ;;  %3046 = vmatmul.msk.f32.gmra.mxu1 %vm664_vm1, %v3225_v16  ;;  %v1254_v9 = vsel %vm664_vm1, %v3225_v16, 0.0  ;;  %v1248_v31 = vsel %vm664_vm1, %v3223_v63, 0.0 }
 0x30a   : > { %3228 = vpow2.f32 %v1765_v24 }
 0x30c   : > { %729 = vadd.xlane.f32.xlu1 %v728_v49  ;;  %v1214_v5 = vpop.xlane.xlu1 %1213  ;;  %v1738_v36 = vpop.xlane.xlu0 %1737  ;;  %v4339_v49 = vmul.f32 0.35355338, %v4275_v44 }
 0x30d   : > { %v1222_v47 = vsub.f32 %v4162_v60, %v1214_v5  ;;  %v1758_v30 = vsub.f32 %v4164_v0, %v1738_v36 }
 0x30f   : > { %735 = vadd.xlane.f32.xlu0 %v734_v34  ;;  %v3227_v32 = vpop.eup %3226  ;;  %v1237_v43 = vmul.f32 1.442695, %v1222_v47  ;;  %v1767_v58 = vmul.f32 1.442695, %v1758_v30 }
 0x310   : > { %v4314_v22 = vpop.eup %3228  ;;  %v1257_v63 = vsel %vm664_vm1, %v3227_v32, 0.0 }
 0x311   : > { %3230 = vpow2.f32 %v1237_v43  ;;  %3047 = vmatmul.msk.f32.gmra.mxu1 %vm664_vm1, %v3227_v32  ;;  %3065 = vmatmul.msk.f32.vlgmr.msra.gmra.mxu0 %vm664_vm1, %v4314_v22  ;;  %v731_v32 = vsel %vm664_vm1, %v4052_v35, 0.0 }
 0x312   : > { %3232 = vpow2.f32 %v1767_v58 }
 0x314   : > { %1240 = vadd.xlane.f32.xlu1 %v1239_v12  ;;  %v1747_v60 = vpop.xlane.xlu1 %1746  ;;  %v1741_v0 = vpop.xlane.xlu2 %1740 }
 0x315   : > { %v1761_v15 = vsub.f32 %v4170_v55, %v1747_v60  ;;  %v1759_v38 = vsub.f32 %v4172_v20, %v1741_v0 }
 0x317   : > { %1252 = vadd.xlane.f32.xlu0 %v1251_v51  ;;  %v4324_v53 = vpop.eup %3230  ;;  %v1773_v2 = vmul.f32 1.442695, %v1761_v15  ;;  %v1769_v56 = vmul.f32 1.442695, %v1759_v38 }
 0x318   : > { %v3233_v13 = vpop.eup %3232 }
 0x319   : > { %3234 = vpow2.f32 %v1773_v2  ;;  %3048 = vmatmul.msk.f32.gmra.mxu1 %vm664_vm1, %v4324_v53  ;;  %3066 = vmatmul.msk.f32.gmra.mxu0 %vm664_vm1, %v3233_v13  ;;  %v1784_v29 = vsel %vm664_vm1, %v3233_v13, 0.0  ;;  %v1242_v2 = vsel %vm664_vm1, %v4281_v27, 0.0 }
 0x31a   : > { %3236 = vpow2.f32 %v1769_v56 }
 0x31c   : > { %1255 = vadd.xlane.f32.xlu1 %v1254_v9  ;;  %v1744_v55 = vpop.xlane.xlu0 %1743  ;;  %v1750_v20 = vpop.xlane.xlu2 %1749 }
 0x31d   : > { %v1760_v40 = vsub.f32 %v4188_v11, %v1744_v55  ;;  %v1762_v48 = vsub.f32 %v4186_v19, %v1750_v20 }
 0x31f   : > { %1246 = vadd.xlane.f32.xlu0 %v1245_v14  ;;  %v3235_v23 = vpop.eup %3234  ;;  %v1771_v62 = vmul.f32 1.442695, %v1760_v40  ;;  %v1775_v33 = vmul.f32 1.442695, %v1762_v48  ;;  %v1781_v48 = vsel %vm664_vm1, %v4314_v22, 0.0 }
 0x320   : > { %v3237_v8 = vpop.eup %3236  ;;  %v1793_v12 = vsel %vm664_vm1, %v3235_v23, 0.0 }
 0x321   : > { %3238 = vpow2.f32 %v1771_v62  ;;  %3067 = vmatmul.msk.f32.gmra.mxu0 %vm664_vm1, %v3237_v8  ;;  %3069 = vmatmul.msk.f32.vlgmr.msra.gmra.mxu1 %vm664_vm1, %v3235_v23  ;;  %v1787_v38 = vsel %vm664_vm1, %v3237_v8, 0.0  ;;  %v1260_v23 = vsel %vm664_vm1, %v4324_v53, 0.0 }
 0x322   : > { %3240 = vpow2.f32 %v1775_v33 }
 0x324   : > { %v1753_v24 = vpop.xlane.xlu1 %1752  ;;  %1249 = vadd.xlane.f32.xlu1 %v1248_v31  ;;  %v3186_v19 = vpop.permute.xlu2 %3185 }
 0x325   : > { %v1763_v11 = vsub.f32 %v4208_v52, %v1753_v24  ;;  %v3187_v16 = vunpack.i.l.bf16 %v3186_v19  ;;  %v3188_v30 = vunpack.i.h.bf16 %v3186_v19  ;;  %v2281_v52 = vsel %vm664_vm1, %v4339_v49, -inf }
 0x327   : > { %v1777_v5 = vmul.f32 1.442695, %v1763_v11  ;;  %1785 = vadd.xlane.f32.xlu0 %v1784_v29  ;;  %v3239_v36 = vpop.eup %3238  ;;  %2402 = vmatpush.msrb.mxu0 %v3187_v16 }
 0x328   : > { %v3241_v47 = vpop.eup %3240 }
 0x329   : > { %3242 = vpow2.f32 %v1777_v5  ;;  %3068 = vmatmul.msk.f32.gmra.mxu0 %vm664_vm1, %v3239_v36  ;;  %3070 = vmatmul.msk.f32.gmra.mxu1 %vm664_vm1, %v3241_v47  ;;  %v1796_v56 = vsel %vm664_vm1, %v3241_v47, 0.0 }
 0x32a   : > { %2403 = vmatpush.msrb.mxu0 %v3188_v30 }
 0x32b   : > { %2282 = vmax.xlane.f32.xlu2 %v2281_v52 }
 0x32c   : > { %v1756_v44 = vpop.xlane.xlu0 %1755  ;;  %v2277_v34 = vpop.xlane.xlu1 %2276  ;;  %1258 = vadd.xlane.f32.xlu1 %v1257_v63 }
 0x32d   : > { %v1764_v43 = vsub.f32 %v4227_v41, %v1756_v44  ;;  %v2299_v58 = vsub.f32 %v4218_v45, %v2277_v34 }
 0x32f   : > { %v3243_v60 = vpop.eup %3242  ;;  %v1779_v0 = vmul.f32 1.442695, %v1764_v43  ;;  %1794 = vadd.xlane.f32.xlu0 %v1793_v12  ;;  %v2307_v15 = vmul.f32 1.442695, %v2299_v58 }
 0x330   : > { %v1799_v41 = vsel %vm664_vm1, %v3243_v60, 0.0 }
 0x331   : > { %3244 = vpow2.f32 %v1779_v0  ;;  %3071 = vmatmul.msk.f32.gmra.mxu1 %vm664_vm1, %v3243_v60 }
 0x332   : > { %3246 = vpow2.f32 %v2307_v15 }
 0x333   : > { %732 = vadd.xlane.f32.xlu2 %v731_v32 }
 0x334   : > { %1788 = vadd.xlane.f32.xlu1 %v1787_v38  ;;  %v2289_v9 = vpop.xlane.xlu1 %2288 }
 0x335   : > { %v2303_v40 = vsub.f32 %v4238_v25, %v2289_v9  ;;  %v1790_v25 = vsel %vm664_vm1, %v3239_v36, 0.0 }
 0x337   : > { %v3245_v45 = vpop.eup %3244  ;;  %1800 = vadd.xlane.f32.xlu0 %v1799_v41  ;;  %v2315_v27 = vmul.f32 1.442695, %v2303_v40 }
 0x338   : > { %v3247_v51 = vpop.eup %3246  ;;  %v1802_v14 = vsel %vm664_vm1, %v3245_v45, 0.0 }
 0x339   : > { %3072 = vmatmul.msk.f32.gmra.mxu1 %vm664_vm1, %v3245_v45  ;;  %v2323_v35 = vsel %vm664_vm1, %v3247_v51, 0.0  ;;  %3248 = vpow2.f32 %v2315_v27 }
 0x33b   : > { %1243 = vadd.xlane.f32.xlu2 %v1242_v2 }
 0x33c   : > { %1797 = vadd.xlane.f32.xlu1 %v1796_v56 }
 0x33f   : > { %2324 = vadd.xlane.f32.xlu0 %v2323_v35  ;;  %v3176_v13 = vpop.permute.xlu0 %3175  ;;  %v3249_v31 = vpop.eup %3248 }
 0x340   : > { %v3177_v55 = vunpack.i.l.bf16 %v3176_v13  ;;  %v3178_v20 = vunpack.i.h.bf16 %v3176_v13  ;;  %v2335_v22 = vsel %vm664_vm1, %v3249_v31, 0.0 }
 0x342   : > { %2474 = vmatpush.msrb.mxu1 %v3177_v55 }
 0x343   : > { %1782 = vadd.xlane.f32.xlu2 %v1781_v48 }
 0x344   : > { %1803 = vadd.xlane.f32.xlu1 %v1802_v14  ;;  %2475 = vmatpush.msrb.mxu1 %v3178_v20 }
 0x34b   : > { %1261 = vadd.xlane.f32.xlu2 %v1260_v23 }
 0x34c   : > { %v3181_v62 = vpop.permute.xlu1 %3180 }
 0x34d   : > { %v3183_v33 = vunpack.i.h.bf16 %v3181_v62  ;;  %v3182_v8 = vunpack.i.l.bf16 %v3181_v62 }
 0x34f   : > { %2476 = vmatpush.msrb.mxu1 %v3182_v8 }
 0x351   : > { %2477 = vmatpush.msrb.mxu1 %v3183_v33 }
 0x352   : > { %3093 = vmatmul.msk.f32.vlgmr.msrb.gmra.mxu1 %vm664_vm1, %v3249_v31 }
 0x353   : > { %1791 = vadd.xlane.f32.xlu2 %v1790_v25 }
 0x35b   : > { %2336 = vadd.xlane.f32.xlu2 %v2335_v22 }
 0x35d   : > { %v2292_v24 = vpop.xlane.xlu2 %2291 }
 0x35e   : > { %v2304_v11 = vsub.f32 %v4259_v39, %v2292_v24 }
 0x360   : > { %v2317_v19 = vmul.f32 1.442695, %v2304_v11 }
 0x362   : > { %3250 = vpow2.f32 %v2317_v19 }
 0x365   : > { %v3191_v53 = vpop.permute.xlu2 %3190 }
 0x366   : > { %v3192_v16 = vunpack.i.l.bf16 %v3191_v53  ;;  %v3193_v5 = vunpack.i.h.bf16 %v3191_v53 }
 0x368   : > { %v3251_v29 = vpop.eup %3250  ;;  %2404 = vmatpush.msrb.mxu0 %v3192_v16 }
 0x369   : > { %3094 = vmatmul.msk.f32.gmra.mxu1 %vm664_vm1, %v3251_v29  ;;  %v2338_v30 = vsel %vm664_vm1, %v3251_v29, 0.0 }
 0x36a   : > { %v2280_v47 = vpop.xlane.xlu0 %2279  ;;  %2339 = vadd.xlane.f32.xlu0 %v2338_v30  ;;  %2405 = vmatpush.msrb.mxu0 %v3193_v5 }
 0x36b   : > { %v2300_v36 = vsub.f32 %v4273_v3, %v2280_v47  ;;  %3089 = vmatmul.msk.f32.vlgmr.msrb.gmra.mxu0 %vm664_vm1, %v3247_v51 }
 0x36d   : > { %v2309_v52 = vmul.f32 1.442695, %v2300_v36  ;;  %v4378_v15 = vpop.f32.mrf.mxu0 }
 0x36f   : > { %3252 = vpow2.f32 %v2309_v52 }
 0x372   : > { %v2298_v39 = vpop.xlane.xlu0 %2297 }
 0x373   : > { %v2306_v60 = vsub.f32 %v4283_v54, %v2298_v39 }
 0x375   : > { %v3253_v63 = vpop.eup %3252  ;;  %v2321_v41 = vmul.f32 1.442695, %v2306_v60  ;;  %v4392_v2 = vpop.f32.mrf.mxu0 }
 0x376   : > { %3090 = vmatmul.msk.f32.gmra.mxu0 %vm664_vm1, %v3253_v63  ;;  %v2326_v44 = vsel %vm664_vm1, %v3253_v63, 0.0 }
 0x377   : > { %v2295_v34 = vpop.xlane.xlu1 %2294  ;;  %2327 = vadd.xlane.f32.xlu1 %v2326_v44 }
 0x378   : > { %v2305_v43 = vsub.f32 %v4289_v7, %v2295_v34 }
 0x37a   : > { %v2319_v58 = vmul.f32 1.442695, %v2305_v43  ;;  %v2286_v12 = vpop.xlane.xlu0 %2285 }
 0x37b   : > { %v2302_v3 = vsub.f32 %v4295_v42, %v2286_v12 }
 0x37c   : > { %3254 = vpow2.f32 %v2319_v58 }
 0x37d   : > { %v2313_v0 = vmul.f32 1.442695, %v2302_v3  ;;  %v1395_v32 = vpop.f32.mrf.mxu1 }
 0x37e   : > { %v4400_v62 = vpop.f32.mrf.mxu0 }
 0x37f   : > { %3256 = vpow2.f32 %v2313_v0  ;;  %v4380_v38 = vpop.xlane.xlu1 %729 }
 0x380   : > { %3258 = vpow2.f32 %v2321_v41 }
 0x382   : > { %v4382_v45 = vpop.eup %3254  ;;  %v4384_v51 = vpop.xlane.xlu0 %735 }
 0x383   : > { %3095 = vmatmul.msk.f32.gmra.mxu1 %vm664_vm1, %v4382_v45 }
 0x385   : > { %v4388_v7 = vpop.eup %3256 }
 0x386   : > { %v2332_v54 = vsel %vm664_vm1, %v4388_v7, 0.0  ;;  %v4394_v56 = vpop.f32.mrf.mxu1  ;;  %v3259_v35 = vpop.eup %3258 }
 0x387   : > { %2333 = vadd.xlane.f32.xlu0 %v2332_v54  ;;  %v1241_v42 = vpop.xlane.xlu1 %1240  ;;  %v2344_v9 = vsel %vm664_vm1, %v3259_v35, 0.0  ;;  %v4410_v43 = vpop.f32.mrf.mxu0 }
 0x388   : > { %3260 = vrcp.f32 %v1241_v42  ;;  %v1418_v19 = vand.u32 2147483648, %v1241_v42  ;;  %vm1412_vm13 = vweird.f32 %v1241_v42  ;;  %v1416_v5 = vand.u32 2147483647, %v1241_v42 }
 0x38a   : > { %v1253_v13 = vpop.xlane.xlu0 %1252  ;;  %v1419_v63 = vor.u32 1.1754944e-38, %v1418_v19  ;;  %vm1417_vm3 = vcmp.eq.f32.partialorder %v1416_v5, 8.507059e+37 }
 0x38b   : > { %3262 = vrcp.f32 %v1253_v13  ;;  %3096 = vmatmul.msk.f32.gmra.mxu1 %vm664_vm1, %v3259_v35  ;;  %v1474_v22 = vand.u32 2147483648, %v1253_v13  ;;  %v1472_v24 = vand.u32 2147483647, %v1253_v13  ;;  %vm1468_vm12 = vweird.f32 %v1253_v13 }
 0x38d   : > { %v1475_v47 = vor.u32 1.1754944e-38, %v1474_v22  ;;  %vm1473_vm2 = vcmp.eq.f32.partialorder %v1472_v24, 8.507059e+37 }
 0x38e   : > { %v3261_v55 = vpop.eup %3260  ;;  %v4402_v33 = vpop.f32.mrf.mxu1 }
 0x38f   : > { %2345 = vadd.xlane.f32.xlu0 %v2344_v9  ;;  %v1408_v20 = vmul.f32 %v3261_v55, %v1241_v42  ;;  %v4398_v40 = vpop.xlane.xlu1 %1255  ;;  %vm1413_vm11 = vweird.f32 %v3261_v55  ;;  %v4432_v19 = vpop.f32.mrf.mxu0 }
 0x390   : > { %vm1414_vm15 = vmor %vm1412_vm13, %vm1413_vm11 }
 0x391   : > { %v3263_v48 = vpop.eup %3262  ;;  %v1409_v14 = vsub.f32 1.0, %v1408_v20 }
 0x392   : > { %v1464_v27 = vmul.f32 %v3263_v48, %v1253_v13  ;;  %v1247_v23 = vpop.xlane.xlu0 %1246  ;;  %vm1469_vm10 = vweird.f32 %v3263_v48 }
 0x393   : > { %3264 = vrcp.f32 %v1247_v23  ;;  %v1410_v8 = vmul.f32 %v3261_v55, %v1409_v14  ;;  %vm1470_vm14 = vmor %vm1468_vm12, %vm1469_vm10  ;;  %v1446_v60 = vand.u32 2147483648, %v1247_v23  ;;  %v1444_v54 = vand.u32 2147483647, %v1247_v23 }
 0x394   : > { %v1465_v31 = vsub.f32 1.0, %v1464_v27  ;;  %vm1440_vm5 = vweird.f32 %v1247_v23 }
 0x395   : > { %v1411_v11 = vadd.f32 %v3261_v55, %v1410_v8  ;;  %vm1445_vm7 = vcmp.eq.f32.partialorder %v1444_v54, 8.507059e+37 }
 0x396   : > { %v1466_v25 = vmul.f32 %v3263_v48, %v1465_v31  ;;  %v4412_v58 = vpop.f32.mrf.mxu1 }
 0x397   : > { %v4404_v53 = vpop.xlane.xlu1 %1249  ;;  %v1415_v39 = vsel %vm1414_vm15, %v3261_v55, %v1411_v11 }
 0x398   : > { %v1467_v16 = vadd.f32 %v3263_v48, %v1466_v25  ;;  %3266 = vrcp.f32 %v4404_v53  ;;  %v1420_v0 = vsel %vm1417_vm3, %v1419_v63, %v1415_v39  ;;  %vm1454_vm9 = vweird.f32 %v4404_v53 }
 0x399   : > { %v3265_v29 = vpop.eup %3264  ;;  %v1519_v20 = vmul.f32 %v1420_v0, %v4378_v15 }
 0x39a   : > { %v1436_v30 = vmul.f32 %v3265_v29, %v1247_v23  ;;  %v4407_v36 = vpop.xlane.xlu0 %1785  ;;  %v1471_v52 = vsel %vm1470_vm14, %v3263_v48, %v1467_v16  ;;  %vm1441_vm4 = vweird.f32 %v3265_v29  ;;  %v1447_v48 = vor.u32 1.1754944e-38, %v1446_v60 }
 0x39b   : > { %3268 = vrcp.f32 %v4407_v36  ;;  %v1476_v34 = vsel %vm1473_vm2, %v1475_v47, %v1471_v52  ;;  %vm1442_vm6 = vmor %vm1440_vm5, %vm1441_vm4  ;;  %v1460_v16 = vand.u32 2147483648, %v4404_v53  ;;  %v1458_v52 = vand.u32 2147483647, %v4404_v53 }
 0x39c   : > { %v1437_v44 = vsub.f32 1.0, %v1436_v30  ;;  %v1523_v12 = vmul.f32 %v1476_v34, %v1395_v32  ;;  %v1974_v54 = vand.u32 2147483648, %v4407_v36  ;;  %vm1968_vm13 = vweird.f32 %v4407_v36 }
 0x39d   : > { %v1461_v0 = vor.u32 1.1754944e-38, %v1460_v16  ;;  %vm1459_vm12 = vcmp.eq.f32.partialorder %v1458_v52, 8.507059e+37 }
 0x39e   : > { %v1438_v3 = vmul.f32 %v3265_v29, %v1437_v44  ;;  %v3267_v41 = vpop.eup %3266  ;;  %2627 = vrot.lane.b32.xlu1 %v1523_v12, %s3349_s9  ;;  %v2283_v35 = vpop.xlane.xlu2 %2282 }
 0x39f   : > { %v1450_v42 = vmul.f32 %v3267_v41, %v4404_v53  ;;  %v4416_v13 = vpop.xlane.xlu1 %1258  ;;  %v2301_v32 = vsub.f32 %v4339_v49, %v2283_v35  ;;  %vm1455_vm8 = vweird.f32 %v3267_v41  ;;  %v4436_v5 = vpop.f32.mrf.mxu1  ;;  %v1972_v35 = vand.u32 2147483647, %v4407_v36 }
 0x3a0   : > { %v1439_v9 = vadd.f32 %v3265_v29, %v1438_v3  ;;  %3270 = vrcp.f32 %v4416_v13  ;;  %vm4449_vm10 = vmor %vm1454_vm9, %vm1455_vm8  ;;  %vm1496_vm3 = vweird.f32 %v4416_v13 }
 0x3a1   : > { %v4418_v55 = vpop.eup %3268  ;;  %v1451_v14 = vsub.f32 1.0, %v1450_v42  ;;  %v2311_v31 = vmul.f32 1.442695, %v2301_v32  ;;  %vm1973_vm15 = vcmp.eq.f32.partialorder %v1972_v35, 8.507059e+37 }
 0x3a2   : > { %v1964_v27 = vmul.f32 %v4418_v55, %v4407_v36  ;;  %v4425_v23 = vpop.xlane.xlu0 %1794  ;;  %v1443_v8 = vsel %vm1442_vm6, %v3265_v29, %v1439_v9  ;;  %vm1969_vm11 = vweird.f32 %v4418_v55  ;;  %v1502_v36 = vand.u32 2147483648, %v4416_v13 }
 0x3a3   : > { %3272 = vrcp.f32 %v4425_v23  ;;  %2619 = vrot.lane.b32.xlu0 %v1519_v20, %s3349_s9  ;;  %v1452_v49 = vmul.f32 %v3267_v41, %v1451_v14  ;;  %v1448_v22 = vsel %vm1445_vm7, %v1447_v48, %v1443_v8  ;;  %vm4469_vm14 = vmor %vm1968_vm13, %vm1969_vm11  ;;  %vm2010_vm4 = vweird.f32 %v4425_v23 }
 0x3a4   : > { %v1965_v25 = vsub.f32 1.0, %v1964_v27  ;;  %3274 = vpow2.f32 %v2311_v31  ;;  %v1521_v15 = vmul.f32 %v1448_v22, %v4400_v62  ;;  %v1975_v27 = vor.u32 1.1754944e-38, %v1974_v54 }
 0x3a5   : > { %v1453_v24 = vadd.f32 %v3267_v41, %v1452_v49  ;;  %v1500_v49 = vand.u32 2147483647, %v4416_v13  ;;  %v1503_v52 = vor.u32 1.1754944e-38, %v1502_v36  ;;  %v2016_v63 = vand.u32 2147483648, %v4425_v23 }
 0x3a6   : > { %v4430_v11 = vpop.eup %3270  ;;  %v1966_v29 = vmul.f32 %v4418_v55, %v1965_v25  ;;  %2623 = vrot.lane.b32.xlu1 %v1521_v15, %s3349_s9  ;;  %v4442_v62 = vpop.xlane.xlu2 %732 }
 0x3a7   : > { %v1492_v47 = vmul.f32 %v4430_v11, %v4416_v13  ;;  %v4444_v30 = vpop.xlane.xlu1 %1788  ;;  %v1457_v3 = vsel %vm4449_vm10, %v3267_v41, %v1453_v24  ;;  %vm1497_vm2 = vweird.f32 %v4430_v11  ;;  %v4488_v15 = vpop.f32.mrf.mxu1  ;;  %vm1501_vm6 = vcmp.eq.f32.partialorder %v1500_v49, 8.507059e+37 }
 0x3a8   : > { %v1967_v53 = vadd.f32 %v4418_v55, %v1966_v29  ;;  %v1462_v9 = vsel %vm1459_vm12, %v1461_v0, %v1457_v3  ;;  %vm1498_vm5 = vmor %vm1496_vm3, %vm1497_vm2 }
 0x3a9   : > { %v4447_v39 = vpop.eup %3272  ;;  %v1493_v44 = vsub.f32 1.0, %v1492_v47  ;;  %v1522_v20 = vmul.f32 %v1462_v9, %v4410_v43  ;;  %v2341_v47 = vsel %vm664_vm1, %v4382_v45, 0.0 }
 0x3aa   : > { %v2006_v34 = vmul.f32 %v4447_v39, %v4425_v23  ;;  %v4455_v12 = vpop.xlane.xlu0 %1800  ;;  %v3275_v60 = vpop.eup %3274  ;;  %v1971_v14 = vsel %vm4469_vm14, %v4418_v55, %v1967_v53  ;;  %vm2011_vm7 = vweird.f32 %v4447_v39 }
 0x3ab   : > { %3276 = vrcp.f32 %v4455_v12  ;;  %3091 = vmatmul.msk.f32.gmra.mxu0 %vm664_vm1, %v3275_v60  ;;  %v2329_v42 = vsel %vm664_vm1, %v3275_v60, 0.0  ;;  %v1494_v41 = vmul.f32 %v4430_v11, %v1493_v44  ;;  %2625 = vrot.lane.b32.xlu0 %v1522_v20, %s3349_s9  ;;  %v1868_v55 = vpop.f32.mrf.mxu0  ;;  %v1976_v24 = vsel %vm1973_vm15, %v1975_v27, %v1971_v14  ;;  %vm4526_vm9 = vmor %vm2010_vm4, %vm2011_vm7 }
 0x3ac   : > { %2330 = vadd.xlane.f32.xlu2 %v2329_v42  ;;  %v2007_v32 = vsub.f32 1.0, %v2006_v34  ;;  %3278 = vrcp.f32 %v4398_v40  ;;  %v2062_v29 = vmul.f32 %v1976_v24, %v1868_v55  ;;  %v2014_v44 = vand.u32 2147483647, %v4425_v23 }
 0x3ad   : > { %v1495_v43 = vadd.f32 %v4430_v11, %v1494_v41  ;;  %v2042_v53 = vand.u32 2147483647, %v4455_v12  ;;  %v2017_v41 = vor.u32 1.1754944e-38, %v2016_v63  ;;  %vm2038_vm10 = vweird.f32 %v4455_v12 }
 0x3ae   : > { %v4479_v8 = vpop.xlane.xlu2 %1243  ;;  %v2008_v22 = vmul.f32 %v4447_v39, %v2007_v32  ;;  %2653 = vrot.lane.b32.xlu1 %v2062_v29, %s3350_s10  ;;  %vm2015_vm12 = vcmp.eq.f32.partialorder %v2014_v44, 8.507059e+37 }
 0x3af   : > { %v4481_v31 = vpop.xlane.xlu1 %1797  ;;  %3280 = vrcp.f32 %v4479_v8  ;;  %v1499_v45 = vsel %vm1498_vm5, %v4430_v11, %v1495_v43  ;;  %vm2043_vm13 = vcmp.eq.f32.partialorder %v2042_v53, 8.507059e+37  ;;  %vm1426_vm4 = vweird.f32 %v4479_v8 }
 0x3b0   : > { %3282 = vrcp.f32 %v4481_v31  ;;  %v1504_v3 = vsel %vm1501_vm6, %v1503_v52, %v1499_v45  ;;  %v2009_v60 = vadd.f32 %v4447_v39, %v2008_v22  ;;  %v1943_v22 = vpop.f32.mrf.mxu1  ;;  %v2030_v52 = vand.u32 2147483648, %v4481_v31 }
 0x3b1   : > { %v3277_v25 = vpop.eup %3276  ;;  %3284 = vrcp.f32 %v4444_v30  ;;  %v1525_v42 = vmul.f32 %v1504_v3, %v4402_v33  ;;  %v2028_v63 = vand.u32 2147483647, %v4481_v31  ;;  %vm2024_vm15 = vweird.f32 %v4481_v31 }
 0x3b2   : > { %v2034_v16 = vmul.f32 %v3277_v25, %v4455_v12  ;;  %v4502_v13 = vpop.eup %3278  ;;  %vm2039_vm8 = vweird.f32 %v3277_v25  ;;  %v2013_v27 = vsel %vm4526_vm9, %v4447_v39, %v2009_v60  ;;  %v1430_v48 = vand.u32 2147483647, %v4479_v8 }
 0x3b3   : > { %3092 = vmatmul.msk.f32.gmra.mxu0 %vm664_vm1, %v4388_v7  ;;  %v2044_v7 = vand.u32 2147483648, %v4455_v12  ;;  %v1478_v11 = vmul.f32 %v4502_v13, %v4398_v40  ;;  %2631 = vrot.lane.b32.xlu0 %v1525_v42, %s3349_s9  ;;  %vm2040_vm11 = vmor %vm2038_vm10, %vm2039_vm8  ;;  %v1432_v42 = vand.u32 2147483648, %v4479_v8  ;;  %vm2029_vm5 = vcmp.eq.f32.partialorder %v2028_v63, 8.507059e+37 }
 0x3b4   : > { %v2035_v34 = vsub.f32 1.0, %v2034_v16  ;;  %2342 = vadd.xlane.f32.xlu2 %v2341_v47  ;;  %v2018_v16 = vsel %vm2015_vm12, %v2017_v41, %v2013_v27  ;;  %vm1431_vm9 = vcmp.eq.f32.partialorder %v1430_v48, 8.507059e+37 }
 0x3b5   : > { %v4510_v0 = vpop.eup %3280  ;;  %v2045_v36 = vor.u32 1.1754944e-38, %v2044_v7  ;;  %v1479_v55 = vsub.f32 1.0, %v1478_v11  ;;  %v2065_v44 = vmul.f32 %v2018_v16, %v4436_v5 }
 0x3b6   : > { %v2036_v54 = vmul.f32 %v3277_v25, %v2035_v34  ;;  %v3283_v35 = vpop.eup %3282  ;;  %v1422_v9 = vmul.f32 %v4510_v0, %v4479_v8  ;;  %v4518_v32 = vpop.xlane.xlu2 %1782  ;;  %vm1427_vm3 = vweird.f32 %v4510_v0 }
 0x3b7   : > { %v4520_v20 = vpop.xlane.xlu1 %1803  ;;  %v2020_v14 = vmul.f32 %v3283_v35, %v4481_v31  ;;  %v4539_v12 = vpop.eup %3284  ;;  %vm2025_vm14 = vweird.f32 %v3283_v35  ;;  %v1480_v7 = vmul.f32 %v4502_v13, %v1479_v55  ;;  %vm1428_vm6 = vmor %vm1426_vm4, %vm1427_vm3 }
 0x3b8   : > { %v2037_v33 = vadd.f32 %v3277_v25, %v2036_v54  ;;  %v1423_v43 = vsub.f32 1.0, %v1422_v9  ;;  %3286 = vrcp.f32 %v4520_v20  ;;  %v2031_v54 = vor.u32 1.1754944e-38, %v2030_v52  ;;  %vm2026_vm2 = vmor %vm2024_vm15, %vm2025_vm14 }
 0x3b9   : > { %v2021_v49 = vsub.f32 1.0, %v2020_v14  ;;  %3288 = vrcp.f32 %v4518_v32  ;;  %v2058_v14 = vand.u32 2147483648, %v4520_v20  ;;  %v2056_v27 = vand.u32 2147483647, %v4520_v20 }
 0x3ba   : > { %v2041_v23 = vsel %vm2040_vm11, %v3277_v25, %v2037_v33  ;;  %v1424_v39 = vmul.f32 %v4510_v0, %v1423_v43  ;;  %v1978_v25 = vmul.f32 %v4539_v12, %v4444_v30  ;;  %vm2052_vm8 = vweird.f32 %v4520_v20 }
 0x3bb   : > { %v2046_v24 = vsel %vm2043_vm13, %v2045_v36, %v2041_v23  ;;  %v2022_v47 = vmul.f32 %v3283_v35, %v2021_v49  ;;  %2659 = vrot.lane.b32.xlu0 %v2065_v44, %s3350_s10  ;;  %v1433_v23 = vor.u32 1.1754944e-38, %v1432_v42  ;;  %v4569_v49 = vpop.xlane.xlu0 %2324  ;;  %v2059_v55 = vor.u32 1.1754944e-38, %v2058_v14  ;;  %v1946_v44 = vpop.f32.mrf.mxu1 }
 0x3bc   : > { %v2067_v29 = vmul.f32 %v2046_v24, %v1943_v22  ;;  %v1425_v5 = vadd.f32 %v4510_v0, %v1424_v39  ;;  %v1979_v31 = vsub.f32 1.0, %v1978_v25  ;;  %v1481_v16 = vadd.f32 %v4502_v13, %v1480_v7 }
 0x3bd   : > { %v2023_v34 = vadd.f32 %v3283_v35, %v2022_v47  ;;  %vm1483_vm11 = vweird.f32 %v4502_v13  ;;  %vm2057_vm12 = vcmp.eq.f32.partialorder %v2056_v27, 8.507059e+37  ;;  %vm1482_vm13 = vweird.f32 %v4398_v40 }
 0x3be   : > { %2663 = vrot.lane.b32.xlu1 %v2067_v29, %s3350_s10  ;;  %v3287_v45 = vpop.eup %3286  ;;  %v4550_v3 = vpop.xlane.xlu2 %1261  ;;  %v1488_v39 = vand.u32 2147483648, %v4398_v40  ;;  %vm4583_vm14 = vmor %vm1482_vm13, %vm1483_vm11  ;;  %v1486_v25 = vand.u32 2147483647, %v4398_v40  ;;  %vm1983_vm15 = vweird.f32 %v4539_v12  ;;  %v1960_v14 = vand.u32 2147483648, %v4518_v32 }
 0x3bf   : > { %v4552_v60 = vpop.eup %3288  ;;  %v2048_v53 = vmul.f32 %v3287_v45, %v4520_v20  ;;  %v2027_v11 = vsel %vm2026_vm2, %v3283_v35, %v2023_v34  ;;  %3290 = vrcp.f32 %v4550_v3  ;;  %v1429_v35 = vsel %vm1428_vm6, %v4510_v0, %v1425_v5 }
 0x3c0   : > { %v2032_v9 = vsel %vm2029_vm5, %v2031_v54, %v2027_v11  ;;  %v1950_v33 = vmul.f32 %v4552_v60, %v4518_v32  ;;  %vm2053_vm7 = vweird.f32 %v3287_v45  ;;  %v1434_v24 = vsel %vm1431_vm9, %v1433_v23, %v1429_v35 }
 0x3c1   : > { %v2049_v41 = vsub.f32 1.0, %v2048_v53  ;;  %v2066_v43 = vmul.f32 %v2032_v9, %v4488_v15  ;;  %vm2054_vm10 = vmor %vm2052_vm8, %vm2053_vm7  ;;  %v1980_v15 = vmul.f32 %v4539_v12, %v1979_v31  ;;  %3292 = vrcp.f32 %v4569_v49 }
 0x3c2   : > { %v1951_v0 = vsub.f32 1.0, %v1950_v33  ;;  %v1520_v52 = vmul.f32 %v1434_v24, %v4392_v2  ;;  %v1485_v34 = vsel %vm4583_vm14, %v4502_v13, %v1481_v16  ;;  %v1489_v40 = vor.u32 1.1754944e-38, %v1488_v39 }
 0x3c3   : > { %v2050_v36 = vmul.f32 %v3287_v45, %v2049_v41  ;;  %2661 = vrot.lane.b32.xlu0 %v2066_v43, %s3350_s10  ;;  %v1988_v53 = vand.u32 2147483648, %v4444_v30  ;;  %vm1982_vm2 = vweird.f32 %v4444_v30  ;;  %v1986_v5 = vand.u32 2147483647, %v4444_v30 }
 0x3c4   : > { %v1952_v7 = vmul.f32 %v4552_v60, %v1951_v0  ;;  %vm1487_vm3 = vcmp.eq.f32.partialorder %v1486_v25, 8.507059e+37  ;;  %vm4601_vm4 = vmor %vm1982_vm2, %vm1983_vm15  ;;  %vm1955_vm5 = vweird.f32 %v4552_v60  ;;  %vm1954_vm7 = vweird.f32 %v4518_v32 }
 0x3c5   : > { %v2051_v8 = vadd.f32 %v3287_v45, %v2050_v36  ;;  %v4577_v20 = vpop.eup %3290  ;;  %v1490_v42 = vsel %vm1487_vm3, %v1489_v40, %v1485_v34  ;;  %v1989_v33 = vor.u32 1.1754944e-38, %v1988_v53  ;;  %vm1987_vm6 = vcmp.eq.f32.partialorder %v1986_v5, 8.507059e+37  ;;  %vm1956_vm8 = vmor %vm1954_vm7, %vm1955_vm5 }
 0x3c6   : > { %v4571_v22 = vpop.xlane.xlu2 %1791  ;;  %v1506_v2 = vmul.f32 %v4577_v20, %v4550_v3  ;;  %v1953_v48 = vadd.f32 %v4552_v60, %v1952_v7  ;;  %v1524_v27 = vmul.f32 %v1490_v42, %v4394_v56  ;;  %v1958_v36 = vand.u32 2147483647, %v4518_v32 }
 0x3c7   : > { %v2055_v29 = vsel %vm2054_vm10, %v3287_v45, %v2051_v8  ;;  %3294 = vrcp.f32 %v4571_v22  ;;  %v1981_v45 = vadd.f32 %v4539_v12, %v1980_v15  ;;  %v4605_v11 = vpop.eup %3292  ;;  %v1961_v56 = vor.u32 1.1754944e-38, %v1960_v14 }
 0x3c8   : > { %v2060_v47 = vsel %vm2057_vm12, %v2059_v55, %v2055_v29  ;;  %v1507_v31 = vsub.f32 1.0, %v1506_v2  ;;  %v1957_v8 = vsel %vm1956_vm8, %v4552_v60, %v1953_v48  ;;  %v1871_v55 = vpop.f32.mrf.mxu0  ;;  %vm1959_vm9 = vcmp.eq.f32.partialorder %v1958_v36, 8.507059e+37 }
 0x3c9   : > { %v2068_v54 = vmul.f32 %v2060_v47, %v1946_v44  ;;  %v1985_v9 = vsel %vm4601_vm4, %v4539_v12, %v1981_v45  ;;  %v2492_v12 = vmul.f32 %v4605_v11, %v4569_v49  ;;  %v1962_v32 = vsel %vm1959_vm9, %v1961_v56, %v1957_v8 }
 0x3ca   : > { %v1990_v43 = vsel %vm1987_vm6, %v1989_v33, %v1985_v9  ;;  %v1508_v35 = vmul.f32 %v4577_v20, %v1507_v31  ;;  %vm1511_vm10 = vweird.f32 %v4577_v20  ;;  %v1516_v39 = vand.u32 2147483648, %v4550_v3 }
 0x3cb   : > { %2665 = vrot.lane.b32.xlu0 %v2068_v54, %s3350_s10  ;;  %v2063_v24 = vmul.f32 %v1990_v43, %v1871_v55  ;;  %v2493_v16 = vsub.f32 1.0, %v2492_v12  ;;  %vm1510_vm11 = vweird.f32 %v4550_v3  ;;  %v2061_v60 = vmul.f32 %v1962_v32, %v4432_v19 }
 0x3cc   : > { %2621 = vrot.lane.b32.xlu2 %v1520_v52, %s3349_s9  ;;  %v1509_v0 = vadd.f32 %v4577_v20, %v1508_v35  ;;  %v1514_v47 = vand.u32 2147483647, %v4550_v3  ;;  %vm1512_vm12 = vmor %vm1510_vm11, %vm1511_vm10  ;;  %v1517_v34 = vor.u32 1.1754944e-38, %v1516_v39  ;;  %vm2497_vm14 = vweird.f32 %v4605_v11 }
 0x3cd   : > { %v4615_v30 = vpop.eup %3294  ;;  %v2494_v44 = vmul.f32 %v4605_v11, %v2493_v16  ;;  %v2002_v40 = vand.u32 2147483648, %v4571_v22  ;;  %vm2496_vm2 = vweird.f32 %v4569_v49  ;;  %vm1996_vm3 = vweird.f32 %v4571_v22 }
 0x3ce   : > { %v4608_v41 = vpop.xlane.xlu2 %2336  ;;  %v1992_v23 = vmul.f32 %v4615_v30, %v4571_v22  ;;  %v1513_v25 = vsel %vm1512_vm12, %v4577_v20, %v1509_v0  ;;  %vm1515_vm13 = vcmp.eq.f32.partialorder %v1514_v47, 8.507059e+37  ;;  %vm1997_vm15 = vweird.f32 %v4615_v30  ;;  %vm4653_vm4 = vmor %vm2496_vm2, %vm2497_vm14 }
 0x3cf   : > { %3296 = vrcp.f32 %v4608_v41  ;;  %v1518_v7 = vsel %vm1515_vm13, %v1517_v34, %v1513_v25  ;;  %v2495_v2 = vadd.f32 %v4605_v11, %v2494_v44  ;;  %v2502_v20 = vand.u32 2147483648, %v4569_v49  ;;  %vm1998_vm5 = vmor %vm1996_vm3, %vm1997_vm15  ;;  %v2479_v43 = vpop.f32.mrf.mxu1 }
 0x3d0   : > { %v1993_v15 = vsub.f32 1.0, %v1992_v23  ;;  %v1874_v19 = vpop.f32.mrf.mxu0  ;;  %v1526_v53 = vmul.f32 %v1518_v7, %v4412_v58  ;;  %v2500_v13 = vand.u32 2147483647, %v4569_v49  ;;  %v2000_v42 = vand.u32 2147483647, %v4571_v22 }
 0x3d1   : > { %v2499_v48 = vsel %vm4653_vm4, %v4605_v11, %v2495_v2  ;;  %v2003_v33 = vor.u32 1.1754944e-38, %v2002_v40  ;;  %v2558_v35 = vand.u32 2147483648, %v4608_v41  ;;  %vm2552_vm10 = vweird.f32 %v4608_v41 }
 0x3d2   : > { %v1994_v52 = vmul.f32 %v4615_v30, %v1993_v15  ;;  %vm2501_vm6 = vcmp.eq.f32.partialorder %v2500_v13, 8.507059e+37  ;;  %vm2001_vm7 = vcmp.eq.f32.partialorder %v2000_v42, 8.507059e+37 }
 0x3d3   : > { %2655 = vrot.lane.b32.xlu0 %v2063_v24, %s3350_s10  ;;  %v2556_v24 = vand.u32 2147483647, %v4608_v41  ;;  %v2559_v39 = vor.u32 1.1754944e-38, %v2558_v35 }
 0x3d4   : > { %2629 = vrot.lane.b32.xlu2 %v1524_v27, %s3349_s9  ;;  %v1995_v54 = vadd.f32 %v4615_v30, %v1994_v52  ;;  %v2503_v27 = vor.u32 1.1754944e-38, %v2502_v20 }
 0x3d5   : > { %v4632_v29 = vpop.eup %3296  ;;  %vm2557_vm15 = vcmp.eq.f32.partialorder %v2556_v24, 8.507059e+37 }
 0x3d6   : > { %v2548_v63 = vmul.f32 %v4632_v29, %v4608_v41  ;;  %v1999_v58 = vsel %vm1998_vm5, %v4615_v30, %v1995_v54  ;;  %v2504_v36 = vsel %vm2501_vm6, %v2503_v27, %v2499_v48  ;;  %vm2553_vm8 = vweird.f32 %v4632_v29 }
 0x3d7   : > { %v2004_v22 = vsel %vm2001_vm7, %v2003_v33, %v1999_v58  ;;  %vm2554_vm11 = vmor %vm2552_vm10, %vm2553_vm8 }
 0x3d8   : > { %v2549_v3 = vsub.f32 1.0, %v2548_v63  ;;  %v2064_v32 = vmul.f32 %v2004_v22, %v1874_v19 }
 0x3da   : > { %v2550_v9 = vmul.f32 %v4632_v29, %v2549_v3 }
 0x3dc   : > { %2651 = vrot.lane.b32.xlu2 %v2061_v60, %s3350_s10  ;;  %v2551_v12 = vadd.f32 %v4632_v29, %v2550_v9 }
 0x3dd   : > { %v2340_v45 = vpop.xlane.xlu0 %2339 }
 0x3de   : > { %3298 = vrcp.f32 %v2340_v45  ;;  %v2572_v23 = vand.u32 2147483648, %v2340_v45  ;;  %v2570_v30 = vand.u32 2147483647, %v2340_v45  ;;  %vm2566_vm12 = vweird.f32 %v2340_v45 }
 0x3df   : > { %v2555_v15 = vsel %vm2554_vm11, %v4632_v29, %v2551_v12  ;;  %vm912_vm11 = vweird.f32 %v4261_v18 }
 0x3e0   : > { %v2573_v0 = vor.u32 1.1754944e-38, %v2572_v23  ;;  %vm2571_vm14 = vcmp.eq.f32.partialorder %v2570_v30, 8.507059e+37  ;;  %v2560_v41 = vsel %vm2557_vm15, %v2559_v39, %v2555_v15  ;;  %vm954_vm15 = vweird.f32 %v4442_v62 }
 0x3e1   : > { %v2607_v34 = vmul.f32 %v2560_v41, %v2479_v43 }
 0x3e4   : > { %v3299_v31 = vpop.eup %3298  ;;  %2633 = vrot.lane.b32.xlu2 %v1526_v53, %s3349_s9 }
 0x3e5   : > { %v2562_v14 = vmul.f32 %v3299_v31, %v2340_v45  ;;  %vm2567_vm9 = vweird.f32 %v3299_v31 }
 0x3e6   : > { %vm2568_vm13 = vmor %vm2566_vm12, %vm2567_vm9  ;;  %v2482_v63 = vpop.f32.mrf.mxu1 }
 0x3e7   : > { %v2563_v49 = vsub.f32 1.0, %v2562_v14 }
 0x3e8   : > { %v2407_v8 = vpop.f32.mrf.mxu0 }
 0x3e9   : > { %v2564_v11 = vmul.f32 %v3299_v31, %v2563_v49  ;;  %v2603_v55 = vmul.f32 %v2504_v36, %v2407_v8 }
 0x3ea   : > { %v2328_v56 = vpop.xlane.xlu1 %2327 }
 0x3eb   : > { %3300 = vrcp.f32 %v2328_v56  ;;  %v2565_v16 = vadd.f32 %v3299_v31, %v2564_v11  ;;  %2683 = vrot.lane.b32.xlu1 %v2603_v55, %s3351_s11  ;;  %v2516_v7 = vand.u32 2147483648, %v2328_v56  ;;  %v2514_v19 = vand.u32 2147483647, %v2328_v56 }
 0x3ec   : > { %2657 = vrot.lane.b32.xlu2 %v2064_v32, %s3350_s10  ;;  %vm2510_vm3 = vweird.f32 %v2328_v56  ;;  %3302 = vrcp.f32 %v4261_v18  ;;  %v918_v32 = vand.u32 2147483648, %v4261_v18 }
 0x3ed   : > { %v2569_v60 = vsel %vm2568_vm13, %v3299_v31, %v2565_v16  ;;  %v2517_v2 = vor.u32 1.1754944e-38, %v2516_v7  ;;  %vm2515_vm5 = vcmp.eq.f32.partialorder %v2514_v19, 8.507059e+37  ;;  %v960_v7 = vand.u32 2147483648, %v4442_v62 }
 0x3ee   : > { %v2574_v47 = vsel %vm2571_vm14, %v2573_v0, %v2569_v60  ;;  %v916_v0 = vand.u32 2147483647, %v4261_v18 }
 0x3ef   : > { %v2608_v25 = vmul.f32 %v2574_v47, %v2482_v63 }
 0x3f0   : > { %vm917_vm13 = vcmp.eq.f32.partialorder %v916_v0, 8.507059e+37 }
 0x3f1   : > { %v3301_v52 = vpop.eup %3300 }
 0x3f2   : > { %v2506_v44 = vmul.f32 %v3301_v52, %v2328_v56  ;;  %vm2511_vm2 = vweird.f32 %v3301_v52  ;;  %v3303_v42 = vpop.eup %3302 }
 0x3f3   : > { %2693 = vrot.lane.b32.xlu1 %v2608_v25, %s3351_s11  ;;  %vm2512_vm4 = vmor %vm2510_vm3, %vm2511_vm2  ;;  %v2410_v20 = vpop.f32.mrf.mxu0  ;;  %v908_v58 = vmul.f32 %v3303_v42, %v4261_v18  ;;  %vm913_vm10 = vweird.f32 %v3303_v42 }
 0x3f4   : > { %v2507_v45 = vsub.f32 1.0, %v2506_v44  ;;  %2691 = vrot.lane.b32.xlu2 %v2607_v34, %s3351_s11  ;;  %vm914_vm12 = vmor %vm912_vm11, %vm913_vm10 }
 0x3f5   : > { %v909_v36 = vsub.f32 1.0, %v908_v58 }
 0x3f6   : > { %v2508_v29 = vmul.f32 %v3301_v52, %v2507_v45 }
 0x3f7   : > { %v910_v8 = vmul.f32 %v3303_v42, %v909_v36 }
 0x3f8   : > { %v2509_v3 = vadd.f32 %v3301_v52, %v2508_v29 }
 0x3f9   : > { %v911_v24 = vadd.f32 %v3303_v42, %v910_v8 }
 0x3fa   : > { %v2513_v54 = vsel %vm2512_vm4, %v3301_v52, %v2509_v3  ;;  %v4675_v40 = vpop.xlane.xlu0 %2333  ;;  %v919_v52 = vor.u32 1.1754944e-38, %v918_v32 }
 0x3fb   : > { %v2518_v53 = vsel %vm2515_vm5, %v2517_v2, %v2513_v54  ;;  %v915_v41 = vsel %vm914_vm12, %v3303_v42, %v911_v24  ;;  %v961_v54 = vor.u32 1.1754944e-38, %v960_v7  ;;  %vm2538_vm5 = vweird.f32 %v4675_v40 }
 0x3fc   : > { %v2604_v5 = vmul.f32 %v2518_v53, %v2410_v20  ;;  %v920_v25 = vsel %vm917_vm13, %v919_v52, %v915_v41 }
 0x3fd   : > { %v980_v18 = vmul.f32 %v920_v25, %v4121_v57 }
 0x3fe   : > { %2685 = vrot.lane.b32.xlu0 %v2604_v5, %s3351_s11 }
 0x400   : > { %v4679_v9 = vpop.f32.mrf.mxu1 }
 0x402   : > { %v2346_v13 = vpop.xlane.xlu0 %2345 }
 0x403   : > { %3304 = vrcp.f32 %v2346_v13  ;;  %v2600_v14 = vand.u32 2147483648, %v2346_v13  ;;  %v2598_v49 = vand.u32 2147483647, %v2346_v13  ;;  %vm2594_vm7 = vweird.f32 %v2346_v13 }
 0x404   : > { %3306 = vrcp.f32 %v4442_v62 }
 0x405   : > { %v2601_v12 = vor.u32 1.1754944e-38, %v2600_v14  ;;  %vm2599_vm9 = vcmp.eq.f32.partialorder %v2598_v49, 8.507059e+37  ;;  %3308 = vrcp.f32 %v4675_v40  ;;  %v2542_v14 = vand.u32 2147483647, %v4675_v40 }
 0x408   : > { %v2488_v11 = vpop.f32.mrf.mxu1 }
 0x409   : > { %v3305_v31 = vpop.eup %3304 }
 0x40a   : > { %v2590_v48 = vmul.f32 %v3305_v31, %v2346_v13  ;;  %vm2595_vm6 = vweird.f32 %v3305_v31  ;;  %v3307_v43 = vpop.eup %3306 }
 0x40b   : > { %vm2596_vm8 = vmor %vm2594_vm7, %vm2595_vm6  ;;  %v950_v55 = vmul.f32 %v3307_v43, %v4442_v62  ;;  %v3309_v47 = vpop.eup %3308  ;;  %vm955_vm14 = vweird.f32 %v3307_v43  ;;  %vm2543_vm7 = vcmp.eq.f32.partialorder %v2542_v14, 8.507059e+37 }
 0x40c   : > { %v2591_v33 = vsub.f32 1.0, %v2590_v48  ;;  %v2534_v44 = vmul.f32 %v3309_v47, %v4675_v40  ;;  %vm956_vm2 = vmor %vm954_vm15, %vm955_vm14  ;;  %vm2539_vm4 = vweird.f32 %v3309_v47  ;;  %v2544_v48 = vand.u32 2147483648, %v4675_v40 }
 0x40d   : > { %v951_v16 = vsub.f32 1.0, %v950_v55  ;;  %vm2540_vm6 = vmor %vm2538_vm5, %vm2539_vm4  ;;  %vm926_vm4 = vweird.f32 %v4266_v17 }
 0x40e   : > { %v2592_v27 = vmul.f32 %v3305_v31, %v2591_v33  ;;  %v2535_v29 = vsub.f32 1.0, %v2534_v44  ;;  %v2545_v36 = vor.u32 1.1754944e-38, %v2544_v48 }
 0x40f   : > { %v952_v63 = vmul.f32 %v3307_v43, %v951_v16 }
 0x410   : > { %v2593_v22 = vadd.f32 %v3305_v31, %v2592_v27  ;;  %v4683_v35 = vpop.permute.xlu1 %2627  ;;  %v2536_v20 = vmul.f32 %v3309_v47, %v2535_v29 }
 0x411   : > { %v953_v34 = vadd.f32 %v3307_v43, %v952_v63 }
 0x412   : > { %v2597_v23 = vsel %vm2596_vm8, %v3305_v31, %v2593_v22 }
 0x413   : > { %v2602_v30 = vsel %vm2599_vm9, %v2601_v12, %v2597_v23  ;;  %v957_v2 = vsel %vm956_vm2, %v3307_v43, %v953_v34 }
 0x414   : > { %v2610_v56 = vmul.f32 %v2602_v30, %v2488_v11 }
 0x415   : > { %v4689_v15 = vpop.permute.xlu0 %2619 }
 0x416   : > { %2697 = vrot.lane.b32.xlu1 %v2610_v56, %s3351_s11 }
 0x418   : > { %v2624_v39 = vpop.permute.xlu1 %2623 }
 0x419   : > { %v4695_v60 = vsel %vm527_vm0, %v4160_v10, %v2624_v39  ;;  %v958_v10 = vand.u32 2147483647, %v4442_v62  ;;  %v2537_v62 = vadd.f32 %v3309_v47, %v2536_v20 }
 0x41b   : > { %vm959_vm3 = vcmp.eq.f32.partialorder %v958_v10, 8.507059e+37  ;;  %v2541_v27 = vsel %vm2540_vm6, %v3309_v47, %v2537_v62  ;;  %v932_v62 = vand.u32 2147483648, %v4266_v17 }
 0x41c   : > { %v962_v53 = vsel %vm959_vm3, %v961_v54, %v957_v2  ;;  %v2546_v23 = vsel %vm2543_vm7, %v2545_v36, %v2541_v27  ;;  %vm2715_vm3 = vcmask 130048   ;;  %vm2724_vm7 = vcmask 195584  }
 0x41d   : > { %v2626_v19 = vpop.permute.xlu0 %2625  ;;  %v983_v42 = vmul.f32 %v962_v53, %v4123_v26  ;;  %v933_v27 = vor.u32 1.1754944e-38, %v932_v62 }
 0x41e   : > { %v4705_v3 = vsel %vm527_vm0, %v980_v18, %v2626_v19 }
 0x41f   : > { %v4698_v45 = vpop.xlane.xlu2 %2330 }
 0x420   : > { %3310 = vrcp.f32 %v4698_v45  ;;  %v2530_v41 = vand.u32 2147483648, %v4698_v45  ;;  %vm2524_vm13 = vweird.f32 %v4698_v45  ;;  %v2528_v63 = vand.u32 2147483647, %v4698_v45  ;;  %v4747_v48 = vpop.permute.xlu1 %2653 }
 0x422   : > { %v2531_v7 = vor.u32 1.1754944e-38, %v2530_v41  ;;  %vm2529_vm15 = vcmp.eq.f32.partialorder %v2528_v63, 8.507059e+37 }
 0x425   : > { %v2632_v31 = vpop.permute.xlu0 %2631 }
 0x426   : > { %v3311_v5 = vpop.eup %3310  ;;  %v4712_v33 = vsel %vm527_vm0, %v983_v42, %v2632_v31  ;;  %v930_v31 = vand.u32 2147483647, %v4266_v17 }
 0x427   : > { %v2343_v57 = vpop.xlane.xlu2 %2342  ;;  %v2520_v58 = vmul.f32 %v3311_v5, %v4698_v45  ;;  %vm2525_vm11 = vweird.f32 %v3311_v5 }
 0x428   : > { %3312 = vrcp.f32 %v2343_v57  ;;  %v2413_v13 = vpop.f32.mrf.mxu0  ;;  %v2586_v30 = vand.u32 2147483648, %v2343_v57  ;;  %v2584_v40 = vand.u32 2147483647, %v2343_v57  ;;  %vm2580_vm9 = vweird.f32 %v2343_v57  ;;  %vm2526_vm14 = vmor %vm2524_vm13, %vm2525_vm11 }
 0x429   : > { %v2521_v22 = vsub.f32 1.0, %v2520_v58  ;;  %3314 = vrcp.f32 %v4266_v17  ;;  %vm931_vm6 = vcmp.eq.f32.partialorder %v930_v31, 8.507059e+37  ;;  %vm2828_vm13 = vcmask 1043456   ;;  %v2763_v31 = vld.sshfl [vmem:[#allocation1 + $0x30] sm:$0xff pattern:$0x75316420] }
 0x42a   : > { %v2587_v16 = vor.u32 1.1754944e-38, %v2586_v30  ;;  %vm2585_vm12 = vcmp.eq.f32.partialorder %v2584_v40, 8.507059e+37  ;;  %3316 = vrcp.f32 %v4380_v38  ;;  %v2760_v30 = vld.sshfl [vmem:[#allocation1] sm:$0xff pattern:$0x75316420] }
 0x42b   : > { %v2522_v24 = vmul.f32 %v3311_v5, %v2521_v22  ;;  %3318 = vrcp.f32 %v4257_v1 }
 0x42c   : > { %3320 = vrcp.f32 %v4384_v51 }
 0x42d   : > { %v4718_v55 = vpop.permute.xlu0 %2659  ;;  %v2523_v0 = vadd.f32 %v3311_v5, %v2522_v24 }
 0x42e   : > { %v3313_v49 = vpop.eup %3312 }
 0x42f   : > { %v2576_v26 = vmul.f32 %v3313_v49, %v2343_v57  ;;  %v4716_v43 = vpop.permute.xlu2 %2621  ;;  %vm2581_vm8 = vweird.f32 %v3313_v49  ;;  %v3315_v34 = vpop.eup %3314  ;;  %v2527_v18 = vsel %vm2526_vm14, %v3311_v5, %v2523_v0  ;;  %vm884_vm14 = vweird.f32 %v4257_v1 }
 0x430   : > { %v2416_v12 = vpop.f32.mrf.mxu0  ;;  %vm2582_vm10 = vmor %vm2580_vm9, %vm2581_vm8  ;;  %v922_v10 = vmul.f32 %v3315_v34, %v4266_v17  ;;  %v2532_v29 = vsel %vm2529_vm15, %v2531_v7, %v2527_v18  ;;  %v3317_v20 = vpop.eup %3316  ;;  %vm927_vm2 = vweird.f32 %v3315_v34  ;;  %vm940_vm9 = vweird.f32 %v4380_v38 }
 0x431   : > { %v2577_v8 = vsub.f32 1.0, %v2576_v26  ;;  %v2606_v11 = vmul.f32 %v2546_v23, %v2416_v12  ;;  %v2605_v2 = vmul.f32 %v2532_v29, %v2413_v13  ;;  %v936_v5 = vmul.f32 %v3317_v20, %v4380_v38  ;;  %vm928_vm5 = vmor %vm926_vm4, %vm927_vm2  ;;  %v3319_v22 = vpop.eup %3318  ;;  %v4755_v17 = vpop.permute.xlu1 %2663 }
 0x432   : > { %v923_v54 = vsub.f32 1.0, %v922_v10  ;;  %v880_v12 = vmul.f32 %v3319_v22, %v4257_v1  ;;  %vm941_vm8 = vweird.f32 %v3317_v20  ;;  %v890_v29 = vand.u32 2147483648, %v4257_v1 }
 0x433   : > { %v2578_v56 = vmul.f32 %v3313_v49, %v2577_v8  ;;  %2689 = vrot.lane.b32.xlu1 %v2606_v11, %s3351_s11  ;;  %v937_v58 = vsub.f32 1.0, %v936_v5  ;;  %v2762_v5 = vld.sshfl [vmem:[#allocation1 + $0x20] sm:$0xff pattern:$0x75316420] }
 0x434   : > { %v881_v40 = vsub.f32 1.0, %v880_v12 }
 0x435   : > { %v2579_v32 = vadd.f32 %v3313_v49, %v2578_v56  ;;  %v4728_v44 = vpop.permute.xlu0 %2661  ;;  %v946_v56 = vand.u32 2147483648, %v4380_v38 }
 0x437   : > { %v4722_v39 = vpop.permute.xlu2 %2629  ;;  %v2583_v47 = vsel %vm2582_vm10, %v3313_v49, %v2579_v32  ;;  %vm942_vm10 = vmor %vm940_vm9, %vm941_vm8  ;;  %v947_v41 = vor.u32 1.1754944e-38, %v946_v56 }
 0x438   : > { %v2588_v52 = vsel %vm2585_vm12, %v2587_v16, %v2583_v47  ;;  %v2761_v47 = vld.sshfl [vmem:[#allocation1 + $0x10] sm:$0xff pattern:$0x75316420]  ;;  %vm885_vm12 = vweird.f32 %v3319_v22 }
 0x439   : > { %v2609_v25 = vmul.f32 %v2588_v52, %v4679_v9  ;;  %v924_v9 = vmul.f32 %v3315_v34, %v923_v54  ;;  %v882_v52 = vmul.f32 %v3319_v22, %v881_v40  ;;  %vm886_vm15 = vmor %vm884_vm14, %vm885_vm12 }
 0x43b   : > { %2695 = vrot.lane.b32.xlu2 %v2609_v25, %s3351_s11  ;;  %v925_v57 = vadd.f32 %v3315_v34, %v924_v9  ;;  %v883_v7 = vadd.f32 %v3319_v22, %v882_v52  ;;  %v891_v9 = vor.u32 1.1754944e-38, %v890_v29 }
 0x43d   : > { %v4733_v45 = vpop.permute.xlu0 %2665  ;;  %v929_v14 = vsel %vm928_vm5, %v3315_v34, %v925_v57  ;;  %vm968_vm5 = vweird.f32 %v4384_v51 }
 0x43e   : > { %v934_v26 = vsel %vm931_vm6, %v933_v27, %v929_v14 }
 0x43f   : > { %v2652_v19 = vpop.permute.xlu2 %2651  ;;  %v981_v23 = vmul.f32 %v934_v26, %v4115_v46  ;;  %v944_v46 = vand.u32 2147483647, %v4380_v38 }
 0x441   : > { %v2711_v11 = vsel %vm527_vm0, %v981_v23, %v4683_v35  ;;  %vm945_vm11 = vcmp.eq.f32.partialorder %v944_v46, 8.507059e+37 }
 0x443   : > { %2687 = vrot.lane.b32.xlu2 %v2605_v2, %s3351_s11  ;;  %v887_v2 = vsel %vm886_vm15, %v3319_v22, %v883_v7 }
 0x445   : > { %v2656_v42 = vpop.permute.xlu0 %2655 }
 0x446   : > { %v4743_v13 = vsel %vm2715_vm3, %v4695_v60, %v2656_v42  ;;  %v938_v60 = vmul.f32 %v3317_v20, %v937_v58  ;;  %v3321_v58 = vpop.eup %3320 }
 0x447   : > { %v4736_v53 = vpop.permute.xlu2 %2633  ;;  %vm969_vm4 = vweird.f32 %v3321_v58 }
 0x448   : > { %v939_v8 = vadd.f32 %v3317_v20, %v938_v60  ;;  %vm970_vm6 = vmor %vm968_vm5, %vm969_vm4 }
 0x44a   : > { %v943_v0 = vsel %vm942_vm10, %v3317_v20, %v939_v8 }
 0x44b   : > { %v948_v63 = vsel %vm945_vm11, %v947_v41, %v943_v0 }
 0x44c   : > { %v982_v10 = vmul.f32 %v948_v63, %v4119_v50 }
 0x44f   : > { %v2658_v49 = vpop.permute.xlu2 %2657 }
 0x450   : > { %v4751_v36 = vsel %vm2715_vm3, %v4705_v3, %v2658_v49  ;;  %v2720_v3 = vsel %vm2715_vm3, %v2711_v11, %v4718_v55  ;;  %v2707_v55 = vsel %vm527_vm0, %v4108_v4, %v4689_v15  ;;  %v888_v15 = vand.u32 2147483647, %v4257_v1 }
 0x451   : > { %v2716_v25 = vsel %vm2715_vm3, %v2707_v55, %v2652_v19 }
 0x452   : > { %vm889_vm2 = vcmp.eq.f32.partialorder %v888_v15, 8.507059e+37 }
 0x453   : > { %v892_v42 = vsel %vm889_vm2, %v891_v9, %v887_v2 }
 0x454   : > { %v978_v27 = vmul.f32 %v892_v42, %v4113_v61 }
 0x456   : > { %v2708_v49 = vsel %vm527_vm0, %v978_v27, %v4716_v43 }
 0x457   : > { %v2692_v24 = vpop.permute.xlu2 %2691  ;;  %v2717_v22 = vsel %vm2715_vm3, %v2708_v49, %v4747_v48  ;;  %v974_v48 = vand.u32 2147483648, %v4384_v51 }
 0x458   : > { %v2729_v32 = vsel %vm2724_vm7, %v2720_v3, %v2692_v24 }
 0x459   : > { %v2776_v16 = vadd.f32 %v2760_v30, %v2729_v32  ;;  %v975_v40 = vor.u32 1.1754944e-38, %v974_v48 }
 0x45b   : > { %v2796_v35 = vrot.slane %v2776_v16, 4  ;;  %2801 = vst [vmem:[#allocation1 + $0x1] ss:$2 sm:$0xff] %v2776_v16 }
 0x45d   : > { %v2684_v38 = vpop.permute.xlu1 %2683  ;;  %2804 = vst [vmem:[#allocation1 + $0x11] ss:$2 sm:$0xff] %v2796_v35 }
 0x45e   : > { %v2725_v34 = vsel %vm2724_vm7, %v2716_v25, %v2684_v38 }
 0x45f   : > { %v2772_v18 = vadd.f32 %v4242_v28, %v2725_v34  ;;  %v2712_v28 = vsel %vm527_vm0, %v982_v10, %v4722_v39 }
 0x460   : > { %v2721_v57 = vsel %vm2715_vm3, %v2712_v28, %v4728_v44  ;;  %v964_v44 = vmul.f32 %v3321_v58, %v4384_v51 }
 0x461   : > { %v2784_v4 = vrot.slane %v2772_v18, 4 }
 0x462   : > { %v2802_v19 = vld.sshfl [vmem:[#allocation1] sm:$0xff pattern:$0x75316420]  ;;  %v965_v60 = vsub.f32 1.0, %v964_v44 }
 0x463   : > { %v2829_v50 = vsel %vm2828_vm13, %v2772_v18, %v2802_v19 }
 0x464   : > { %2837 = vst.msk [vmem:[%s4777_s14] sm:$0xff] %vm664_vm1, %v2829_v50  ;;  %v2805_v54 = vld.sshfl [vmem:[#allocation1 + $0x10] sm:$0xff pattern:$0x75316420]  ;;  %v966_v30 = vmul.f32 %v3321_v58, %v965_v60 }
 0x465   : > { %v2694_v20 = vpop.permute.xlu1 %2693  ;;  %v2830_v1 = vsel %vm2828_vm13, %v2784_v4, %v2805_v54 }
 0x466   : > { %v2730_v39 = vsel %vm2724_vm7, %v2721_v57, %v2694_v20  ;;  %2838 = vst.msk [vmem:[%s4777_s14 + $0x8] sm:$0xff] %vm664_vm1, %v2830_v1  ;;  %v967_v43 = vadd.f32 %v3321_v58, %v966_v30 }
 0x467   : > { %v2777_v62 = vadd.f32 %v2761_v47, %v2730_v39 }
 0x468   : > { %v971_v24 = vsel %vm970_vm6, %v3321_v58, %v967_v43 }
 0x469   : > { %v2797_v14 = vrot.slane %v2777_v62, 4  ;;  %2807 = vst [vmem:[#allocation1 + $0x21] ss:$2 sm:$0xff] %v2777_v62 }
 0x46b   : > { %2810 = vst [vmem:[#allocation1 + $0x31] ss:$2 sm:$0xff] %v2797_v14 }
 0x470   : > { %v2686_v26 = vpop.permute.xlu0 %2685  ;;  %v2808_v8 = vld.sshfl [vmem:[#allocation1 + $0x20] sm:$0xff pattern:$0x75316420] }
 0x471   : > { %v2726_v12 = vsel %vm2724_vm7, %v2717_v22, %v2686_v26 }
 0x472   : > { %v2773_v23 = vadd.f32 %v4247_v59, %v2726_v12  ;;  %v2811_v56 = vld.sshfl [vmem:[#allocation1 + $0x30] sm:$0xff pattern:$0x75316420]  ;;  %v972_v59 = vand.u32 2147483647, %v4384_v51  ;;  %v2722_v51 = vsel %vm2715_vm3, %v4712_v33, %v4755_v17 }
 0x474   : > { %v2785_v11 = vrot.slane %v2773_v23, 4  ;;  %v2831_v61 = vsel %vm2828_vm13, %v2773_v23, %v2808_v8  ;;  %vm973_vm8 = vcmp.eq.f32.partialorder %v972_v59, 8.507059e+37 }
 0x475   : > { %2839 = vst.msk [vmem:[%s4777_s14 + $0x10] sm:$0xff] %vm664_vm1, %v2831_v61  ;;  %v976_v46 = vsel %vm973_vm8, %v975_v40, %v971_v24 }
 0x476   : > { %v2832_v3 = vsel %vm2828_vm13, %v2785_v11, %v2811_v56  ;;  %v984_v32 = vmul.f32 %v976_v46, %v4129_v21 }
 0x477   : > { %2840 = vst.msk [vmem:[%s4777_s14 + $0x18] sm:$0xff] %vm664_vm1, %v2832_v3 }
 0x478   : > { %v2714_v16 = vsel %vm527_vm0, %v984_v32, %v4736_v53 }
 0x479   : > { %v2723_v47 = vsel %vm2715_vm3, %v2714_v16, %v4733_v45 }
 0x488   : > { %v2698_v0 = vpop.permute.xlu1 %2697 }
 0x489   : > { %v2732_v41 = vsel %vm2724_vm7, %v2723_v47, %v2698_v0 }
 0x48a   : > { %v2779_v35 = vadd.f32 %v2763_v31, %v2732_v41 }
 0x48c   : > { %v2799_v52 = vrot.slane %v2779_v35, 4  ;;  %2816 = vst [vmem:[#allocation1 + $0x21] ss:$2 sm:$0xff] %v2779_v35 }
 0x48e   : > { %2818 = vst [vmem:[#allocation1 + $0x31] ss:$2 sm:$0xff] %v2799_v52 }
 0x493   : > { %v2817_v4 = vld.sshfl [vmem:[#allocation1 + $0x20] sm:$0xff pattern:$0x75316420] }
 0x495   : > { %v2696_v21 = vpop.permute.xlu2 %2695  ;;  %v2819_v28 = vld.sshfl [vmem:[#allocation1 + $0x30] sm:$0xff pattern:$0x75316420] }
 0x496   : > { %v2731_v55 = vsel %vm2724_vm7, %v2722_v51, %v2696_v21 }
 0x497   : > { %v2778_v53 = vadd.f32 %v2762_v5, %v2731_v55 }
 0x499   : > { %v2798_v63 = vrot.slane %v2778_v53, 4  ;;  %2812 = vst [vmem:[#allocation1 + $0x1] ss:$2 sm:$0xff] %v2778_v53 }
 0x49b   : > { %2814 = vst [vmem:[#allocation1 + $0x11] ss:$2 sm:$0xff] %v2798_v63 }
 0x49d   : > { %v2688_v45 = vpop.permute.xlu2 %2687 }
 0x49e   : > { %v2727_v25 = vsel %vm2724_vm7, %v4743_v13, %v2688_v45 }
 0x49f   : > { %v2774_v38 = vadd.f32 %v4215_v37, %v2727_v25 }
 0x4a0   : > { %v2813_v34 = vld.sshfl [vmem:[#allocation1] sm:$0xff pattern:$0x75316420] }
 0x4a1   : > { %v2786_v18 = vrot.slane %v2774_v38, 4  ;;  %v2833_v33 = vsel %vm2828_vm13, %v2774_v38, %v2813_v34 }
 0x4a2   : > { %v2815_v17 = vld.sshfl [vmem:[#allocation1 + $0x10] sm:$0xff pattern:$0x75316420]  ;;  %2841 = vst.msk [vmem:[%s4777_s14 + $0x20] sm:$0xff] %vm664_vm1, %v2833_v33 }
 0x4a3   : > { %v2834_v7 = vsel %vm2828_vm13, %v2786_v18, %v2815_v17 }
 0x4a4   : > { %2842 = vst.msk [vmem:[%s4777_s14 + $0x28] sm:$0xff] %vm664_vm1, %v2834_v7 }
 0x4a5   : > { %v2690_v10 = vpop.permute.xlu1 %2689 }
 0x4a6   : > { %v2728_v29 = vsel %vm2724_vm7, %v4751_v36, %v2690_v10 }
 0x4a7   : > { %v2775_v13 = vadd.f32 %v4221_v6, %v2728_v29 }
 0x4a9   : > { %v2787_v37 = vrot.slane %v2775_v13, 4  ;;  %v2835_v15 = vsel %vm2828_vm13, %v2775_v13, %v2817_v4 }
 0x4aa   : > { %2843 = vst.msk [vmem:[%s4777_s14 + $0x30] sm:$0xff] %vm664_vm1, %v2835_v15 }
 0x4ab   : > { %v2836_v19 = vsel %vm2828_vm13, %v2787_v37, %v2819_v28 }
 0x4ac   : > { %2844 = vst.msk [vmem:[%s4777_s14 + $0x38] sm:$0xff] %vm664_vm1, %v2836_v19 }
 0x4ad PF: > { %s14_s17 = sadd.s32 1, %s3344_s17   ;;  %s4959_s15 = smov %s3340_s16 }
 0x4ae   : > { %p11_p5 = scmp.ge.s32.totalorder %s14_s17, 4   ;;  %s4960_s16 = smov %s4962_s18 }
 0x4b0   :  { %13 = sbr.rel (!%p11_p5) target bundleno = 2 (0x2), region = 270 }

</bundles_post_ra>
